<compile_context>
chip_gen: v6e
topology: v6e:2x2x1
jax: 0.10.0
libtpu: 0.0.40
codegen_flags: <defaults>
</compile_context>

<pallas_src>
import math

import jax
import jax.numpy as jnp
from jax.experimental import pallas as pl
from jax.experimental.pallas import tpu as pltpu

_LANE = 128


def _round_up(a, m):
    return ((a + m - 1) // m) * m


def _sigmoid(x):
    # sigmoid(x) == 0.5 * tanh(x/2) + 0.5 : one EUP transcendental instead of
    # exp + reciprocal (both would hit the single EUP unit).
    return 0.5 * jnp.tanh(0.5 * x) + 0.5


def _make_lstm_kernel(n_layer, seq, hidden):
    H = hidden
    # Unroll the serial time loop so the scheduler sees across iterations.
    if seq <= 16:
        unroll = True
    elif seq % 4 == 0:
        unroll = 4
    elif seq % 2 == 0:
        unroll = 2
    else:
        unroll = 1

    def kernel(*refs):
        x_ref = refs[0]                         # (seq*bt, in_dim)
        layer_refs = refs[1:1 + 3 * n_layer]    # (w_ih, w_hh, b) per layer
        wc_ref = refs[1 + 3 * n_layer]
        bc_ref = refs[2 + 3 * n_layer]
        o_ref = refs[3 + 3 * n_layer]
        g_buf = refs[4 + 3 * n_layer]           # (seq*bt, 4H) gate scratch
        h_buf = refs[5 + 3 * n_layer]           # (seq*bt or bt, H) scratch
        bt = o_ref.shape[0]

        h_last = None
        for l in range(n_layer):
            w_ih = layer_refs[3 * l + 0]
            w_hh = layer_refs[3 * l + 1]
            b_ref = layer_refs[3 * l + 2]
            seq_in = x_ref if l == 0 else h_buf
            mm_dtype = w_hh.dtype
            # Only non-top layers need their full output sequence kept; the top
            # layer only feeds its final hidden state to the classifier.
            write_seq = l < n_layer - 1

            # Hoisted input projection: one MXU-saturating matmul for all
            # timesteps (M = seq*bt), bias folded in once (no per-step
            # broadcast), result parked in VMEM scratch.
            pre = jnp.dot(seq_in[...], w_ih[...],
                          preferred_element_type=jnp.float32)
            g_buf[...] = (pre + b_ref[...].astype(jnp.float32)).astype(g_buf.dtype)

            def step(t, carry, w_hh=w_hh, write_seq=write_seq,
                     mm_dtype=mm_dtype):
                h, c = carry                       # h: mm_dtype, c: float32
                row = pl.multiple_of(t * bt, bt)
                gates = (g_buf[pl.ds(row, bt), :].astype(jnp.float32)
                         + jnp.dot(h, w_hh[...],
                                   preferred_element_type=jnp.float32))
                # PyTorch gate order: i, f, g, o.
                # NOTE: slices are lane-aligned when hidden % 128 == 0.
                i_g = _sigmoid(gates[:, 0 * H:1 * H])
                f_g = _sigmoid(gates[:, 1 * H:2 * H])
                g_g = jnp.tanh(gates[:, 2 * H:3 * H])
                o_g = _sigmoid(gates[:, 3 * H:4 * H])
                c_new = f_g * c + i_g * g_g
                h_new = (o_g * jnp.tanh(c_new)).astype(mm_dtype)
                if write_seq:
                    h_buf[pl.ds(row, bt), :] = h_new.astype(h_buf.dtype)
                return h_new, c_new

            h0 = jnp.zeros((bt, H), mm_dtype)
            c0 = jnp.zeros((bt, H), jnp.float32)
            h_last, _ = jax.lax.fori_loop(0, seq, step, (h0, c0),
                                          unroll=unroll)

        out = (jnp.dot(h_last, wc_ref[...], preferred_element_type=jnp.float32)
               + bc_ref[...].astype(jnp.float32))
        o_ref[...] = out.astype(o_ref.dtype)

    return kernel


def rnn_forward(x, params, *, n_layer, n_class, batch_tile=None):
    """Forward of Rnn: multi-layer LSTM (h0=c0=0), last timestep, Linear."""
    orig_B, S, D = x.shape
    hidden = params["w_hh_0"].shape[0]
    ncp = params["w_c"].shape[1]          # classifier width, padded to 128 lanes
    w_dtype = params["w_ih_0"].dtype

    # Cast activations to bf16 when the weights are bf16 (halves x HBM traffic
    # and the double-buffered x tile, uses the bf16 MXU path); keep f32
    # otherwise so the f32 path stays numerically exact.
    if w_dtype == jnp.bfloat16:
        x = x.astype(jnp.bfloat16)
    sc_dtype = jnp.bfloat16 if w_dtype == jnp.bfloat16 else jnp.float32
    sc_item = jnp.dtype(sc_dtype).itemsize
    x_item = jnp.dtype(x.dtype).itemsize

    weight_args = []
    for l in range(n_layer):
        weight_args += [params[f"w_ih_{l}"], params[f"w_hh_{l}"], params[f"b_{l}"]]
    weight_args += [params["w_c"], params["b_c"]]
    weight_bytes = sum(int(a.size) * a.dtype.itemsize for a in weight_args)

    def vmem_need(bt):
        # double-buffered x/out tiles + weights, single-buffered scratch, slack.
        x_tile = S * bt * D * x_item
        out_tile = bt * ncp * 4
        g_scr = S * bt * 4 * hidden * sc_item
        h_scr = (S if n_layer > 1 else 1) * bt * hidden * sc_item
        return 2 * (x_tile + out_tile + weight_bytes) + g_scr + h_scr + (2 << 20)

    # Generation-aware VMEM budget (~128 MiB on v5e/v6e, 64 MiB/TC on v7x).
    cap = 64 << 20
    num_tc = 1
    try:
        info = pltpu.get_tpu_info()
        cap = int(getattr(info, "vmem_capacity_bytes", cap))
        num_tc = int(getattr(info, "num_cores",
                             getattr(info, "core_count", 1)) or 1)
    except Exception:
        pass
    budget = int(cap * 0.8)
    num_tc = 2 if num_tc >= 2 else 1

    if batch_tile is None:
        # Prefer one grid step: on single-TC chips the grid is a serial loop,
        # so splitting the batch just re-runs the whole time recurrence with a
        # worse MXU M-fill.  On multi-TC chips start with one tile per core.
        # Split further (powers of two -> even grid) only when VMEM-bound.
        n_tiles = num_tc if (num_tc > 1 and orig_B >= 8 * num_tc) else 1
        while True:
            B = _round_up(orig_B, 8 * n_tiles)
            bt = B // n_tiles
            if vmem_need(bt) <= budget or bt <= 8:
                break
            n_tiles *= 2
        batch_tile = bt
    else:
        assert batch_tile % 8 == 0, "batch_tile must be a multiple of 8"
        B = _round_up(orig_B, batch_tile)
        n_tiles = B // batch_tile

    if B != orig_B:
        x = jnp.pad(x, ((0, B - orig_B), (0, 0), (0, 0)))

    # Per grid step the kernel wants a lane-dense (seq*batch_tile, in_dim) slab
    # where row t*bt + j is batch element j of the tile at time t: the hoisted
    # input projection is then one big matmul and the recurrence reads rows
    # [t*bt, (t+1)*bt) -- no in-kernel reshapes.
    x_t = (x.reshape(n_tiles, batch_tile, S, D)
             .transpose(0, 2, 1, 3)
             .reshape(n_tiles, S * batch_tile, D))

    full = lambda shape: pl.BlockSpec(shape, lambda i: (0, 0))
    in_specs = [pl.BlockSpec((None, S * batch_tile, D), lambda i: (i, 0, 0))]
    args = [x_t]
    for l in range(n_layer):
        din = D if l == 0 else hidden
        in_specs += [full((din, 4 * hidden)),
                     full((hidden, 4 * hidden)),
                     full((1, 4 * hidden))]
        args += [params[f"w_ih_{l}"], params[f"w_hh_{l}"], params[f"b_{l}"]]
    in_specs += [full((hidden, ncp)), full((1, ncp))]
    args += [params["w_c"], params["b_c"]]

    # Cost estimate so XLA schedules surrounding HLO around the custom call.
    flops = 2 * B * hidden * ncp
    transcendentals = 0
    din = D
    for l in range(n_layer):
        flops += 2 * B * S * (din + hidden) * 4 * hidden
        transcendentals += 5 * B * S * hidden    # 3 sigmoid + 2 tanh per step
        din = hidden
    bytes_accessed = int(x_t.size) * x_item + weight_bytes + B * ncp * 4

    vmem_limit = int(min(budget, max(vmem_need(batch_tile), 16 << 20)))
    h_rows = S * batch_tile if n_layer > 1 else batch_tile

    out = pl.pallas_call(
        _make_lstm_kernel(n_layer, S, hidden),
        out_shape=jax.ShapeDtypeStruct((B, ncp), jnp.float32),
        grid_spec=pltpu.PrefetchScalarGridSpec(
            num_scalar_prefetch=0,
            grid=(n_tiles,),
            in_specs=in_specs,
            out_specs=pl.BlockSpec((batch_tile, ncp), lambda i: (i, 0)),
            scratch_shapes=[
                pltpu.VMEM((S * batch_tile, 4 * hidden), sc_dtype),  # gates
                pltpu.VMEM((h_rows, hidden), sc_dtype),              # h seq
            ],
        ),
        compiler_params=pltpu.CompilerParams(
            dimension_semantics=("parallel",),
            vmem_limit_bytes=vmem_limit,
        ),
        cost_estimate=pl.CostEstimate(
            flops=int(flops),
            transcendentals=int(transcendentals),
            bytes_accessed=int(bytes_accessed),
        ),
    )(*args)

    return out[:orig_B, :n_class]


def init_params(key, in_dim, hidden, n_layer, n_class, weight_dtype=jnp.float32):
    """Deterministic init mimicking nn.LSTM / nn.Linear (uniform +/- 1/sqrt(hidden)).

    Weights are stored pre-transposed ((in, out) layout) so the kernel computes
    x @ W directly; b_{l} folds PyTorch's b_ih + b_hh into one (1, 4*hidden) bias.
    The classifier is zero-padded to a 128-lane-multiple output width.
    Biases stay float32 even when weight_dtype is bfloat16.
    """
    ncp = ((n_class + _LANE - 1) // _LANE) * _LANE
    bound = 1.0 / math.sqrt(hidden)
    ks = iter(jax.random.split(key, 3 * n_layer + 2))
    p = {}
    for l in range(n_layer):
        din = in_dim if l == 0 else hidden
        p[f"w_ih_{l}"] = jax.random.uniform(
            next(ks), (din, 4 * hidden), jnp.float32, -bound, bound).astype(weight_dtype)
        p[f"w_hh_{l}"] = jax.random.uniform(
            next(ks), (hidden, 4 * hidden), jnp.float32, -bound, bound).astype(weight_dtype)
        p[f"b_{l}"] = jax.random.uniform(
            next(ks), (1, 4 * hidden), jnp.float32, -2.0 * bound, 2.0 * bound)
    wc = jax.random.uniform(next(ks), (hidden, n_class), jnp.float32, -bound, bound)
    bc = jax.random.uniform(next(ks), (1, n_class), jnp.float32, -bound, bound)
    p["w_c"] = jnp.zeros((hidden, ncp), jnp.float32).at[:, :n_class].set(wc).astype(weight_dtype)
    p["b_c"] = jnp.zeros((1, ncp), jnp.float32).at[:, :n_class].set(bc)
    return p


def reference_forward(x, params, *, n_layer, n_class):
    """Pure-JAX float32 reference of the PyTorch Rnn forward."""
    B, S, _ = x.shape
    H = params["w_hh_0"].shape[0]
    layer_in = x.astype(jnp.float32)
    h = None
    for l in range(n_layer):
        w_ih = params[f"w_ih_{l}"].astype(jnp.float32)
        w_hh = params[f"w_hh_{l}"].astype(jnp.float32)
        b = params[f"b_{l}"].astype(jnp.float32)
        h = jnp.zeros((B, H), jnp.float32)
        c = jnp.zeros((B, H), jnp.float32)
        outs = []
        for t in range(S):
            gates = layer_in[:, t, :] @ w_ih + h @ w_hh + b
            i_g = jax.nn.sigmoid(gates[:, 0 * H:1 * H])
            f_g = jax.nn.sigmoid(gates[:, 1 * H:2 * H])
            g_g = jnp.tanh(gates[:, 2 * H:3 * H])
            o_g = jax.nn.sigmoid(gates[:, 3 * H:4 * H])
            c = f_g * c + i_g * g_g
            h = o_g * jnp.tanh(c)
            outs.append(h)
        layer_in = jnp.stack(outs, axis=1)
    out = (h @ params["w_c"].astype(jnp.float32)
           + params["b_c"].astype(jnp.float32))
    return out[:, :n_class]


if __name__ == "__main__":
    key = jax.random.PRNGKey(0)
    k_x, k_p = jax.random.split(key)

    # Small shapes consistent with the module: x is (batch, seq, in_dim).
    batch, seq, in_dim, hidden, n_layer, n_class = 8, 8, 32, 128, 2, 10

    x = jax.random.normal(k_x, (batch, seq, in_dim), jnp.float32)

    # float32 params: tight check against the pure-JAX reference.
    params = init_params(k_p, in_dim, hidden, n_layer, n_class,
                         weight_dtype=jnp.float32)
    out = jax.block_until_ready(
        rnn_forward(x, params, n_layer=n_layer, n_class=n_class))
    ref = reference_forward(x, params, n_layer=n_layer, n_class=n_class)
    assert out.shape == (batch, n_class)
    assert jnp.allclose(out, ref, atol=1e-4, rtol=1e-4), float(
        jnp.max(jnp.abs(out - ref)))

    # bfloat16 weights (recommended fast path on v6e/v7x MXU): smoke-check that
    # the mixed-precision path compiles and produces finite values.
    params_bf16 = init_params(k_p, in_dim, hidden, n_layer, n_class,
                              weight_dtype=jnp.bfloat16)
    out_bf16 = jax.block_until_ready(
        rnn_forward(x, params_bf16, n_layer=n_layer, n_class=n_class))
    assert out_bf16.shape == (batch, n_class)
    assert bool(jnp.all(jnp.isfinite(out_bf16)))

    print("KERNEL_OK")
</pallas_src>

<mosaic_0001>
module attributes {stable_mosaic.version = 11 : i64} {
  func.func @kernel(%arg0: i32, %arg1: memref<1x64x32xf32, #tpu.memory_space<vmem>>, %arg2: memref<32x512xf32, #tpu.memory_space<vmem>>, %arg3: memref<128x512xf32, #tpu.memory_space<vmem>>, %arg4: memref<1x512xf32, #tpu.memory_space<vmem>>, %arg5: memref<128x512xf32, #tpu.memory_space<vmem>>, %arg6: memref<128x512xf32, #tpu.memory_space<vmem>>, %arg7: memref<1x512xf32, #tpu.memory_space<vmem>>, %arg8: memref<128x128xf32, #tpu.memory_space<vmem>>, %arg9: memref<1x128xf32, #tpu.memory_space<vmem>>, %arg10: memref<8x128xf32, #tpu.memory_space<vmem>>, %arg11: memref<64x512xf32, #tpu.memory_space<vmem>>, %arg12: memref<64x128xf32, #tpu.memory_space<vmem>>) attributes {dimension_semantics = [#tpu.dimension_semantics<parallel>], iteration_bounds = array<i64: 1>, scalar_prefetch = 0 : i64, scratch_operands = 2 : i64, tpu.core_type = #tpu.core_type<tc>, window_params = [{transform_indices = @transform_0, window_bounds = array<i64: 1, 64, 32>}, {pipeline_mode = #tpu.pipeline_mode<synchronous>, transform_indices = @transform_1, window_bounds = array<i64: 32, 512>}, {pipeline_mode = #tpu.pipeline_mode<synchronous>, transform_indices = @transform_2, window_bounds = array<i64: 128, 512>}, {pipeline_mode = #tpu.pipeline_mode<synchronous>, transform_indices = @transform_3, window_bounds = array<i64: 1, 512>}, {pipeline_mode = #tpu.pipeline_mode<synchronous>, transform_indices = @transform_4, window_bounds = array<i64: 128, 512>}, {pipeline_mode = #tpu.pipeline_mode<synchronous>, transform_indices = @transform_5, window_bounds = array<i64: 128, 512>}, {pipeline_mode = #tpu.pipeline_mode<synchronous>, transform_indices = @transform_6, window_bounds = array<i64: 1, 512>}, {pipeline_mode = #tpu.pipeline_mode<synchronous>, transform_indices = @transform_7, window_bounds = array<i64: 128, 128>}, {pipeline_mode = #tpu.pipeline_mode<synchronous>, transform_indices = @transform_8, window_bounds = array<i64: 1, 128>}, {transform_indices = @transform_9, window_bounds = array<i64: 8, 128>}]} {
    %c0 = arith.constant 0 : index
    %c0_0 = arith.constant 0 : index
    %c0_1 = arith.constant 0 : index
    %0 = vector.load %arg1[%c0, %c0_0, %c0_1] : memref<1x64x32xf32, #tpu.memory_space<vmem>>, vector<1x64x32xf32>
    %1 = vector.shape_cast %0 : vector<1x64x32xf32> to vector<64x32xf32>
    %c0_2 = arith.constant 0 : index
    %c0_3 = arith.constant 0 : index
    %2 = vector.load %arg2[%c0_2, %c0_3] : memref<32x512xf32, #tpu.memory_space<vmem>>, vector<32x512xf32>
    %cst = arith.constant dense<0.000000e+00> : vector<64x512xf32>
    %3 = tpu.matmul %1, %2, %cst {dimension_numbers = #tpu.dot_dimension_numbers<[1], [0], [0], [1], [0, 0, 1, 1], [], []>} : vector<64x32xf32>, vector<32x512xf32>, vector<64x512xf32> -> vector<64x512xf32>
    %c0_4 = arith.constant 0 : index
    %c0_5 = arith.constant 0 : index
    %4 = vector.load %arg4[%c0_4, %c0_5] : memref<1x512xf32, #tpu.memory_space<vmem>>, vector<1x512xf32>
    %5 = vector.broadcast %4 : vector<1x512xf32> to vector<64x512xf32>
    %6 = arith.addf %3, %5 : vector<64x512xf32>
    %c0_6 = arith.constant 0 : index
    %c0_7 = arith.constant 0 : index
    %7 = vector.load %arg11[%c0_6, %c0_7] : memref<64x512xf32, #tpu.memory_space<vmem>>, vector<64x512xf32>
    tpu.vector_store %arg11[%c0_6, %c0_7], %6 {strides = array<i32>} : memref<64x512xf32, #tpu.memory_space<vmem>>, vector<64x512xf32>,
    %cst_8 = arith.constant 0.000000e+00 : f32
    %8 = vector.broadcast %cst_8 : f32 to vector<8x128xf32>
    %cst_9 = arith.constant 0.000000e+00 : f32
    %9 = vector.broadcast %cst_9 : f32 to vector<8x128xf32>
    %c0_i32 = arith.constant 0 : i32
    %c8_i32 = arith.constant 8 : i32
    %10 = arith.muli %c0_i32, %c8_i32 : i32
    %11 = tpu.assume_multiple %10, 8 : i32
    %12 = arith.index_cast %11 : i32 to index
    %c0_10 = arith.constant 0 : index
    %13 = vector.load %arg11[%12, %c0_10] : memref<64x512xf32, #tpu.memory_space<vmem>>, vector<8x512xf32>
    %c0_11 = arith.constant 0 : index
    %c0_12 = arith.constant 0 : index
    %14 = vector.load %arg3[%c0_11, %c0_12] : memref<128x512xf32, #tpu.memory_space<vmem>>, vector<128x512xf32>
    %cst_13 = arith.constant dense<0.000000e+00> : vector<8x512xf32>
    %15 = tpu.matmul %8, %14, %cst_13 {dimension_numbers = #tpu.dot_dimension_numbers<[1], [0], [0], [1], [0, 0, 1, 1], [], []>} : vector<8x128xf32>, vector<128x512xf32>, vector<8x512xf32> -> vector<8x512xf32>
    %16 = arith.addf %13, %15 : vector<8x512xf32>
    %17 = vector.extract_strided_slice %16 {offsets = [0, 0], sizes = [8, 128], strides = [1, 1]} : vector<8x512xf32> to vector<8x128xf32>
    %cst_14 = arith.constant 5.000000e-01 : f32
    %18 = vector.broadcast %cst_14 : f32 to vector<8x128xf32>
    %19 = arith.mulf %18, %17 : vector<8x128xf32>
    %20 = math.tanh %19 : vector<8x128xf32>
    %cst_15 = arith.constant 5.000000e-01 : f32
    %21 = vector.broadcast %cst_15 : f32 to vector<8x128xf32>
    %22 = arith.mulf %21, %20 : vector<8x128xf32>
    %cst_16 = arith.constant 5.000000e-01 : f32
    %23 = vector.broadcast %cst_16 : f32 to vector<8x128xf32>
    %24 = arith.addf %22, %23 : vector<8x128xf32>
    %25 = vector.extract_strided_slice %16 {offsets = [0, 128], sizes = [8, 128], strides = [1, 1]} : vector<8x512xf32> to vector<8x128xf32>
    %cst_17 = arith.constant 5.000000e-01 : f32
    %26 = vector.broadcast %cst_17 : f32 to vector<8x128xf32>
    %27 = arith.mulf %26, %25 : vector<8x128xf32>
    %28 = math.tanh %27 : vector<8x128xf32>
    %cst_18 = arith.constant 5.000000e-01 : f32
    %29 = vector.broadcast %cst_18 : f32 to vector<8x128xf32>
    %30 = arith.mulf %29, %28 : vector<8x128xf32>
    %cst_19 = arith.constant 5.000000e-01 : f32
    %31 = vector.broadcast %cst_19 : f32 to vector<8x128xf32>
    %32 = arith.addf %30, %31 : vector<8x128xf32>
    %33 = vector.extract_strided_slice %16 {offsets = [0, 256], sizes = [8, 128], strides = [1, 1]} : vector<8x512xf32> to vector<8x128xf32>
    %34 = math.tanh %33 : vector<8x128xf32>
    %35 = vector.extract_strided_slice %16 {offsets = [0, 384], sizes = [8, 128], strides = [1, 1]} : vector<8x512xf32> to vector<8x128xf32>
    %cst_20 = arith.constant 5.000000e-01 : f32
    %36 = vector.broadcast %cst_20 : f32 to vector<8x128xf32>
    %37 = arith.mulf %36, %35 : vector<8x128xf32>
    %38 = math.tanh %37 : vector<8x128xf32>
    %cst_21 = arith.constant 5.000000e-01 : f32
    %39 = vector.broadcast %cst_21 : f32 to vector<8x128xf32>
    %40 = arith.mulf %39, %38 : vector<8x128xf32>
    %cst_22 = arith.constant 5.000000e-01 : f32
    %41 = vector.broadcast %cst_22 : f32 to vector<8x128xf32>
    %42 = arith.addf %40, %41 : vector<8x128xf32>
    %43 = arith.mulf %32, %9 : vector<8x128xf32>
    %44 = arith.mulf %24, %34 : vector<8x128xf32>
    %45 = arith.addf %43, %44 : vector<8x128xf32>
    %46 = math.tanh %45 : vector<8x128xf32>
    %47 = arith.mulf %42, %46 : vector<8x128xf32>
    %48 = arith.index_cast %11 : i32 to index
    %c0_23 = arith.constant 0 : index
    %49 = vector.load %arg12[%48, %c0_23] : memref<64x128xf32, #tpu.memory_space<vmem>>, vector<8x128xf32>
    tpu.vector_store %arg12[%48, %c0_23], %47 {strides = array<i32>} : memref<64x128xf32, #tpu.memory_space<vmem>>, vector<8x128xf32>,
    %c1_i32 = arith.constant 1 : i32
    %c8_i32_24 = arith.constant 8 : i32
    %50 = arith.muli %c1_i32, %c8_i32_24 : i32
    %51 = tpu.assume_multiple %50, 8 : i32
    %52 = arith.index_cast %51 : i32 to index
    %c0_25 = arith.constant 0 : index
    %53 = vector.load %arg11[%52, %c0_25] : memref<64x512xf32, #tpu.memory_space<vmem>>, vector<8x512xf32>
    %c0_26 = arith.constant 0 : index
    %c0_27 = arith.constant 0 : index
    %54 = vector.load %arg3[%c0_26, %c0_27] : memref<128x512xf32, #tpu.memory_space<vmem>>, vector<128x512xf32>
    %cst_28 = arith.constant dense<0.000000e+00> : vector<8x512xf32>
    %55 = tpu.matmul %47, %54, %cst_28 {dimension_numbers = #tpu.dot_dimension_numbers<[1], [0], [0], [1], [0, 0, 1, 1], [], []>} : vector<8x128xf32>, vector<128x512xf32>, vector<8x512xf32> -> vector<8x512xf32>
    %56 = arith.addf %53, %55 : vector<8x512xf32>
    %57 = vector.extract_strided_slice %56 {offsets = [0, 0], sizes = [8, 128], strides = [1, 1]} : vector<8x512xf32> to vector<8x128xf32>
    %cst_29 = arith.constant 5.000000e-01 : f32
    %58 = vector.broadcast %cst_29 : f32 to vector<8x128xf32>
    %59 = arith.mulf %58, %57 : vector<8x128xf32>
    %60 = math.tanh %59 : vector<8x128xf32>
    %cst_30 = arith.constant 5.000000e-01 : f32
    %61 = vector.broadcast %cst_30 : f32 to vector<8x128xf32>
    %62 = arith.mulf %61, %60 : vector<8x128xf32>
    %cst_31 = arith.constant 5.000000e-01 : f32
    %63 = vector.broadcast %cst_31 : f32 to vector<8x128xf32>
    %64 = arith.addf %62, %63 : vector<8x128xf32>
    %65 = vector.extract_strided_slice %56 {offsets = [0, 128], sizes = [8, 128], strides = [1, 1]} : vector<8x512xf32> to vector<8x128xf32>
    %cst_32 = arith.constant 5.000000e-01 : f32
    %66 = vector.broadcast %cst_32 : f32 to vector<8x128xf32>
    %67 = arith.mulf %66, %65 : vector<8x128xf32>
    %68 = math.tanh %67 : vector<8x128xf32>
    %cst_33 = arith.constant 5.000000e-01 : f32
    %69 = vector.broadcast %cst_33 : f32 to vector<8x128xf32>
    %70 = arith.mulf %69, %68 : vector<8x128xf32>
    %cst_34 = arith.constant 5.000000e-01 : f32
    %71 = vector.broadcast %cst_34 : f32 to vector<8x128xf32>
    %72 = arith.addf %70, %71 : vector<8x128xf32>
    %73 = vector.extract_strided_slice %56 {offsets = [0, 256], sizes = [8, 128], strides = [1, 1]} : vector<8x512xf32> to vector<8x128xf32>
    %74 = math.tanh %73 : vector<8x128xf32>
    %75 = vector.extract_strided_slice %56 {offsets = [0, 384], sizes = [8, 128], strides = [1, 1]} : vector<8x512xf32> to vector<8x128xf32>
    %cst_35 = arith.constant 5.000000e-01 : f32
    %76 = vector.broadcast %cst_35 : f32 to vector<8x128xf32>
    %77 = arith.mulf %76, %75 : vector<8x128xf32>
    %78 = math.tanh %77 : vector<8x128xf32>
    %cst_36 = arith.constant 5.000000e-01 : f32
    %79 = vector.broadcast %cst_36 : f32 to vector<8x128xf32>
    %80 = arith.mulf %79, %78 : vector<8x128xf32>
    %cst_37 = arith.constant 5.000000e-01 : f32
    %81 = vector.broadcast %cst_37 : f32 to vector<8x128xf32>
    %82 = arith.addf %80, %81 : vector<8x128xf32>
    %83 = arith.mulf %72, %45 : vector<8x128xf32>
    %84 = arith.mulf %64, %74 : vector<8x128xf32>
    %85 = arith.addf %83, %84 : vector<8x128xf32>
    %86 = math.tanh %85 : vector<8x128xf32>
    %87 = arith.mulf %82, %86 : vector<8x128xf32>
    %88 = arith.index_cast %51 : i32 to index
    %c0_38 = arith.constant 0 : index
    %89 = vector.load %arg12[%88, %c0_38] : memref<64x128xf32, #tpu.memory_space<vmem>>, vector<8x128xf32>
    tpu.vector_store %arg12[%88, %c0_38], %87 {strides = array<i32>} : memref<64x128xf32, #tpu.memory_space<vmem>>, vector<8x128xf32>,
    %c2_i32 = arith.constant 2 : i32
    %c8_i32_39 = arith.constant 8 : i32
    %90 = arith.muli %c2_i32, %c8_i32_39 : i32
    %91 = tpu.assume_multiple %90, 8 : i32
    %92 = arith.index_cast %91 : i32 to index
    %c0_40 = arith.constant 0 : index
    %93 = vector.load %arg11[%92, %c0_40] : memref<64x512xf32, #tpu.memory_space<vmem>>, vector<8x512xf32>
    %c0_41 = arith.constant 0 : index
    %c0_42 = arith.constant 0 : index
    %94 = vector.load %arg3[%c0_41, %c0_42] : memref<128x512xf32, #tpu.memory_space<vmem>>, vector<128x512xf32>
    %cst_43 = arith.constant dense<0.000000e+00> : vector<8x512xf32>
    %95 = tpu.matmul %87, %94, %cst_43 {dimension_numbers = #tpu.dot_dimension_numbers<[1], [0], [0], [1], [0, 0, 1, 1], [], []>} : vector<8x128xf32>, vector<128x512xf32>, vector<8x512xf32> -> vector<8x512xf32>
    %96 = arith.addf %93, %95 : vector<8x512xf32>
    %97 = vector.extract_strided_slice %96 {offsets = [0, 0], sizes = [8, 128], strides = [1, 1]} : vector<8x512xf32> to vector<8x128xf32>
    %cst_44 = arith.constant 5.000000e-01 : f32
    %98 = vector.broadcast %cst_44 : f32 to vector<8x128xf32>
    %99 = arith.mulf %98, %97 : vector<8x128xf32>
    %100 = math.tanh %99 : vector<8x128xf32>
    %cst_45 = arith.constant 5.000000e-01 : f32
    %101 = vector.broadcast %cst_45 : f32 to vector<8x128xf32>
    %102 = arith.mulf %101, %100 : vector<8x128xf32>
    %cst_46 = arith.constant 5.000000e-01 : f32
    %103 = vector.broadcast %cst_46 : f32 to vector<8x128xf32>
    %104 = arith.addf %102, %103 : vector<8x128xf32>
    %105 = vector.extract_strided_slice %96 {offsets = [0, 128], sizes = [8, 128], strides = [1, 1]} : vector<8x512xf32> to vector<8x128xf32>
    %cst_47 = arith.constant 5.000000e-01 : f32
    %106 = vector.broadcast %cst_47 : f32 to vector<8x128xf32>
    %107 = arith.mulf %106, %105 : vector<8x128xf32>
    %108 = math.tanh %107 : vector<8x128xf32>
    %cst_48 = arith.constant 5.000000e-01 : f32
    %109 = vector.broadcast %cst_48 : f32 to vector<8x128xf32>
    %110 = arith.mulf %109, %108 : vector<8x128xf32>
    %cst_49 = arith.constant 5.000000e-01 : f32
    %111 = vector.broadcast %cst_49 : f32 to vector<8x128xf32>
    %112 = arith.addf %110, %111 : vector<8x128xf32>
    %113 = vector.extract_strided_slice %96 {offsets = [0, 256], sizes = [8, 128], strides = [1, 1]} : vector<8x512xf32> to vector<8x128xf32>
    %114 = math.tanh %113 : vector<8x128xf32>
    %115 = vector.extract_strided_slice %96 {offsets = [0, 384], sizes = [8, 128], strides = [1, 1]} : vector<8x512xf32> to vector<8x128xf32>
    %cst_50 = arith.constant 5.000000e-01 : f32
    %116 = vector.broadcast %cst_50 : f32 to vector<8x128xf32>
    %117 = arith.mulf %116, %115 : vector<8x128xf32>
    %118 = math.tanh %117 : vector<8x128xf32>
    %cst_51 = arith.constant 5.000000e-01 : f32
    %119 = vector.broadcast %cst_51 : f32 to vector<8x128xf32>
    %120 = arith.mulf %119, %118 : vector<8x128xf32>
    %cst_52 = arith.constant 5.000000e-01 : f32
    %121 = vector.broadcast %cst_52 : f32 to vector<8x128xf32>
    %122 = arith.addf %120, %121 : vector<8x128xf32>
    %123 = arith.mulf %112, %85 : vector<8x128xf32>
    %124 = arith.mulf %104, %114 : vector<8x128xf32>
    %125 = arith.addf %123, %124 : vector<8x128xf32>
    %126 = math.tanh %125 : vector<8x128xf32>
    %127 = arith.mulf %122, %126 : vector<8x128xf32>
    %128 = arith.index_cast %91 : i32 to index
    %c0_53 = arith.constant 0 : index
    %129 = vector.load %arg12[%128, %c0_53] : memref<64x128xf32, #tpu.memory_space<vmem>>, vector<8x128xf32>
    tpu.vector_store %arg12[%128, %c0_53], %127 {strides = array<i32>} : memref<64x128xf32, #tpu.memory_space<vmem>>, vector<8x128xf32>,
    %c3_i32 = arith.constant 3 : i32
    %c8_i32_54 = arith.constant 8 : i32
    %130 = arith.muli %c3_i32, %c8_i32_54 : i32
    %131 = tpu.assume_multiple %130, 8 : i32
    %132 = arith.index_cast %131 : i32 to index
    %c0_55 = arith.constant 0 : index
    %133 = vector.load %arg11[%132, %c0_55] : memref<64x512xf32, #tpu.memory_space<vmem>>, vector<8x512xf32>
    %c0_56 = arith.constant 0 : index
    %c0_57 = arith.constant 0 : index
    %134 = vector.load %arg3[%c0_56, %c0_57] : memref<128x512xf32, #tpu.memory_space<vmem>>, vector<128x512xf32>
    %cst_58 = arith.constant dense<0.000000e+00> : vector<8x512xf32>
    %135 = tpu.matmul %127, %134, %cst_58 {dimension_numbers = #tpu.dot_dimension_numbers<[1], [0], [0], [1], [0, 0, 1, 1], [], []>} : vector<8x128xf32>, vector<128x512xf32>, vector<8x512xf32> -> vector<8x512xf32>
    %136 = arith.addf %133, %135 : vector<8x512xf32>
    %137 = vector.extract_strided_slice %136 {offsets = [0, 0], sizes = [8, 128], strides = [1, 1]} : vector<8x512xf32> to vector<8x128xf32>
    %cst_59 = arith.constant 5.000000e-01 : f32
    %138 = vector.broadcast %cst_59 : f32 to vector<8x128xf32>
    %139 = arith.mulf %138, %137 : vector<8x128xf32>
    %140 = math.tanh %139 : vector<8x128xf32>
    %cst_60 = arith.constant 5.000000e-01 : f32
    %141 = vector.broadcast %cst_60 : f32 to vector<8x128xf32>
    %142 = arith.mulf %141, %140 : vector<8x128xf32>
    %cst_61 = arith.constant 5.000000e-01 : f32
    %143 = vector.broadcast %cst_61 : f32 to vector<8x128xf32>
    %144 = arith.addf %142, %143 : vector<8x128xf32>
    %145 = vector.extract_strided_slice %136 {offsets = [0, 128], sizes = [8, 128], strides = [1, 1]} : vector<8x512xf32> to vector<8x128xf32>
    %cst_62 = arith.constant 5.000000e-01 : f32
    %146 = vector.broadcast %cst_62 : f32 to vector<8x128xf32>
    %147 = arith.mulf %146, %145 : vector<8x128xf32>
    %148 = math.tanh %147 : vector<8x128xf32>
    %cst_63 = arith.constant 5.000000e-01 : f32
    %149 = vector.broadcast %cst_63 : f32 to vector<8x128xf32>
    %150 = arith.mulf %149, %148 : vector<8x128xf32>
    %cst_64 = arith.constant 5.000000e-01 : f32
    %151 = vector.broadcast %cst_64 : f32 to vector<8x128xf32>
    %152 = arith.addf %150, %151 : vector<8x128xf32>
    %153 = vector.extract_strided_slice %136 {offsets = [0, 256], sizes = [8, 128], strides = [1, 1]} : vector<8x512xf32> to vector<8x128xf32>
    %154 = math.tanh %153 : vector<8x128xf32>
    %155 = vector.extract_strided_slice %136 {offsets = [0, 384], sizes = [8, 128], strides = [1, 1]} : vector<8x512xf32> to vector<8x128xf32>
    %cst_65 = arith.constant 5.000000e-01 : f32
    %156 = vector.broadcast %cst_65 : f32 to vector<8x128xf32>
    %157 = arith.mulf %156, %155 : vector<8x128xf32>
    %158 = math.tanh %157 : vector<8x128xf32>
    %cst_66 = arith.constant 5.000000e-01 : f32
    %159 = vector.broadcast %cst_66 : f32 to vector<8x128xf32>
    %160 = arith.mulf %159, %158 : vector<8x128xf32>
    %cst_67 = arith.constant 5.000000e-01 : f32
    %161 = vector.broadcast %cst_67 : f32 to vector<8x128xf32>
    %162 = arith.addf %160, %161 : vector<8x128xf32>
    %163 = arith.mulf %152, %125 : vector<8x128xf32>
    %164 = arith.mulf %144, %154 : vector<8x128xf32>
    %165 = arith.addf %163, %164 : vector<8x128xf32>
    %166 = math.tanh %165 : vector<8x128xf32>
    %167 = arith.mulf %162, %166 : vector<8x128xf32>
    %168 = arith.index_cast %131 : i32 to index
    %c0_68 = arith.constant 0 : index
    %169 = vector.load %arg12[%168, %c0_68] : memref<64x128xf32, #tpu.memory_space<vmem>>, vector<8x128xf32>
    tpu.vector_store %arg12[%168, %c0_68], %167 {strides = array<i32>} : memref<64x128xf32, #tpu.memory_space<vmem>>, vector<8x128xf32>,
    %c4_i32 = arith.constant 4 : i32
    %c8_i32_69 = arith.constant 8 : i32
    %170 = arith.muli %c4_i32, %c8_i32_69 : i32
    %171 = tpu.assume_multiple %170, 8 : i32
    %172 = arith.index_cast %171 : i32 to index
    %c0_70 = arith.constant 0 : index
    %173 = vector.load %arg11[%172, %c0_70] : memref<64x512xf32, #tpu.memory_space<vmem>>, vector<8x512xf32>
    %c0_71 = arith.constant 0 : index
    %c0_72 = arith.constant 0 : index
    %174 = vector.load %arg3[%c0_71, %c0_72] : memref<128x512xf32, #tpu.memory_space<vmem>>, vector<128x512xf32>
    %cst_73 = arith.constant dense<0.000000e+00> : vector<8x512xf32>
    %175 = tpu.matmul %167, %174, %cst_73 {dimension_numbers = #tpu.dot_dimension_numbers<[1], [0], [0], [1], [0, 0, 1, 1], [], []>} : vector<8x128xf32>, vector<128x512xf32>, vector<8x512xf32> -> vector<8x512xf32>
    %176 = arith.addf %173, %175 : vector<8x512xf32>
    %177 = vector.extract_strided_slice %176 {offsets = [0, 0], sizes = [8, 128], strides = [1, 1]} : vector<8x512xf32> to vector<8x128xf32>
    %cst_74 = arith.constant 5.000000e-01 : f32
    %178 = vector.broadcast %cst_74 : f32 to vector<8x128xf32>
    %179 = arith.mulf %178, %177 : vector<8x128xf32>
    %180 = math.tanh %179 : vector<8x128xf32>
    %cst_75 = arith.constant 5.000000e-01 : f32
    %181 = vector.broadcast %cst_75 : f32 to vector<8x128xf32>
    %182 = arith.mulf %181, %180 : vector<8x128xf32>
    %cst_76 = arith.constant 5.000000e-01 : f32
    %183 = vector.broadcast %cst_76 : f32 to vector<8x128xf32>
    %184 = arith.addf %182, %183 : vector<8x128xf32>
    %185 = vector.extract_strided_slice %176 {offsets = [0, 128], sizes = [8, 128], strides = [1, 1]} : vector<8x512xf32> to vector<8x128xf32>
    %cst_77 = arith.constant 5.000000e-01 : f32
    %186 = vector.broadcast %cst_77 : f32 to vector<8x128xf32>
    %187 = arith.mulf %186, %185 : vector<8x128xf32>
    %188 = math.tanh %187 : vector<8x128xf32>
    %cst_78 = arith.constant 5.000000e-01 : f32
    %189 = vector.broadcast %cst_78 : f32 to vector<8x128xf32>
    %190 = arith.mulf %189, %188 : vector<8x128xf32>
    %cst_79 = arith.constant 5.000000e-01 : f32
    %191 = vector.broadcast %cst_79 : f32 to vector<8x128xf32>
    %192 = arith.addf %190, %191 : vector<8x128xf32>
    %193 = vector.extract_strided_slice %176 {offsets = [0, 256], sizes = [8, 128], strides = [1, 1]} : vector<8x512xf32> to vector<8x128xf32>
    %194 = math.tanh %193 : vector<8x128xf32>
    %195 = vector.extract_strided_slice %176 {offsets = [0, 384], sizes = [8, 128], strides = [1, 1]} : vector<8x512xf32> to vector<8x128xf32>
    %cst_80 = arith.constant 5.000000e-01 : f32
    %196 = vector.broadcast %cst_80 : f32 to vector<8x128xf32>
    %197 = arith.mulf %196, %195 : vector<8x128xf32>
    %198 = math.tanh %197 : vector<8x128xf32>
    %cst_81 = arith.constant 5.000000e-01 : f32
    %199 = vector.broadcast %cst_81 : f32 to vector<8x128xf32>
    %200 = arith.mulf %199, %198 : vector<8x128xf32>
    %cst_82 = arith.constant 5.000000e-01 : f32
    %201 = vector.broadcast %cst_82 : f32 to vector<8x128xf32>
    %202 = arith.addf %200, %201 : vector<8x128xf32>
    %203 = arith.mulf %192, %165 : vector<8x128xf32>
    %204 = arith.mulf %184, %194 : vector<8x128xf32>
    %205 = arith.addf %203, %204 : vector<8x128xf32>
    %206 = math.tanh %205 : vector<8x128xf32>
    %207 = arith.mulf %202, %206 : vector<8x128xf32>
    %208 = arith.index_cast %171 : i32 to index
    %c0_83 = arith.constant 0 : index
    %209 = vector.load %arg12[%208, %c0_83] : memref<64x128xf32, #tpu.memory_space<vmem>>, vector<8x128xf32>
    tpu.vector_store %arg12[%208, %c0_83], %207 {strides = array<i32>} : memref<64x128xf32, #tpu.memory_space<vmem>>, vector<8x128xf32>,
    %c5_i32 = arith.constant 5 : i32
    %c8_i32_84 = arith.constant 8 : i32
    %210 = arith.muli %c5_i32, %c8_i32_84 : i32
    %211 = tpu.assume_multiple %210, 8 : i32
    %212 = arith.index_cast %211 : i32 to index
    %c0_85 = arith.constant 0 : index
    %213 = vector.load %arg11[%212, %c0_85] : memref<64x512xf32, #tpu.memory_space<vmem>>, vector<8x512xf32>
    %c0_86 = arith.constant 0 : index
    %c0_87 = arith.constant 0 : index
    %214 = vector.load %arg3[%c0_86, %c0_87] : memref<128x512xf32, #tpu.memory_space<vmem>>, vector<128x512xf32>
    %cst_88 = arith.constant dense<0.000000e+00> : vector<8x512xf32>
    %215 = tpu.matmul %207, %214, %cst_88 {dimension_numbers = #tpu.dot_dimension_numbers<[1], [0], [0], [1], [0, 0, 1, 1], [], []>} : vector<8x128xf32>, vector<128x512xf32>, vector<8x512xf32> -> vector<8x512xf32>
    %216 = arith.addf %213, %215 : vector<8x512xf32>
    %217 = vector.extract_strided_slice %216 {offsets = [0, 0], sizes = [8, 128], strides = [1, 1]} : vector<8x512xf32> to vector<8x128xf32>
    %cst_89 = arith.constant 5.000000e-01 : f32
    %218 = vector.broadcast %cst_89 : f32 to vector<8x128xf32>
    %219 = arith.mulf %218, %217 : vector<8x128xf32>
    %220 = math.tanh %219 : vector<8x128xf32>
    %cst_90 = arith.constant 5.000000e-01 : f32
    %221 = vector.broadcast %cst_90 : f32 to vector<8x128xf32>
    %222 = arith.mulf %221, %220 : vector<8x128xf32>
    %cst_91 = arith.constant 5.000000e-01 : f32
    %223 = vector.broadcast %cst_91 : f32 to vector<8x128xf32>
    %224 = arith.addf %222, %223 : vector<8x128xf32>
    %225 = vector.extract_strided_slice %216 {offsets = [0, 128], sizes = [8, 128], strides = [1, 1]} : vector<8x512xf32> to vector<8x128xf32>
    %cst_92 = arith.constant 5.000000e-01 : f32
    %226 = vector.broadcast %cst_92 : f32 to vector<8x128xf32>
    %227 = arith.mulf %226, %225 : vector<8x128xf32>
    %228 = math.tanh %227 : vector<8x128xf32>
    %cst_93 = arith.constant 5.000000e-01 : f32
    %229 = vector.broadcast %cst_93 : f32 to vector<8x128xf32>
    %230 = arith.mulf %229, %228 : vector<8x128xf32>
    %cst_94 = arith.constant 5.000000e-01 : f32
    %231 = vector.broadcast %cst_94 : f32 to vector<8x128xf32>
    %232 = arith.addf %230, %231 : vector<8x128xf32>
    %233 = vector.extract_strided_slice %216 {offsets = [0, 256], sizes = [8, 128], strides = [1, 1]} : vector<8x512xf32> to vector<8x128xf32>
    %234 = math.tanh %233 : vector<8x128xf32>
    %235 = vector.extract_strided_slice %216 {offsets = [0, 384], sizes = [8, 128], strides = [1, 1]} : vector<8x512xf32> to vector<8x128xf32>
    %cst_95 = arith.constant 5.000000e-01 : f32
    %236 = vector.broadcast %cst_95 : f32 to vector<8x128xf32>
    %237 = arith.mulf %236, %235 : vector<8x128xf32>
    %238 = math.tanh %237 : vector<8x128xf32>
    %cst_96 = arith.constant 5.000000e-01 : f32
    %239 = vector.broadcast %cst_96 : f32 to vector<8x128xf32>
    %240 = arith.mulf %239, %238 : vector<8x128xf32>
    %cst_97 = arith.constant 5.000000e-01 : f32
    %241 = vector.broadcast %cst_97 : f32 to vector<8x128xf32>
    %242 = arith.addf %240, %241 : vector<8x128xf32>
    %243 = arith.mulf %232, %205 : vector<8x128xf32>
    %244 = arith.mulf %224, %234 : vector<8x128xf32>
    %245 = arith.addf %243, %244 : vector<8x128xf32>
    %246 = math.tanh %245 : vector<8x128xf32>
    %247 = arith.mulf %242, %246 : vector<8x128xf32>
    %248 = arith.index_cast %211 : i32 to index
    %c0_98 = arith.constant 0 : index
    %249 = vector.load %arg12[%248, %c0_98] : memref<64x128xf32, #tpu.memory_space<vmem>>, vector<8x128xf32>
    tpu.vector_store %arg12[%248, %c0_98], %247 {strides = array<i32>} : memref<64x128xf32, #tpu.memory_space<vmem>>, vector<8x128xf32>,
    %c6_i32 = arith.constant 6 : i32
    %c8_i32_99 = arith.constant 8 : i32
    %250 = arith.muli %c6_i32, %c8_i32_99 : i32
    %251 = tpu.assume_multiple %250, 8 : i32
    %252 = arith.index_cast %251 : i32 to index
    %c0_100 = arith.constant 0 : index
    %253 = vector.load %arg11[%252, %c0_100] : memref<64x512xf32, #tpu.memory_space<vmem>>, vector<8x512xf32>
    %c0_101 = arith.constant 0 : index
    %c0_102 = arith.constant 0 : index
    %254 = vector.load %arg3[%c0_101, %c0_102] : memref<128x512xf32, #tpu.memory_space<vmem>>, vector<128x512xf32>
    %cst_103 = arith.constant dense<0.000000e+00> : vector<8x512xf32>
    %255 = tpu.matmul %247, %254, %cst_103 {dimension_numbers = #tpu.dot_dimension_numbers<[1], [0], [0], [1], [0, 0, 1, 1], [], []>} : vector<8x128xf32>, vector<128x512xf32>, vector<8x512xf32> -> vector<8x512xf32>
    %256 = arith.addf %253, %255 : vector<8x512xf32>
    %257 = vector.extract_strided_slice %256 {offsets = [0, 0], sizes = [8, 128], strides = [1, 1]} : vector<8x512xf32> to vector<8x128xf32>
    %cst_104 = arith.constant 5.000000e-01 : f32
    %258 = vector.broadcast %cst_104 : f32 to vector<8x128xf32>
    %259 = arith.mulf %258, %257 : vector<8x128xf32>
    %260 = math.tanh %259 : vector<8x128xf32>
    %cst_105 = arith.constant 5.000000e-01 : f32
    %261 = vector.broadcast %cst_105 : f32 to vector<8x128xf32>
    %262 = arith.mulf %261, %260 : vector<8x128xf32>
    %cst_106 = arith.constant 5.000000e-01 : f32
    %263 = vector.broadcast %cst_106 : f32 to vector<8x128xf32>
    %264 = arith.addf %262, %263 : vector<8x128xf32>
    %265 = vector.extract_strided_slice %256 {offsets = [0, 128], sizes = [8, 128], strides = [1, 1]} : vector<8x512xf32> to vector<8x128xf32>
    %cst_107 = arith.constant 5.000000e-01 : f32
    %266 = vector.broadcast %cst_107 : f32 to vector<8x128xf32>
    %267 = arith.mulf %266, %265 : vector<8x128xf32>
    %268 = math.tanh %267 : vector<8x128xf32>
    %cst_108 = arith.constant 5.000000e-01 : f32
    %269 = vector.broadcast %cst_108 : f32 to vector<8x128xf32>
    %270 = arith.mulf %269, %268 : vector<8x128xf32>
    %cst_109 = arith.constant 5.000000e-01 : f32
    %271 = vector.broadcast %cst_109 : f32 to vector<8x128xf32>
    %272 = arith.addf %270, %271 : vector<8x128xf32>
    %273 = vector.extract_strided_slice %256 {offsets = [0, 256], sizes = [8, 128], strides = [1, 1]} : vector<8x512xf32> to vector<8x128xf32>
    %274 = math.tanh %273 : vector<8x128xf32>
    %275 = vector.extract_strided_slice %256 {offsets = [0, 384], sizes = [8, 128], strides = [1, 1]} : vector<8x512xf32> to vector<8x128xf32>
    %cst_110 = arith.constant 5.000000e-01 : f32
    %276 = vector.broadcast %cst_110 : f32 to vector<8x128xf32>
    %277 = arith.mulf %276, %275 : vector<8x128xf32>
    %278 = math.tanh %277 : vector<8x128xf32>
    %cst_111 = arith.constant 5.000000e-01 : f32
    %279 = vector.broadcast %cst_111 : f32 to vector<8x128xf32>
    %280 = arith.mulf %279, %278 : vector<8x128xf32>
    %cst_112 = arith.constant 5.000000e-01 : f32
    %281 = vector.broadcast %cst_112 : f32 to vector<8x128xf32>
    %282 = arith.addf %280, %281 : vector<8x128xf32>
    %283 = arith.mulf %272, %245 : vector<8x128xf32>
    %284 = arith.mulf %264, %274 : vector<8x128xf32>
    %285 = arith.addf %283, %284 : vector<8x128xf32>
    %286 = math.tanh %285 : vector<8x128xf32>
    %287 = arith.mulf %282, %286 : vector<8x128xf32>
    %288 = arith.index_cast %251 : i32 to index
    %c0_113 = arith.constant 0 : index
    %289 = vector.load %arg12[%288, %c0_113] : memref<64x128xf32, #tpu.memory_space<vmem>>, vector<8x128xf32>
    tpu.vector_store %arg12[%288, %c0_113], %287 {strides = array<i32>} : memref<64x128xf32, #tpu.memory_space<vmem>>, vector<8x128xf32>,
    %c7_i32 = arith.constant 7 : i32
    %c8_i32_114 = arith.constant 8 : i32
    %290 = arith.muli %c7_i32, %c8_i32_114 : i32
    %291 = tpu.assume_multiple %290, 8 : i32
    %292 = arith.index_cast %291 : i32 to index
    %c0_115 = arith.constant 0 : index
    %293 = vector.load %arg11[%292, %c0_115] : memref<64x512xf32, #tpu.memory_space<vmem>>, vector<8x512xf32>
    %c0_116 = arith.constant 0 : index
    %c0_117 = arith.constant 0 : index
    %294 = vector.load %arg3[%c0_116, %c0_117] : memref<128x512xf32, #tpu.memory_space<vmem>>, vector<128x512xf32>
    %cst_118 = arith.constant dense<0.000000e+00> : vector<8x512xf32>
    %295 = tpu.matmul %287, %294, %cst_118 {dimension_numbers = #tpu.dot_dimension_numbers<[1], [0], [0], [1], [0, 0, 1, 1], [], []>} : vector<8x128xf32>, vector<128x512xf32>, vector<8x512xf32> -> vector<8x512xf32>
    %296 = arith.addf %293, %295 : vector<8x512xf32>
    %297 = vector.extract_strided_slice %296 {offsets = [0, 0], sizes = [8, 128], strides = [1, 1]} : vector<8x512xf32> to vector<8x128xf32>
    %cst_119 = arith.constant 5.000000e-01 : f32
    %298 = vector.broadcast %cst_119 : f32 to vector<8x128xf32>
    %299 = arith.mulf %298, %297 : vector<8x128xf32>
    %300 = math.tanh %299 : vector<8x128xf32>
    %cst_120 = arith.constant 5.000000e-01 : f32
    %301 = vector.broadcast %cst_120 : f32 to vector<8x128xf32>
    %302 = arith.mulf %301, %300 : vector<8x128xf32>
    %cst_121 = arith.constant 5.000000e-01 : f32
    %303 = vector.broadcast %cst_121 : f32 to vector<8x128xf32>
    %304 = arith.addf %302, %303 : vector<8x128xf32>
    %305 = vector.extract_strided_slice %296 {offsets = [0, 128], sizes = [8, 128], strides = [1, 1]} : vector<8x512xf32> to vector<8x128xf32>
    %cst_122 = arith.constant 5.000000e-01 : f32
    %306 = vector.broadcast %cst_122 : f32 to vector<8x128xf32>
    %307 = arith.mulf %306, %305 : vector<8x128xf32>
    %308 = math.tanh %307 : vector<8x128xf32>
    %cst_123 = arith.constant 5.000000e-01 : f32
    %309 = vector.broadcast %cst_123 : f32 to vector<8x128xf32>
    %310 = arith.mulf %309, %308 : vector<8x128xf32>
    %cst_124 = arith.constant 5.000000e-01 : f32
    %311 = vector.broadcast %cst_124 : f32 to vector<8x128xf32>
    %312 = arith.addf %310, %311 : vector<8x128xf32>
    %313 = vector.extract_strided_slice %296 {offsets = [0, 256], sizes = [8, 128], strides = [1, 1]} : vector<8x512xf32> to vector<8x128xf32>
    %314 = math.tanh %313 : vector<8x128xf32>
    %315 = vector.extract_strided_slice %296 {offsets = [0, 384], sizes = [8, 128], strides = [1, 1]} : vector<8x512xf32> to vector<8x128xf32>
    %cst_125 = arith.constant 5.000000e-01 : f32
    %316 = vector.broadcast %cst_125 : f32 to vector<8x128xf32>
    %317 = arith.mulf %316, %315 : vector<8x128xf32>
    %318 = math.tanh %317 : vector<8x128xf32>
    %cst_126 = arith.constant 5.000000e-01 : f32
    %319 = vector.broadcast %cst_126 : f32 to vector<8x128xf32>
    %320 = arith.mulf %319, %318 : vector<8x128xf32>
    %cst_127 = arith.constant 5.000000e-01 : f32
    %321 = vector.broadcast %cst_127 : f32 to vector<8x128xf32>
    %322 = arith.addf %320, %321 : vector<8x128xf32>
    %323 = arith.mulf %312, %285 : vector<8x128xf32>
    %324 = arith.mulf %304, %314 : vector<8x128xf32>
    %325 = arith.addf %323, %324 : vector<8x128xf32>
    %326 = math.tanh %325 : vector<8x128xf32>
    %327 = arith.mulf %322, %326 : vector<8x128xf32>
    %328 = arith.index_cast %291 : i32 to index
    %c0_128 = arith.constant 0 : index
    %329 = vector.load %arg12[%328, %c0_128] : memref<64x128xf32, #tpu.memory_space<vmem>>, vector<8x128xf32>
    tpu.vector_store %arg12[%328, %c0_128], %327 {strides = array<i32>} : memref<64x128xf32, #tpu.memory_space<vmem>>, vector<8x128xf32>,
    %c8_i32_129 = arith.constant 8 : i32
    %c0_130 = arith.constant 0 : index
    %c0_131 = arith.constant 0 : index
    %330 = vector.load %arg12[%c0_130, %c0_131] : memref<64x128xf32, #tpu.memory_space<vmem>>, vector<64x128xf32>
    %c0_132 = arith.constant 0 : index
    %c0_133 = arith.constant 0 : index
    %331 = vector.load %arg5[%c0_132, %c0_133] : memref<128x512xf32, #tpu.memory_space<vmem>>, vector<128x512xf32>
    %cst_134 = arith.constant dense<0.000000e+00> : vector<64x512xf32>
    %332 = tpu.matmul %330, %331, %cst_134 {dimension_numbers = #tpu.dot_dimension_numbers<[1], [0], [0], [1], [0, 0, 1, 1], [], []>} : vector<64x128xf32>, vector<128x512xf32>, vector<64x512xf32> -> vector<64x512xf32>
    %c0_135 = arith.constant 0 : index
    %c0_136 = arith.constant 0 : index
    %333 = vector.load %arg7[%c0_135, %c0_136] : memref<1x512xf32, #tpu.memory_space<vmem>>, vector<1x512xf32>
    %334 = vector.broadcast %333 : vector<1x512xf32> to vector<64x512xf32>
    %335 = arith.addf %332, %334 : vector<64x512xf32>
    %c0_137 = arith.constant 0 : index
    %c0_138 = arith.constant 0 : index
    %336 = vector.load %arg11[%c0_137, %c0_138] : memref<64x512xf32, #tpu.memory_space<vmem>>, vector<64x512xf32>
    tpu.vector_store %arg11[%c0_137, %c0_138], %335 {strides = array<i32>} : memref<64x512xf32, #tpu.memory_space<vmem>>, vector<64x512xf32>,
    %cst_139 = arith.constant 0.000000e+00 : f32
    %337 = vector.broadcast %cst_139 : f32 to vector<8x128xf32>
    %cst_140 = arith.constant 0.000000e+00 : f32
    %338 = vector.broadcast %cst_140 : f32 to vector<8x128xf32>
    %c0_i32_141 = arith.constant 0 : i32
    %c8_i32_142 = arith.constant 8 : i32
    %339 = arith.muli %c0_i32_141, %c8_i32_142 : i32
    %340 = tpu.assume_multiple %339, 8 : i32
    %341 = arith.index_cast %340 : i32 to index
    %c0_143 = arith.constant 0 : index
    %342 = vector.load %arg11[%341, %c0_143] : memref<64x512xf32, #tpu.memory_space<vmem>>, vector<8x512xf32>
    %c0_144 = arith.constant 0 : index
    %c0_145 = arith.constant 0 : index
    %343 = vector.load %arg6[%c0_144, %c0_145] : memref<128x512xf32, #tpu.memory_space<vmem>>, vector<128x512xf32>
    %cst_146 = arith.constant dense<0.000000e+00> : vector<8x512xf32>
    %344 = tpu.matmul %337, %343, %cst_146 {dimension_numbers = #tpu.dot_dimension_numbers<[1], [0], [0], [1], [0, 0, 1, 1], [], []>} : vector<8x128xf32>, vector<128x512xf32>, vector<8x512xf32> -> vector<8x512xf32>
    %345 = arith.addf %342, %344 : vector<8x512xf32>
    %346 = vector.extract_strided_slice %345 {offsets = [0, 0], sizes = [8, 128], strides = [1, 1]} : vector<8x512xf32> to vector<8x128xf32>
    %cst_147 = arith.constant 5.000000e-01 : f32
    %347 = vector.broadcast %cst_147 : f32 to vector<8x128xf32>
    %348 = arith.mulf %347, %346 : vector<8x128xf32>
    %349 = math.tanh %348 : vector<8x128xf32>
    %cst_148 = arith.constant 5.000000e-01 : f32
    %350 = vector.broadcast %cst_148 : f32 to vector<8x128xf32>
    %351 = arith.mulf %350, %349 : vector<8x128xf32>
    %cst_149 = arith.constant 5.000000e-01 : f32
    %352 = vector.broadcast %cst_149 : f32 to vector<8x128xf32>
    %353 = arith.addf %351, %352 : vector<8x128xf32>
    %354 = vector.extract_strided_slice %345 {offsets = [0, 128], sizes = [8, 128], strides = [1, 1]} : vector<8x512xf32> to vector<8x128xf32>
    %cst_150 = arith.constant 5.000000e-01 : f32
    %355 = vector.broadcast %cst_150 : f32 to vector<8x128xf32>
    %356 = arith.mulf %355, %354 : vector<8x128xf32>
    %357 = math.tanh %356 : vector<8x128xf32>
    %cst_151 = arith.constant 5.000000e-01 : f32
    %358 = vector.broadcast %cst_151 : f32 to vector<8x128xf32>
    %359 = arith.mulf %358, %357 : vector<8x128xf32>
    %cst_152 = arith.constant 5.000000e-01 : f32
    %360 = vector.broadcast %cst_152 : f32 to vector<8x128xf32>
    %361 = arith.addf %359, %360 : vector<8x128xf32>
    %362 = vector.extract_strided_slice %345 {offsets = [0, 256], sizes = [8, 128], strides = [1, 1]} : vector<8x512xf32> to vector<8x128xf32>
    %363 = math.tanh %362 : vector<8x128xf32>
    %364 = vector.extract_strided_slice %345 {offsets = [0, 384], sizes = [8, 128], strides = [1, 1]} : vector<8x512xf32> to vector<8x128xf32>
    %cst_153 = arith.constant 5.000000e-01 : f32
    %365 = vector.broadcast %cst_153 : f32 to vector<8x128xf32>
    %366 = arith.mulf %365, %364 : vector<8x128xf32>
    %367 = math.tanh %366 : vector<8x128xf32>
    %cst_154 = arith.constant 5.000000e-01 : f32
    %368 = vector.broadcast %cst_154 : f32 to vector<8x128xf32>
    %369 = arith.mulf %368, %367 : vector<8x128xf32>
    %cst_155 = arith.constant 5.000000e-01 : f32
    %370 = vector.broadcast %cst_155 : f32 to vector<8x128xf32>
    %371 = arith.addf %369, %370 : vector<8x128xf32>
    %372 = arith.mulf %361, %338 : vector<8x128xf32>
    %373 = arith.mulf %353, %363 : vector<8x128xf32>
    %374 = arith.addf %372, %373 : vector<8x128xf32>
    %375 = math.tanh %374 : vector<8x128xf32>
    %376 = arith.mulf %371, %375 : vector<8x128xf32>
    %c1_i32_156 = arith.constant 1 : i32
    %c8_i32_157 = arith.constant 8 : i32
    %377 = arith.muli %c1_i32_156, %c8_i32_157 : i32
    %378 = tpu.assume_multiple %377, 8 : i32
    %379 = arith.index_cast %378 : i32 to index
    %c0_158 = arith.constant 0 : index
    %380 = vector.load %arg11[%379, %c0_158] : memref<64x512xf32, #tpu.memory_space<vmem>>, vector<8x512xf32>
    %c0_159 = arith.constant 0 : index
    %c0_160 = arith.constant 0 : index
    %381 = vector.load %arg6[%c0_159, %c0_160] : memref<128x512xf32, #tpu.memory_space<vmem>>, vector<128x512xf32>
    %cst_161 = arith.constant dense<0.000000e+00> : vector<8x512xf32>
    %382 = tpu.matmul %376, %381, %cst_161 {dimension_numbers = #tpu.dot_dimension_numbers<[1], [0], [0], [1], [0, 0, 1, 1], [], []>} : vector<8x128xf32>, vector<128x512xf32>, vector<8x512xf32> -> vector<8x512xf32>
    %383 = arith.addf %380, %382 : vector<8x512xf32>
    %384 = vector.extract_strided_slice %383 {offsets = [0, 0], sizes = [8, 128], strides = [1, 1]} : vector<8x512xf32> to vector<8x128xf32>
    %cst_162 = arith.constant 5.000000e-01 : f32
    %385 = vector.broadcast %cst_162 : f32 to vector<8x128xf32>
    %386 = arith.mulf %385, %384 : vector<8x128xf32>
    %387 = math.tanh %386 : vector<8x128xf32>
    %cst_163 = arith.constant 5.000000e-01 : f32
    %388 = vector.broadcast %cst_163 : f32 to vector<8x128xf32>
    %389 = arith.mulf %388, %387 : vector<8x128xf32>
    %cst_164 = arith.constant 5.000000e-01 : f32
    %390 = vector.broadcast %cst_164 : f32 to vector<8x128xf32>
    %391 = arith.addf %389, %390 : vector<8x128xf32>
    %392 = vector.extract_strided_slice %383 {offsets = [0, 128], sizes = [8, 128], strides = [1, 1]} : vector<8x512xf32> to vector<8x128xf32>
    %cst_165 = arith.constant 5.000000e-01 : f32
    %393 = vector.broadcast %cst_165 : f32 to vector<8x128xf32>
    %394 = arith.mulf %393, %392 : vector<8x128xf32>
    %395 = math.tanh %394 : vector<8x128xf32>
    %cst_166 = arith.constant 5.000000e-01 : f32
    %396 = vector.broadcast %cst_166 : f32 to vector<8x128xf32>
    %397 = arith.mulf %396, %395 : vector<8x128xf32>
    %cst_167 = arith.constant 5.000000e-01 : f32
    %398 = vector.broadcast %cst_167 : f32 to vector<8x128xf32>
    %399 = arith.addf %397, %398 : vector<8x128xf32>
    %400 = vector.extract_strided_slice %383 {offsets = [0, 256], sizes = [8, 128], strides = [1, 1]} : vector<8x512xf32> to vector<8x128xf32>
    %401 = math.tanh %400 : vector<8x128xf32>
    %402 = vector.extract_strided_slice %383 {offsets = [0, 384], sizes = [8, 128], strides = [1, 1]} : vector<8x512xf32> to vector<8x128xf32>
    %cst_168 = arith.constant 5.000000e-01 : f32
    %403 = vector.broadcast %cst_168 : f32 to vector<8x128xf32>
    %404 = arith.mulf %403, %402 : vector<8x128xf32>
    %405 = math.tanh %404 : vector<8x128xf32>
    %cst_169 = arith.constant 5.000000e-01 : f32
    %406 = vector.broadcast %cst_169 : f32 to vector<8x128xf32>
    %407 = arith.mulf %406, %405 : vector<8x128xf32>
    %cst_170 = arith.constant 5.000000e-01 : f32
    %408 = vector.broadcast %cst_170 : f32 to vector<8x128xf32>
    %409 = arith.addf %407, %408 : vector<8x128xf32>
    %410 = arith.mulf %399, %374 : vector<8x128xf32>
    %411 = arith.mulf %391, %401 : vector<8x128xf32>
    %412 = arith.addf %410, %411 : vector<8x128xf32>
    %413 = math.tanh %412 : vector<8x128xf32>
    %414 = arith.mulf %409, %413 : vector<8x128xf32>
    %c2_i32_171 = arith.constant 2 : i32
    %c8_i32_172 = arith.constant 8 : i32
    %415 = arith.muli %c2_i32_171, %c8_i32_172 : i32
    %416 = tpu.assume_multiple %415, 8 : i32
    %417 = arith.index_cast %416 : i32 to index
    %c0_173 = arith.constant 0 : index
    %418 = vector.load %arg11[%417, %c0_173] : memref<64x512xf32, #tpu.memory_space<vmem>>, vector<8x512xf32>
    %c0_174 = arith.constant 0 : index
    %c0_175 = arith.constant 0 : index
    %419 = vector.load %arg6[%c0_174, %c0_175] : memref<128x512xf32, #tpu.memory_space<vmem>>, vector<128x512xf32>
    %cst_176 = arith.constant dense<0.000000e+00> : vector<8x512xf32>
    %420 = tpu.matmul %414, %419, %cst_176 {dimension_numbers = #tpu.dot_dimension_numbers<[1], [0], [0], [1], [0, 0, 1, 1], [], []>} : vector<8x128xf32>, vector<128x512xf32>, vector<8x512xf32> -> vector<8x512xf32>
    %421 = arith.addf %418, %420 : vector<8x512xf32>
    %422 = vector.extract_strided_slice %421 {offsets = [0, 0], sizes = [8, 128], strides = [1, 1]} : vector<8x512xf32> to vector<8x128xf32>
    %cst_177 = arith.constant 5.000000e-01 : f32
    %423 = vector.broadcast %cst_177 : f32 to vector<8x128xf32>
    %424 = arith.mulf %423, %422 : vector<8x128xf32>
    %425 = math.tanh %424 : vector<8x128xf32>
    %cst_178 = arith.constant 5.000000e-01 : f32
    %426 = vector.broadcast %cst_178 : f32 to vector<8x128xf32>
    %427 = arith.mulf %426, %425 : vector<8x128xf32>
    %cst_179 = arith.constant 5.000000e-01 : f32
    %428 = vector.broadcast %cst_179 : f32 to vector<8x128xf32>
    %429 = arith.addf %427, %428 : vector<8x128xf32>
    %430 = vector.extract_strided_slice %421 {offsets = [0, 128], sizes = [8, 128], strides = [1, 1]} : vector<8x512xf32> to vector<8x128xf32>
    %cst_180 = arith.constant 5.000000e-01 : f32
    %431 = vector.broadcast %cst_180 : f32 to vector<8x128xf32>
    %432 = arith.mulf %431, %430 : vector<8x128xf32>
    %433 = math.tanh %432 : vector<8x128xf32>
    %cst_181 = arith.constant 5.000000e-01 : f32
    %434 = vector.broadcast %cst_181 : f32 to vector<8x128xf32>
    %435 = arith.mulf %434, %433 : vector<8x128xf32>
    %cst_182 = arith.constant 5.000000e-01 : f32
    %436 = vector.broadcast %cst_182 : f32 to vector<8x128xf32>
    %437 = arith.addf %435, %436 : vector<8x128xf32>
    %438 = vector.extract_strided_slice %421 {offsets = [0, 256], sizes = [8, 128], strides = [1, 1]} : vector<8x512xf32> to vector<8x128xf32>
    %439 = math.tanh %438 : vector<8x128xf32>
    %440 = vector.extract_strided_slice %421 {offsets = [0, 384], sizes = [8, 128], strides = [1, 1]} : vector<8x512xf32> to vector<8x128xf32>
    %cst_183 = arith.constant 5.000000e-01 : f32
    %441 = vector.broadcast %cst_183 : f32 to vector<8x128xf32>
    %442 = arith.mulf %441, %440 : vector<8x128xf32>
    %443 = math.tanh %442 : vector<8x128xf32>
    %cst_184 = arith.constant 5.000000e-01 : f32
    %444 = vector.broadcast %cst_184 : f32 to vector<8x128xf32>
    %445 = arith.mulf %444, %443 : vector<8x128xf32>
    %cst_185 = arith.constant 5.000000e-01 : f32
    %446 = vector.broadcast %cst_185 : f32 to vector<8x128xf32>
    %447 = arith.addf %445, %446 : vector<8x128xf32>
    %448 = arith.mulf %437, %412 : vector<8x128xf32>
    %449 = arith.mulf %429, %439 : vector<8x128xf32>
    %450 = arith.addf %448, %449 : vector<8x128xf32>
    %451 = math.tanh %450 : vector<8x128xf32>
    %452 = arith.mulf %447, %451 : vector<8x128xf32>
    %c3_i32_186 = arith.constant 3 : i32
    %c8_i32_187 = arith.constant 8 : i32
    %453 = arith.muli %c3_i32_186, %c8_i32_187 : i32
    %454 = tpu.assume_multiple %453, 8 : i32
    %455 = arith.index_cast %454 : i32 to index
    %c0_188 = arith.constant 0 : index
    %456 = vector.load %arg11[%455, %c0_188] : memref<64x512xf32, #tpu.memory_space<vmem>>, vector<8x512xf32>
    %c0_189 = arith.constant 0 : index
    %c0_190 = arith.constant 0 : index
    %457 = vector.load %arg6[%c0_189, %c0_190] : memref<128x512xf32, #tpu.memory_space<vmem>>, vector<128x512xf32>
    %cst_191 = arith.constant dense<0.000000e+00> : vector<8x512xf32>
    %458 = tpu.matmul %452, %457, %cst_191 {dimension_numbers = #tpu.dot_dimension_numbers<[1], [0], [0], [1], [0, 0, 1, 1], [], []>} : vector<8x128xf32>, vector<128x512xf32>, vector<8x512xf32> -> vector<8x512xf32>
    %459 = arith.addf %456, %458 : vector<8x512xf32>
    %460 = vector.extract_strided_slice %459 {offsets = [0, 0], sizes = [8, 128], strides = [1, 1]} : vector<8x512xf32> to vector<8x128xf32>
    %cst_192 = arith.constant 5.000000e-01 : f32
    %461 = vector.broadcast %cst_192 : f32 to vector<8x128xf32>
    %462 = arith.mulf %461, %460 : vector<8x128xf32>
    %463 = math.tanh %462 : vector<8x128xf32>
    %cst_193 = arith.constant 5.000000e-01 : f32
    %464 = vector.broadcast %cst_193 : f32 to vector<8x128xf32>
    %465 = arith.mulf %464, %463 : vector<8x128xf32>
    %cst_194 = arith.constant 5.000000e-01 : f32
    %466 = vector.broadcast %cst_194 : f32 to vector<8x128xf32>
    %467 = arith.addf %465, %466 : vector<8x128xf32>
    %468 = vector.extract_strided_slice %459 {offsets = [0, 128], sizes = [8, 128], strides = [1, 1]} : vector<8x512xf32> to vector<8x128xf32>
    %cst_195 = arith.constant 5.000000e-01 : f32
    %469 = vector.broadcast %cst_195 : f32 to vector<8x128xf32>
    %470 = arith.mulf %469, %468 : vector<8x128xf32>
    %471 = math.tanh %470 : vector<8x128xf32>
    %cst_196 = arith.constant 5.000000e-01 : f32
    %472 = vector.broadcast %cst_196 : f32 to vector<8x128xf32>
    %473 = arith.mulf %472, %471 : vector<8x128xf32>
    %cst_197 = arith.constant 5.000000e-01 : f32
    %474 = vector.broadcast %cst_197 : f32 to vector<8x128xf32>
    %475 = arith.addf %473, %474 : vector<8x128xf32>
    %476 = vector.extract_strided_slice %459 {offsets = [0, 256], sizes = [8, 128], strides = [1, 1]} : vector<8x512xf32> to vector<8x128xf32>
    %477 = math.tanh %476 : vector<8x128xf32>
    %478 = vector.extract_strided_slice %459 {offsets = [0, 384], sizes = [8, 128], strides = [1, 1]} : vector<8x512xf32> to vector<8x128xf32>
    %cst_198 = arith.constant 5.000000e-01 : f32
    %479 = vector.broadcast %cst_198 : f32 to vector<8x128xf32>
    %480 = arith.mulf %479, %478 : vector<8x128xf32>
    %481 = math.tanh %480 : vector<8x128xf32>
    %cst_199 = arith.constant 5.000000e-01 : f32
    %482 = vector.broadcast %cst_199 : f32 to vector<8x128xf32>
    %483 = arith.mulf %482, %481 : vector<8x128xf32>
    %cst_200 = arith.constant 5.000000e-01 : f32
    %484 = vector.broadcast %cst_200 : f32 to vector<8x128xf32>
    %485 = arith.addf %483, %484 : vector<8x128xf32>
    %486 = arith.mulf %475, %450 : vector<8x128xf32>
    %487 = arith.mulf %467, %477 : vector<8x128xf32>
    %488 = arith.addf %486, %487 : vector<8x128xf32>
    %489 = math.tanh %488 : vector<8x128xf32>
    %490 = arith.mulf %485, %489 : vector<8x128xf32>
    %c4_i32_201 = arith.constant 4 : i32
    %c8_i32_202 = arith.constant 8 : i32
    %491 = arith.muli %c4_i32_201, %c8_i32_202 : i32
    %492 = tpu.assume_multiple %491, 8 : i32
    %493 = arith.index_cast %492 : i32 to index
    %c0_203 = arith.constant 0 : index
    %494 = vector.load %arg11[%493, %c0_203] : memref<64x512xf32, #tpu.memory_space<vmem>>, vector<8x512xf32>
    %c0_204 = arith.constant 0 : index
    %c0_205 = arith.constant 0 : index
    %495 = vector.load %arg6[%c0_204, %c0_205] : memref<128x512xf32, #tpu.memory_space<vmem>>, vector<128x512xf32>
    %cst_206 = arith.constant dense<0.000000e+00> : vector<8x512xf32>
    %496 = tpu.matmul %490, %495, %cst_206 {dimension_numbers = #tpu.dot_dimension_numbers<[1], [0], [0], [1], [0, 0, 1, 1], [], []>} : vector<8x128xf32>, vector<128x512xf32>, vector<8x512xf32> -> vector<8x512xf32>
    %497 = arith.addf %494, %496 : vector<8x512xf32>
    %498 = vector.extract_strided_slice %497 {offsets = [0, 0], sizes = [8, 128], strides = [1, 1]} : vector<8x512xf32> to vector<8x128xf32>
    %cst_207 = arith.constant 5.000000e-01 : f32
    %499 = vector.broadcast %cst_207 : f32 to vector<8x128xf32>
    %500 = arith.mulf %499, %498 : vector<8x128xf32>
    %501 = math.tanh %500 : vector<8x128xf32>
    %cst_208 = arith.constant 5.000000e-01 : f32
    %502 = vector.broadcast %cst_208 : f32 to vector<8x128xf32>
    %503 = arith.mulf %502, %501 : vector<8x128xf32>
    %cst_209 = arith.constant 5.000000e-01 : f32
    %504 = vector.broadcast %cst_209 : f32 to vector<8x128xf32>
    %505 = arith.addf %503, %504 : vector<8x128xf32>
    %506 = vector.extract_strided_slice %497 {offsets = [0, 128], sizes = [8, 128], strides = [1, 1]} : vector<8x512xf32> to vector<8x128xf32>
    %cst_210 = arith.constant 5.000000e-01 : f32
    %507 = vector.broadcast %cst_210 : f32 to vector<8x128xf32>
    %508 = arith.mulf %507, %506 : vector<8x128xf32>
    %509 = math.tanh %508 : vector<8x128xf32>
    %cst_211 = arith.constant 5.000000e-01 : f32
    %510 = vector.broadcast %cst_211 : f32 to vector<8x128xf32>
    %511 = arith.mulf %510, %509 : vector<8x128xf32>
    %cst_212 = arith.constant 5.000000e-01 : f32
    %512 = vector.broadcast %cst_212 : f32 to vector<8x128xf32>
    %513 = arith.addf %511, %512 : vector<8x128xf32>
    %514 = vector.extract_strided_slice %497 {offsets = [0, 256], sizes = [8, 128], strides = [1, 1]} : vector<8x512xf32> to vector<8x128xf32>
    %515 = math.tanh %514 : vector<8x128xf32>
    %516 = vector.extract_strided_slice %497 {offsets = [0, 384], sizes = [8, 128], strides = [1, 1]} : vector<8x512xf32> to vector<8x128xf32>
    %cst_213 = arith.constant 5.000000e-01 : f32
    %517 = vector.broadcast %cst_213 : f32 to vector<8x128xf32>
    %518 = arith.mulf %517, %516 : vector<8x128xf32>
    %519 = math.tanh %518 : vector<8x128xf32>
    %cst_214 = arith.constant 5.000000e-01 : f32
    %520 = vector.broadcast %cst_214 : f32 to vector<8x128xf32>
    %521 = arith.mulf %520, %519 : vector<8x128xf32>
    %cst_215 = arith.constant 5.000000e-01 : f32
    %522 = vector.broadcast %cst_215 : f32 to vector<8x128xf32>
    %523 = arith.addf %521, %522 : vector<8x128xf32>
    %524 = arith.mulf %513, %488 : vector<8x128xf32>
    %525 = arith.mulf %505, %515 : vector<8x128xf32>
    %526 = arith.addf %524, %525 : vector<8x128xf32>
    %527 = math.tanh %526 : vector<8x128xf32>
    %528 = arith.mulf %523, %527 : vector<8x128xf32>
    %c5_i32_216 = arith.constant 5 : i32
    %c8_i32_217 = arith.constant 8 : i32
    %529 = arith.muli %c5_i32_216, %c8_i32_217 : i32
    %530 = tpu.assume_multiple %529, 8 : i32
    %531 = arith.index_cast %530 : i32 to index
    %c0_218 = arith.constant 0 : index
    %532 = vector.load %arg11[%531, %c0_218] : memref<64x512xf32, #tpu.memory_space<vmem>>, vector<8x512xf32>
    %c0_219 = arith.constant 0 : index
    %c0_220 = arith.constant 0 : index
    %533 = vector.load %arg6[%c0_219, %c0_220] : memref<128x512xf32, #tpu.memory_space<vmem>>, vector<128x512xf32>
    %cst_221 = arith.constant dense<0.000000e+00> : vector<8x512xf32>
    %534 = tpu.matmul %528, %533, %cst_221 {dimension_numbers = #tpu.dot_dimension_numbers<[1], [0], [0], [1], [0, 0, 1, 1], [], []>} : vector<8x128xf32>, vector<128x512xf32>, vector<8x512xf32> -> vector<8x512xf32>
    %535 = arith.addf %532, %534 : vector<8x512xf32>
    %536 = vector.extract_strided_slice %535 {offsets = [0, 0], sizes = [8, 128], strides = [1, 1]} : vector<8x512xf32> to vector<8x128xf32>
    %cst_222 = arith.constant 5.000000e-01 : f32
    %537 = vector.broadcast %cst_222 : f32 to vector<8x128xf32>
    %538 = arith.mulf %537, %536 : vector<8x128xf32>
    %539 = math.tanh %538 : vector<8x128xf32>
    %cst_223 = arith.constant 5.000000e-01 : f32
    %540 = vector.broadcast %cst_223 : f32 to vector<8x128xf32>
    %541 = arith.mulf %540, %539 : vector<8x128xf32>
    %cst_224 = arith.constant 5.000000e-01 : f32
    %542 = vector.broadcast %cst_224 : f32 to vector<8x128xf32>
    %543 = arith.addf %541, %542 : vector<8x128xf32>
    %544 = vector.extract_strided_slice %535 {offsets = [0, 128], sizes = [8, 128], strides = [1, 1]} : vector<8x512xf32> to vector<8x128xf32>
    %cst_225 = arith.constant 5.000000e-01 : f32
    %545 = vector.broadcast %cst_225 : f32 to vector<8x128xf32>
    %546 = arith.mulf %545, %544 : vector<8x128xf32>
    %547 = math.tanh %546 : vector<8x128xf32>
    %cst_226 = arith.constant 5.000000e-01 : f32
    %548 = vector.broadcast %cst_226 : f32 to vector<8x128xf32>
    %549 = arith.mulf %548, %547 : vector<8x128xf32>
    %cst_227 = arith.constant 5.000000e-01 : f32
    %550 = vector.broadcast %cst_227 : f32 to vector<8x128xf32>
    %551 = arith.addf %549, %550 : vector<8x128xf32>
    %552 = vector.extract_strided_slice %535 {offsets = [0, 256], sizes = [8, 128], strides = [1, 1]} : vector<8x512xf32> to vector<8x128xf32>
    %553 = math.tanh %552 : vector<8x128xf32>
    %554 = vector.extract_strided_slice %535 {offsets = [0, 384], sizes = [8, 128], strides = [1, 1]} : vector<8x512xf32> to vector<8x128xf32>
    %cst_228 = arith.constant 5.000000e-01 : f32
    %555 = vector.broadcast %cst_228 : f32 to vector<8x128xf32>
    %556 = arith.mulf %555, %554 : vector<8x128xf32>
    %557 = math.tanh %556 : vector<8x128xf32>
    %cst_229 = arith.constant 5.000000e-01 : f32
    %558 = vector.broadcast %cst_229 : f32 to vector<8x128xf32>
    %559 = arith.mulf %558, %557 : vector<8x128xf32>
    %cst_230 = arith.constant 5.000000e-01 : f32
    %560 = vector.broadcast %cst_230 : f32 to vector<8x128xf32>
    %561 = arith.addf %559, %560 : vector<8x128xf32>
    %562 = arith.mulf %551, %526 : vector<8x128xf32>
    %563 = arith.mulf %543, %553 : vector<8x128xf32>
    %564 = arith.addf %562, %563 : vector<8x128xf32>
    %565 = math.tanh %564 : vector<8x128xf32>
    %566 = arith.mulf %561, %565 : vector<8x128xf32>
    %c6_i32_231 = arith.constant 6 : i32
    %c8_i32_232 = arith.constant 8 : i32
    %567 = arith.muli %c6_i32_231, %c8_i32_232 : i32
    %568 = tpu.assume_multiple %567, 8 : i32
    %569 = arith.index_cast %568 : i32 to index
    %c0_233 = arith.constant 0 : index
    %570 = vector.load %arg11[%569, %c0_233] : memref<64x512xf32, #tpu.memory_space<vmem>>, vector<8x512xf32>
    %c0_234 = arith.constant 0 : index
    %c0_235 = arith.constant 0 : index
    %571 = vector.load %arg6[%c0_234, %c0_235] : memref<128x512xf32, #tpu.memory_space<vmem>>, vector<128x512xf32>
    %cst_236 = arith.constant dense<0.000000e+00> : vector<8x512xf32>
    %572 = tpu.matmul %566, %571, %cst_236 {dimension_numbers = #tpu.dot_dimension_numbers<[1], [0], [0], [1], [0, 0, 1, 1], [], []>} : vector<8x128xf32>, vector<128x512xf32>, vector<8x512xf32> -> vector<8x512xf32>
    %573 = arith.addf %570, %572 : vector<8x512xf32>
    %574 = vector.extract_strided_slice %573 {offsets = [0, 0], sizes = [8, 128], strides = [1, 1]} : vector<8x512xf32> to vector<8x128xf32>
    %cst_237 = arith.constant 5.000000e-01 : f32
    %575 = vector.broadcast %cst_237 : f32 to vector<8x128xf32>
    %576 = arith.mulf %575, %574 : vector<8x128xf32>
    %577 = math.tanh %576 : vector<8x128xf32>
    %cst_238 = arith.constant 5.000000e-01 : f32
    %578 = vector.broadcast %cst_238 : f32 to vector<8x128xf32>
    %579 = arith.mulf %578, %577 : vector<8x128xf32>
    %cst_239 = arith.constant 5.000000e-01 : f32
    %580 = vector.broadcast %cst_239 : f32 to vector<8x128xf32>
    %581 = arith.addf %579, %580 : vector<8x128xf32>
    %582 = vector.extract_strided_slice %573 {offsets = [0, 128], sizes = [8, 128], strides = [1, 1]} : vector<8x512xf32> to vector<8x128xf32>
    %cst_240 = arith.constant 5.000000e-01 : f32
    %583 = vector.broadcast %cst_240 : f32 to vector<8x128xf32>
    %584 = arith.mulf %583, %582 : vector<8x128xf32>
    %585 = math.tanh %584 : vector<8x128xf32>
    %cst_241 = arith.constant 5.000000e-01 : f32
    %586 = vector.broadcast %cst_241 : f32 to vector<8x128xf32>
    %587 = arith.mulf %586, %585 : vector<8x128xf32>
    %cst_242 = arith.constant 5.000000e-01 : f32
    %588 = vector.broadcast %cst_242 : f32 to vector<8x128xf32>
    %589 = arith.addf %587, %588 : vector<8x128xf32>
    %590 = vector.extract_strided_slice %573 {offsets = [0, 256], sizes = [8, 128], strides = [1, 1]} : vector<8x512xf32> to vector<8x128xf32>
    %591 = math.tanh %590 : vector<8x128xf32>
    %592 = vector.extract_strided_slice %573 {offsets = [0, 384], sizes = [8, 128], strides = [1, 1]} : vector<8x512xf32> to vector<8x128xf32>
    %cst_243 = arith.constant 5.000000e-01 : f32
    %593 = vector.broadcast %cst_243 : f32 to vector<8x128xf32>
    %594 = arith.mulf %593, %592 : vector<8x128xf32>
    %595 = math.tanh %594 : vector<8x128xf32>
    %cst_244 = arith.constant 5.000000e-01 : f32
    %596 = vector.broadcast %cst_244 : f32 to vector<8x128xf32>
    %597 = arith.mulf %596, %595 : vector<8x128xf32>
    %cst_245 = arith.constant 5.000000e-01 : f32
    %598 = vector.broadcast %cst_245 : f32 to vector<8x128xf32>
    %599 = arith.addf %597, %598 : vector<8x128xf32>
    %600 = arith.mulf %589, %564 : vector<8x128xf32>
    %601 = arith.mulf %581, %591 : vector<8x128xf32>
    %602 = arith.addf %600, %601 : vector<8x128xf32>
    %603 = math.tanh %602 : vector<8x128xf32>
    %604 = arith.mulf %599, %603 : vector<8x128xf32>
    %c7_i32_246 = arith.constant 7 : i32
    %c8_i32_247 = arith.constant 8 : i32
    %605 = arith.muli %c7_i32_246, %c8_i32_247 : i32
    %606 = tpu.assume_multiple %605, 8 : i32
    %607 = arith.index_cast %606 : i32 to index
    %c0_248 = arith.constant 0 : index
    %608 = vector.load %arg11[%607, %c0_248] : memref<64x512xf32, #tpu.memory_space<vmem>>, vector<8x512xf32>
    %c0_249 = arith.constant 0 : index
    %c0_250 = arith.constant 0 : index
    %609 = vector.load %arg6[%c0_249, %c0_250] : memref<128x512xf32, #tpu.memory_space<vmem>>, vector<128x512xf32>
    %cst_251 = arith.constant dense<0.000000e+00> : vector<8x512xf32>
    %610 = tpu.matmul %604, %609, %cst_251 {dimension_numbers = #tpu.dot_dimension_numbers<[1], [0], [0], [1], [0, 0, 1, 1], [], []>} : vector<8x128xf32>, vector<128x512xf32>, vector<8x512xf32> -> vector<8x512xf32>
    %611 = arith.addf %608, %610 : vector<8x512xf32>
    %612 = vector.extract_strided_slice %611 {offsets = [0, 0], sizes = [8, 128], strides = [1, 1]} : vector<8x512xf32> to vector<8x128xf32>
    %cst_252 = arith.constant 5.000000e-01 : f32
    %613 = vector.broadcast %cst_252 : f32 to vector<8x128xf32>
    %614 = arith.mulf %613, %612 : vector<8x128xf32>
    %615 = math.tanh %614 : vector<8x128xf32>
    %cst_253 = arith.constant 5.000000e-01 : f32
    %616 = vector.broadcast %cst_253 : f32 to vector<8x128xf32>
    %617 = arith.mulf %616, %615 : vector<8x128xf32>
    %cst_254 = arith.constant 5.000000e-01 : f32
    %618 = vector.broadcast %cst_254 : f32 to vector<8x128xf32>
    %619 = arith.addf %617, %618 : vector<8x128xf32>
    %620 = vector.extract_strided_slice %611 {offsets = [0, 128], sizes = [8, 128], strides = [1, 1]} : vector<8x512xf32> to vector<8x128xf32>
    %cst_255 = arith.constant 5.000000e-01 : f32
    %621 = vector.broadcast %cst_255 : f32 to vector<8x128xf32>
    %622 = arith.mulf %621, %620 : vector<8x128xf32>
    %623 = math.tanh %622 : vector<8x128xf32>
    %cst_256 = arith.constant 5.000000e-01 : f32
    %624 = vector.broadcast %cst_256 : f32 to vector<8x128xf32>
    %625 = arith.mulf %624, %623 : vector<8x128xf32>
    %cst_257 = arith.constant 5.000000e-01 : f32
    %626 = vector.broadcast %cst_257 : f32 to vector<8x128xf32>
    %627 = arith.addf %625, %626 : vector<8x128xf32>
    %628 = vector.extract_strided_slice %611 {offsets = [0, 256], sizes = [8, 128], strides = [1, 1]} : vector<8x512xf32> to vector<8x128xf32>
    %629 = math.tanh %628 : vector<8x128xf32>
    %630 = vector.extract_strided_slice %611 {offsets = [0, 384], sizes = [8, 128], strides = [1, 1]} : vector<8x512xf32> to vector<8x128xf32>
    %cst_258 = arith.constant 5.000000e-01 : f32
    %631 = vector.broadcast %cst_258 : f32 to vector<8x128xf32>
    %632 = arith.mulf %631, %630 : vector<8x128xf32>
    %633 = math.tanh %632 : vector<8x128xf32>
    %cst_259 = arith.constant 5.000000e-01 : f32
    %634 = vector.broadcast %cst_259 : f32 to vector<8x128xf32>
    %635 = arith.mulf %634, %633 : vector<8x128xf32>
    %cst_260 = arith.constant 5.000000e-01 : f32
    %636 = vector.broadcast %cst_260 : f32 to vector<8x128xf32>
    %637 = arith.addf %635, %636 : vector<8x128xf32>
    %638 = arith.mulf %627, %602 : vector<8x128xf32>
    %639 = arith.mulf %619, %629 : vector<8x128xf32>
    %640 = arith.addf %638, %639 : vector<8x128xf32>
    %641 = math.tanh %640 : vector<8x128xf32>
    %642 = arith.mulf %637, %641 : vector<8x128xf32>
    %c8_i32_261 = arith.constant 8 : i32
    %c0_262 = arith.constant 0 : index
    %c0_263 = arith.constant 0 : index
    %643 = vector.load %arg8[%c0_262, %c0_263] : memref<128x128xf32, #tpu.memory_space<vmem>>, vector<128x128xf32>
    %cst_264 = arith.constant dense<0.000000e+00> : vector<8x128xf32>
    %644 = tpu.matmul %642, %643, %cst_264 {dimension_numbers = #tpu.dot_dimension_numbers<[1], [0], [0], [1], [0, 0, 1, 1], [], []>} : vector<8x128xf32>, vector<128x128xf32>, vector<8x128xf32> -> vector<8x128xf32>
    %c0_265 = arith.constant 0 : index
    %c0_266 = arith.constant 0 : index
    %645 = vector.load %arg9[%c0_265, %c0_266] : memref<1x128xf32, #tpu.memory_space<vmem>>, vector<1x128xf32>
    %646 = vector.broadcast %645 : vector<1x128xf32> to vector<8x128xf32>
    %647 = arith.addf %644, %646 : vector<8x128xf32>
    %c0_267 = arith.constant 0 : index
    %c0_268 = arith.constant 0 : index
    %648 = vector.load %arg10[%c0_267, %c0_268] : memref<8x128xf32, #tpu.memory_space<vmem>>, vector<8x128xf32>
    tpu.vector_store %arg10[%c0_267, %c0_268], %647 {strides = array<i32>} : memref<8x128xf32, #tpu.memory_space<vmem>>, vector<8x128xf32>,
    return
  }
  func.func @transform_0(%arg0: i32) -> (i32, i32, i32) {
    %c0_i32 = arith.constant 0 : i32
    %c0_i32_0 = arith.constant 0 : i32
    %c0_i32_1 = arith.constant 0 : i32
    return %arg0, %c0_i32, %c0_i32_0 : i32, i32, i32
  }
  func.func @transform_1(%arg0: i32) -> (i32, i32) {
    %c0_i32 = arith.constant 0 : i32
    %c0_i32_0 = arith.constant 0 : i32
    %c0_i32_1 = arith.constant 0 : i32
    return %c0_i32, %c0_i32_0 : i32, i32
  }
  func.func @transform_2(%arg0: i32) -> (i32, i32) {
    %c0_i32 = arith.constant 0 : i32
    %c0_i32_0 = arith.constant 0 : i32
    %c0_i32_1 = arith.constant 0 : i32
    return %c0_i32, %c0_i32_0 : i32, i32
  }
  func.func @transform_3(%arg0: i32) -> (i32, i32) {
    %c0_i32 = arith.constant 0 : i32
    %c0_i32_0 = arith.constant 0 : i32
    %c0_i32_1 = arith.constant 0 : i32
    return %c0_i32, %c0_i32_0 : i32, i32
  }
  func.func @transform_4(%arg0: i32) -> (i32, i32) {
    %c0_i32 = arith.constant 0 : i32
    %c0_i32_0 = arith.constant 0 : i32
    %c0_i32_1 = arith.constant 0 : i32
    return %c0_i32, %c0_i32_0 : i32, i32
  }
  func.func @transform_5(%arg0: i32) -> (i32, i32) {
    %c0_i32 = arith.constant 0 : i32
    %c0_i32_0 = arith.constant 0 : i32
    %c0_i32_1 = arith.constant 0 : i32
    return %c0_i32, %c0_i32_0 : i32, i32
  }
  func.func @transform_6(%arg0: i32) -> (i32, i32) {
    %c0_i32 = arith.constant 0 : i32
    %c0_i32_0 = arith.constant 0 : i32
    %c0_i32_1 = arith.constant 0 : i32
    return %c0_i32, %c0_i32_0 : i32, i32
  }
  func.func @transform_7(%arg0: i32) -> (i32, i32) {
    %c0_i32 = arith.constant 0 : i32
    %c0_i32_0 = arith.constant 0 : i32
    %c0_i32_1 = arith.constant 0 : i32
    return %c0_i32, %c0_i32_0 : i32, i32
  }
  func.func @transform_8(%arg0: i32) -> (i32, i32) {
    %c0_i32 = arith.constant 0 : i32
    %c0_i32_0 = arith.constant 0 : i32
    %c0_i32_1 = arith.constant 0 : i32
    return %c0_i32, %c0_i32_0 : i32, i32
  }
  func.func @transform_9(%arg0: i32) -> (i32, i32) {
    %c0_i32 = arith.constant 0 : i32
    %c0_i32_0 = arith.constant 0 : i32
    return %arg0, %c0_i32 : i32, i32
  }
}

</mosaic_0001>

<bundles_post_ra>
// kernel: tpu_custom_call.1
= control target key start
LH: loop header
LB: loop body
LE: loop exit
PB: predicated region body
PF: predicated region fallthrough
CT: control target
= control target key end

     0   :  { %14 = vsyncpa [#allocation5], 0  ;;  %s6694_s0 = inlined_call_operand.vmem [shape: f32[1,64,32], index: 0, kind: input, shape index: {}]   ;;  %s6695_s1 = inlined_call_operand.hbm [shape: f32[32,512], index: 1, kind: input, shape index: {}]   ;;  %s6696_s2 = inlined_call_operand.hbm [shape: f32[128,512], index: 2, kind: input, shape index: {}]   ;;  %s6697_s3 = inlined_call_operand.vmem [shape: f32[1,512], index: 3, kind: input, shape index: {}]   ;;  %s6698_s4 = inlined_call_operand.hbm [shape: f32[128,512], index: 4, kind: input, shape index: {}]   ;;  %s6699_s5 = inlined_call_operand.hbm [shape: f32[128,512], index: 5, kind: input, shape index: {}]   ;;  %s6700_s6 = inlined_call_operand.vmem [shape: f32[1,512], index: 6, kind: input, shape index: {}]   ;;  %s6701_s7 = inlined_call_operand.hbm [shape: f32[128,128], index: 7, kind: input, shape index: {}]   ;;  %s6702_s8 = inlined_call_operand.vmem [shape: f32[1,128], index: 8, kind: input, shape index: {}]   ;;  %s6703_s9 = inlined_call_operand.hbm [shape: f32[8,128], index: 9, kind: output, shape index: {}]  }
   0x1   :  { %15 = vsyncpa [#allocation8], 0 }
   0x2   :  { %16 = vsyncpa [#allocation11], 0 }
   0x3   :  { %17 = vsyncpa [#allocation6], 0  ;;  %s4636_s30 = smov [#allocation7]   ;;  %s4637_s11 = smov [#allocation10]  }
   0x4   :  { %s37_s10 = sshll.u32 %s4636_s30, 4  ;;  %s63_s12 = sshll.u32 %s4637_s11, 4  ;;  %s38_s10 = int_to_ptr.vmem [resolvable:$true] %s37_s10  ;;  %s64_s12 = int_to_ptr.vmem [resolvable:$true] %s63_s12 }
   0x5   :  { %s4516_s13 = scalar_lea.vmem %s38_s10, 8192  ;;  %p4521_p1 = scmp.lt.s32.totalorder %s38_s10, %s38_s10 }
   0x6   :  { %p4517_p0 = scmp.ne.s32.totalorder %s38_s10, %s4516_s13  ;;  %p4522_p2 = scmp.lt.s32.totalorder %s4516_s13, %s4516_s13 }
   0x8   :  { %p4523_p3 = por %p4522_p2, %p4521_p1 }
   0xa   :  { %p4524_p4 = pnand %p4523_p3, %p4517_p0 }
   0xc   :  { %4527 = shalt.err (!%p4524_p4)
}
   0xd   :  { %s4638_s14 = smov 512   ;;  %s4639_s15 = smov 32  }
   0xe   :  { %43 = dma.hbm_to_vmem [thread:$0]  %s6696_s2, 8192, %s38_s10, [#allocation8], %s4638_s14, %s4638_s14, %s4639_s15  }
   0xf   :  { %s4536_s18 = scalar_lea.vmem %s64_s12, 8192  ;;  %p4541_p6 = scmp.lt.s32.totalorder %s64_s12, %s64_s12 }
  0x10   :  { %p4537_p5 = scmp.ne.s32.totalorder %s64_s12, %s4536_s18  ;;  %p4542_p7 = scmp.lt.s32.totalorder %s4536_s18, %s4536_s18 }
  0x12   :  { %p4543_p8 = por %p4542_p7, %p4541_p6 }
  0x14   :  { %p4544_p9 = pnand %p4543_p8, %p4537_p5 }
  0x16   :  { %4547 = shalt.err (!%p4544_p9)
}
  0x17   :  { %69 = dma.hbm_to_vmem [thread:$0]  %s6699_s5, 8192, %s64_s12, [#allocation11], %s4638_s14, %s4638_s14, %s4639_s15  }
  0x18   :  { %s4640_s21 = smov [#allocation4]   ;;  %s4641_s23 = smov [#allocation9]  }
  0x19   :  { %s25_s22 = sshll.u32 %s4640_s21, 4  ;;  %s51_s24 = sshll.u32 %s4641_s23, 4  ;;  %s26_s22 = int_to_ptr.vmem [resolvable:$true] %s25_s22  ;;  %s52_s24 = int_to_ptr.vmem [resolvable:$true] %s51_s24 }
  0x1a   :  { %s4556_s2 = scalar_lea.vmem %s26_s22, 2048  ;;  %p4561_p11 = scmp.lt.s32.totalorder %s26_s22, %s26_s22 }
  0x1b   :  { %p4557_p10 = scmp.ne.s32.totalorder %s26_s22, %s4556_s2  ;;  %p4562_p12 = scmp.lt.s32.totalorder %s4556_s2, %s4556_s2 }
  0x1d   :  { %p4563_p13 = por %p4562_p12, %p4561_p11 }
  0x1f   :  { %p4564_p0 = pnand %p4563_p13, %p4557_p10 }
  0x21   :  { %4567 = shalt.err (!%p4564_p0)
}
  0x22   :  { %31 = dma.hbm_to_vmem [thread:$0]  %s6695_s1, 2048, %s26_s22, [#allocation5], %s4638_s14, %s4638_s14, %s4639_s15  }
  0x23   :  { %s4576_s5 = scalar_lea.vmem %s52_s24, 8192  ;;  %p4581_p2 = scmp.lt.s32.totalorder %s52_s24, %s52_s24 }
  0x24   :  { %p4577_p1 = scmp.ne.s32.totalorder %s52_s24, %s4576_s5  ;;  %p4582_p3 = scmp.lt.s32.totalorder %s4576_s5, %s4576_s5 }
  0x26   :  { %p4583_p4 = por %p4582_p3, %p4581_p2 }
  0x28   :  { %p4584_p5 = pnand %p4583_p4, %p4577_p1 }
  0x2a   :  { %4587 = shalt.err (!%p4584_p5)
}
  0x2b   :  { %57 = dma.hbm_to_vmem [thread:$0]  %s6698_s4, 8192, %s52_s24, [#allocation8], %s4638_s14, %s4638_s14, %s4639_s15  }
  0x2c   :  { %s4642_s29 = smov [#allocation12]  }
  0x2d   :  { %s77_s30 = sshll.u32 %s4642_s29, 4  ;;  %s78_s30 = int_to_ptr.vmem [resolvable:$true] %s77_s30 }
  0x2e   :  { %s4596_s10 = scalar_lea.vmem %s78_s30, 2048  ;;  %p4601_p7 = scmp.lt.s32.totalorder %s78_s30, %s78_s30 }
  0x2f   :  { %p4597_p6 = scmp.ne.s32.totalorder %s78_s30, %s4596_s10  ;;  %p4602_p8 = scmp.lt.s32.totalorder %s4596_s10, %s4596_s10 }
  0x31   :  { %p4603_p9 = por %p4602_p8, %p4601_p7 }
  0x33   :  { %p4604_p10 = pnand %p4603_p9, %p4597_p6 }
  0x35   :  { %4607 = shalt.err (!%p4604_p10)
}
  0x36   :  { %s4643_s1 = smov 128   ;;  %s4644_s11 = smov 8  }
  0x37   :  { %83 = dma.hbm_to_vmem [thread:$0]  %s6701_s7, 2048, %s78_s30, [#allocation11], %s4643_s1, %s4643_s1, %s4644_s11  }
  0x38   :  { %4628 = dma.done.wait [#allocation5], 2048  }
  0x39   :  { %4629 = vsyncadd [#allocation5], 4294965248 }
  0x3a   :  { %4630 = dma.done.wait [#allocation8], 16384  }
  0x3b   :  { %4631 = vsyncadd [#allocation8], 4294950912 }
  0x3c   :  { %4632 = dma.done.wait [#allocation11], 10240  }
  0x3d   :  { %4633 = vsyncadd [#allocation11], 4294957056  ;;  %v6704_v0 = vmov 0.0   ;;  %v122_v1 = vld [vmem:[#allocation4 + $0x68] sm:$0xff]  ;;  %v124_v2 = vld [vmem:[#allocation4 + $0x78] sm:$0xff]  ;;  %vm147_vm0 = vcmask 261120  }
  0x3e   :  { %236 = vmatprep.mubr.f32.mxu0 %v6704_v0  ;;  %349 = vmatprep.mubr.f32.mxu1 %v6704_v0  ;;  %v121_v3 = vld [vmem:[#allocation4 + $0x60] sm:$0xff]  ;;  %v123_v4 = vld [vmem:[#allocation4 + $0x70] sm:$0xff]  ;;  %v118_v5 = vld [vmem:[#allocation4 + $0x48] sm:$0xff]  ;;  %vm4646_vm1 = vmmov 0   ;;  %s4647_s29 = smov [#allocation13]  }
  0x3f   :  { %196 = vmatprep.subr.mxu0 %v122_v1  ;;  %309 = vmatprep.subr.mxu1 %v124_v2  ;;  %v120_v6 = vld [vmem:[#allocation4 + $0x58] sm:$0xff]  ;;  %v117_v7 = vld [vmem:[#allocation4 + $0x40] sm:$0xff]  ;;  %v119_v8 = vld [vmem:[#allocation4 + $0x50] sm:$0xff]  ;;  %s4185_s30 = sshll.u32 %s4647_s29, 4  ;;  %s4186_s30 = int_to_ptr.vmem [resolvable:$true] %s4185_s30 }
  0x40   :  { %197 = vmatpush1.msra.mxu0 %v121_v3  ;;  %310 = vmatpush1.msra.mxu1 %v123_v4  ;;  %v114_v9 = vld [vmem:[#allocation4 + $0x28] sm:$0xff]  ;;  %v116_v10 = vld [vmem:[#allocation4 + $0x38] sm:$0xff]  ;;  %v113_v11 = vld [vmem:[#allocation4 + $0x20] sm:$0xff]  ;;  %s4608_s10 = scalar_lea.vmem %s4186_s30, 128  ;;  %p4613_p12 = scmp.lt.s32.totalorder %s4186_s30, %s4186_s30 }
  0x41   :  { %198 = vmatprep.subr.mxu0 %v118_v5  ;;  %311 = vmatprep.subr.mxu1 %v120_v6  ;;  %v115_v12 = vld [vmem:[#allocation4 + $0x30] sm:$0xff]  ;;  %v110_v13 = vld [vmem:[#allocation4 + $0x8] sm:$0xff]  ;;  %v112_v14 = vld [vmem:[#allocation4 + $0x18] sm:$0xff]  ;;  %p4609_p11 = scmp.ne.s32.totalorder %s4186_s30, %s4608_s10  ;;  %p4614_p13 = scmp.lt.s32.totalorder %s4608_s10, %s4608_s10 }
  0x42   :  { %199 = vmatpush1.msra.mxu0 %v117_v7  ;;  %312 = vmatpush1.msra.mxu1 %v119_v8  ;;  %v109_v15 = vld [vmem:[#allocation4] sm:$0xff]  ;;  %v111_v16 = vld [vmem:[#allocation4 + $0x10] sm:$0xff]  ;;  %v4730_v18 = vld [vmem:[#allocation7 + $0x1e8] sm:$0xff] }
  0x43   :  { %200 = vmatprep.subr.mxu0 %v114_v9  ;;  %313 = vmatprep.subr.mxu1 %v116_v10  ;;  %v101_v17 = vld [vmem:[%s6694_s0] sm:$0xff]  ;;  %v4732_v19 = vld [vmem:[#allocation7 + $0x1f8] sm:$0xff]  ;;  %v4736_v21 = vld [vmem:[#allocation7 + $0x1f0] sm:$0xff]  ;;  %p4615_p0 = por %p4614_p13, %p4613_p12 }
  0x44   :  { %201 = vmatpush1.msra.mxu0 %v113_v11  ;;  %314 = vmatpush1.msra.mxu1 %v115_v12  ;;  %v4734_v20 = vld [vmem:[#allocation7 + $0x1e0] sm:$0xff]  ;;  %v4740_v22 = vld [vmem:[#allocation7 + $0x1c8] sm:$0xff]  ;;  %v4742_v23 = vld [vmem:[#allocation7 + $0x1d8] sm:$0xff] }
  0x45   :  { %202 = vmatprep.subr.mxu0 %v110_v13  ;;  %315 = vmatprep.subr.mxu1 %v112_v14  ;;  %v4748_v24 = vld [vmem:[#allocation7 + $0x1c0] sm:$0xff]  ;;  %v4750_v25 = vld [vmem:[#allocation7 + $0x1d0] sm:$0xff]  ;;  %v102_v26 = vld [vmem:[%s6694_s0 + $0x8] sm:$0xff]  ;;  %p4616_p1 = pnand %p4615_p0, %p4609_p11 }
  0x46   :  { %203 = vmatpush1.msra.mxu0 %v109_v15  ;;  %316 = vmatpush1.msra.mxu1 %v111_v16  ;;  %v4759_v27 = vld [vmem:[#allocation7 + $0x1a8] sm:$0xff]  ;;  %v4761_v28 = vld [vmem:[#allocation7 + $0x1b8] sm:$0xff]  ;;  %v4765_v29 = vld [vmem:[#allocation7 + $0x1a0] sm:$0xff] }
  0x47   :  { %4203 = vmatmul.mubr.msk.f32.vlgmr.msra.gmra.mxu0 %vm147_vm0, %v101_v17  ;;  %4211 = vmatmul.mubr.msk.f32.vlgmr.msra.gmra.mxu1 %vm147_vm0, %v101_v17  ;;  %v4767_v30 = vld [vmem:[#allocation7 + $0x1b0] sm:$0xff]  ;;  %v4771_v31 = vld [vmem:[#allocation7 + $0x188] sm:$0xff]  ;;  %v4773_v32 = vld [vmem:[#allocation7 + $0x198] sm:$0xff] }
  0x48   :  { %501 = vmatprep.subr.mxu0 %v4730_v18  ;;  %572 = vmatprep.subr.mxu1 %v4732_v19  ;;  %v4779_v33 = vld [vmem:[#allocation7 + $0x180] sm:$0xff]  ;;  %v4781_v34 = vld [vmem:[#allocation7 + $0x190] sm:$0xff]  ;;  %v4790_v36 = vld [vmem:[#allocation7 + $0x168] sm:$0xff] }
  0x49   :  { %502 = vmatpush1.msra.mxu0 %v4734_v20  ;;  %573 = vmatpush1.msra.mxu1 %v4736_v21  ;;  %v103_v35 = vld [vmem:[%s6694_s0 + $0x10] sm:$0xff]  ;;  %v4792_v37 = vld [vmem:[#allocation7 + $0x178] sm:$0xff]  ;;  %v4796_v38 = vld [vmem:[#allocation7 + $0x160] sm:$0xff] }
  0x4a   :  { %503 = vmatprep.subr.mxu0 %v4740_v22  ;;  %574 = vmatprep.subr.mxu1 %v4742_v23  ;;  %v4798_v39 = vld [vmem:[#allocation7 + $0x170] sm:$0xff]  ;;  %v4802_v40 = vld [vmem:[#allocation7 + $0x148] sm:$0xff]  ;;  %v4804_v41 = vld [vmem:[#allocation7 + $0x158] sm:$0xff] }
  0x4b   :  { %242 = vmatprep.mubr.f32.mxu0 %v6704_v0  ;;  %355 = vmatprep.mubr.f32.mxu1 %v6704_v0  ;;  %v4810_v42 = vld [vmem:[#allocation7 + $0x140] sm:$0xff]  ;;  %v4812_v43 = vld [vmem:[#allocation7 + $0x150] sm:$0xff]  ;;  %v104_v44 = vld [vmem:[%s6694_s0 + $0x18] sm:$0xff] }
  0x4c   :  { %504 = vmatpush1.msra.mxu0 %v4748_v24  ;;  %575 = vmatpush1.msra.mxu1 %v4750_v25  ;;  %v4821_v45 = vld [vmem:[#allocation7 + $0x128] sm:$0xff]  ;;  %v4823_v46 = vld [vmem:[#allocation7 + $0x138] sm:$0xff]  ;;  %v4827_v47 = vld [vmem:[#allocation7 + $0x120] sm:$0xff] }
  0x4d   :  { %4204 = vmatmul.mubr.msk.f32.gmra.mxu0 %vm147_vm0, %v102_v26  ;;  %4212 = vmatmul.mubr.msk.f32.gmra.mxu1 %vm147_vm0, %v102_v26  ;;  %v4829_v48 = vld [vmem:[#allocation7 + $0x130] sm:$0xff]  ;;  %v4833_v49 = vld [vmem:[#allocation7 + $0x108] sm:$0xff]  ;;  %v4835_v50 = vld [vmem:[#allocation7 + $0x118] sm:$0xff] }
  0x4e   :  { %505 = vmatprep.subr.mxu0 %v4759_v27  ;;  %576 = vmatprep.subr.mxu1 %v4761_v28  ;;  %v4841_v51 = vld [vmem:[#allocation7 + $0x100] sm:$0xff]  ;;  %v4843_v52 = vld [vmem:[#allocation7 + $0x110] sm:$0xff]  ;;  %v4852_v54 = vld [vmem:[#allocation7 + $0xe8] sm:$0xff] }
  0x4f   :  { %506 = vmatpush1.msra.mxu0 %v4765_v29  ;;  %577 = vmatpush1.msra.mxu1 %v4767_v30  ;;  %v105_v53 = vld [vmem:[%s6694_s0 + $0x20] sm:$0xff]  ;;  %v4854_v55 = vld [vmem:[#allocation7 + $0xf8] sm:$0xff]  ;;  %v4860_v57 = vld [vmem:[#allocation7 + $0xf0] sm:$0xff] }
  0x50   :  { %507 = vmatprep.subr.mxu0 %v4771_v31  ;;  %578 = vmatprep.subr.mxu1 %v4773_v32  ;;  %v4858_v56 = vld [vmem:[#allocation7 + $0xe0] sm:$0xff]  ;;  %v4864_v58 = vld [vmem:[#allocation7 + $0xc8] sm:$0xff]  ;;  %v4866_v59 = vld [vmem:[#allocation7 + $0xd8] sm:$0xff] }
  0x51   :  { %248 = vmatprep.mubr.f32.mxu0 %v6704_v0  ;;  %361 = vmatprep.mubr.f32.mxu1 %v6704_v0  ;;  %v4872_v60 = vld [vmem:[#allocation7 + $0xc0] sm:$0xff]  ;;  %v4874_v61 = vld [vmem:[#allocation7 + $0xd0] sm:$0xff]  ;;  %v106_v62 = vld [vmem:[%s6694_s0 + $0x28] sm:$0xff] }
  0x52   :  { %508 = vmatpush1.msra.mxu0 %v4779_v33  ;;  %579 = vmatpush1.msra.mxu1 %v4781_v34  ;;  %v4883_v63 = vld [vmem:[#allocation7 + $0xa8] sm:$0xff]  ;;  %v4885_v1 = vld [vmem:[#allocation7 + $0xb8] sm:$0xff]  ;;  %v4889_v2 = vld [vmem:[#allocation7 + $0xa0] sm:$0xff] }
  0x53   :  { %4205 = vmatmul.mubr.msk.f32.gmra.mxu0 %vm147_vm0, %v103_v35  ;;  %4213 = vmatmul.mubr.msk.f32.gmra.mxu1 %vm147_vm0, %v103_v35  ;;  %v4891_v3 = vld [vmem:[#allocation7 + $0xb0] sm:$0xff]  ;;  %v4895_v4 = vld [vmem:[#allocation7 + $0x88] sm:$0xff]  ;;  %v4897_v5 = vld [vmem:[#allocation7 + $0x98] sm:$0xff] }
  0x54   :  { %509 = vmatprep.subr.mxu0 %v4790_v36  ;;  %580 = vmatprep.subr.mxu1 %v4792_v37  ;;  %6889 = vst [vmem:[#allocation18_spill] sm:$0xff] %v4891_v3  ;;  %6890 = vst [vmem:[#allocation19_spill] sm:$0xff] %v4895_v4  ;;  %v4903_v6 = vld [vmem:[#allocation7 + $0x80] sm:$0xff]  ;;  %v4905_v7 = vld [vmem:[#allocation7 + $0x90] sm:$0xff] }
  0x55   :  { %510 = vmatpush1.msra.mxu0 %v4796_v38  ;;  %581 = vmatpush1.msra.mxu1 %v4798_v39  ;;  %6891 = vst [vmem:[#allocation20_spill] sm:$0xff] %v4897_v5  ;;  %6892 = vst [vmem:[#allocation21_spill] sm:$0xff] %v4903_v6  ;;  %v107_v8 = vld [vmem:[%s6694_s0 + $0x30] sm:$0xff]  ;;  %v4914_v9 = vld [vmem:[#allocation7 + $0x68] sm:$0xff] }
  0x56   :  { %511 = vmatprep.subr.mxu0 %v4802_v40  ;;  %582 = vmatprep.subr.mxu1 %v4804_v41  ;;  %6893 = vst [vmem:[#allocation22_spill] sm:$0xff] %v4905_v7  ;;  %6894 = vst [vmem:[#allocation23_spill] sm:$0xff] %v4914_v9  ;;  %v4916_v10 = vld [vmem:[#allocation7 + $0x78] sm:$0xff]  ;;  %v4920_v11 = vld [vmem:[#allocation7 + $0x60] sm:$0xff] }
  0x57   :  { %254 = vmatprep.mubr.f32.mxu0 %v6704_v0  ;;  %367 = vmatprep.mubr.f32.mxu1 %v6704_v0  ;;  %6895 = vst [vmem:[#allocation24_spill] sm:$0xff] %v4916_v10  ;;  %6896 = vst [vmem:[#allocation25_spill] sm:$0xff] %v4920_v11  ;;  %v4922_v12 = vld [vmem:[#allocation7 + $0x70] sm:$0xff]  ;;  %v4926_v13 = vld [vmem:[#allocation7 + $0x48] sm:$0xff] }
  0x58   :  { %512 = vmatpush1.msra.mxu0 %v4810_v42  ;;  %583 = vmatpush1.msra.mxu1 %v4812_v43  ;;  %6897 = vst [vmem:[#allocation26_spill] sm:$0xff] %v4922_v12  ;;  %6898 = vst [vmem:[#allocation27_spill] sm:$0xff] %v4926_v13  ;;  %v4928_v14 = vld [vmem:[#allocation7 + $0x58] sm:$0xff]  ;;  %v4934_v15 = vld [vmem:[#allocation7 + $0x40] sm:$0xff] }
  0x59   :  { %4206 = vmatmul.mubr.msk.f32.gmra.mxu0 %vm147_vm0, %v104_v44  ;;  %4214 = vmatmul.mubr.msk.f32.gmra.mxu1 %vm147_vm0, %v104_v44  ;;  %6899 = vst [vmem:[#allocation28_spill] sm:$0xff] %v4928_v14  ;;  %6900 = vst [vmem:[#allocation29_spill] sm:$0xff] %v4934_v15  ;;  %v4936_v16 = vld [vmem:[#allocation7 + $0x50] sm:$0xff]  ;;  %v108_v17 = vld [vmem:[%s6694_s0 + $0x38] sm:$0xff] }
  0x5a   :  { %513 = vmatprep.subr.mxu0 %v4821_v45  ;;  %584 = vmatprep.subr.mxu1 %v4823_v46  ;;  %6901 = vst [vmem:[#allocation30_spill] sm:$0xff] %v4936_v16  ;;  %v4945_v26 = vld [vmem:[#allocation7 + $0x28] sm:$0xff]  ;;  %v4947_v35 = vld [vmem:[#allocation7 + $0x38] sm:$0xff]  ;;  %v4951_v44 = vld [vmem:[#allocation7 + $0x20] sm:$0xff] }
  0x5b   :  { %514 = vmatpush1.msra.mxu0 %v4827_v47  ;;  %585 = vmatpush1.msra.mxu1 %v4829_v48  ;;  %6902 = vst [vmem:[#allocation31_spill] sm:$0xff] %v4945_v26  ;;  %6903 = vst [vmem:[#allocation32_spill] sm:$0xff] %v4947_v35 }
  0x5c   :  { %515 = vmatprep.subr.mxu0 %v4833_v49  ;;  %586 = vmatprep.subr.mxu1 %v4835_v50  ;;  %6904 = vst [vmem:[#allocation33_spill] sm:$0xff] %v4951_v44 }
  0x5d   :  { %260 = vmatprep.mubr.f32.mxu0 %v6704_v0  ;;  %373 = vmatprep.mubr.f32.mxu1 %v6704_v0 }
  0x5e   :  { %516 = vmatpush1.msra.mxu0 %v4841_v51  ;;  %587 = vmatpush1.msra.mxu1 %v4843_v52 }
  0x5f   :  { %4207 = vmatmul.mubr.msk.f32.gmra.mxu0 %vm147_vm0, %v105_v53  ;;  %4215 = vmatmul.mubr.msk.f32.gmra.mxu1 %vm147_vm0, %v105_v53  ;;  %v4953_v53 = vld [vmem:[#allocation7 + $0x30] sm:$0xff] }
  0x60   :  { %517 = vmatprep.subr.mxu0 %v4852_v54  ;;  %588 = vmatprep.subr.mxu1 %v4854_v55  ;;  %6905 = vst [vmem:[#allocation34_spill] sm:$0xff] %v4953_v53 }
  0x61   :  { %518 = vmatpush1.msra.mxu0 %v4858_v56  ;;  %589 = vmatpush1.msra.mxu1 %v4860_v57 }
  0x62   :  { %519 = vmatprep.subr.mxu0 %v4864_v58  ;;  %590 = vmatprep.subr.mxu1 %v4866_v59 }
  0x63   :  { %266 = vmatprep.mubr.f32.mxu0 %v6704_v0  ;;  %379 = vmatprep.mubr.f32.mxu1 %v6704_v0 }
  0x64   :  { %520 = vmatpush1.msra.mxu0 %v4872_v60  ;;  %591 = vmatpush1.msra.mxu1 %v4874_v61 }
  0x65   :  { %4208 = vmatmul.mubr.msk.f32.gmra.mxu0 %vm147_vm0, %v106_v62  ;;  %4216 = vmatmul.mubr.msk.f32.gmra.mxu1 %vm147_vm0, %v106_v62  ;;  %v4957_v62 = vld [vmem:[#allocation7 + $0x8] sm:$0xff] }
  0x66   :  { %521 = vmatprep.subr.mxu0 %v4883_v63  ;;  %592 = vmatprep.subr.mxu1 %v4885_v1  ;;  %6906 = vst [vmem:[#allocation35_spill] sm:$0xff] %v4957_v62 }
  0x67   :  { %522 = vmatpush1.msra.mxu0 %v4889_v2  ;;  %593 = vmatpush1.msra.mxu1 %v4891_v3 }
  0x68   :  { %523 = vmatprep.subr.mxu0 %v4895_v4  ;;  %594 = vmatprep.subr.mxu1 %v4897_v5 }
  0x69   :  { %272 = vmatprep.mubr.f32.mxu0 %v6704_v0  ;;  %385 = vmatprep.mubr.f32.mxu1 %v6704_v0 }
  0x6a   :  { %524 = vmatpush1.msra.mxu0 %v4903_v6  ;;  %595 = vmatpush1.msra.mxu1 %v4905_v7 }
  0x6b   :  { %4209 = vmatmul.mubr.msk.f32.gmra.mxu0 %vm147_vm0, %v107_v8  ;;  %4217 = vmatmul.mubr.msk.f32.gmra.mxu1 %vm147_vm0, %v107_v8  ;;  %v4959_v8 = vld [vmem:[#allocation7 + $0x18] sm:$0xff] }
  0x6c   :  { %525 = vmatprep.subr.mxu0 %v4914_v9  ;;  %596 = vmatprep.subr.mxu1 %v4916_v10  ;;  %6907 = vst [vmem:[#allocation36_spill] sm:$0xff] %v4959_v8 }
  0x6d   :  { %526 = vmatpush1.msra.mxu0 %v4920_v11  ;;  %597 = vmatpush1.msra.mxu1 %v4922_v12 }
  0x6e   :  { %527 = vmatprep.subr.mxu0 %v4926_v13  ;;  %598 = vmatprep.subr.mxu1 %v4928_v14 }
  0x6f   :  { %278 = vmatprep.mubr.f32.mxu0 %v6704_v0  ;;  %391 = vmatprep.mubr.f32.mxu1 %v6704_v0  ;;  %v4963_v0 = vld [vmem:[#allocation7] sm:$0xff] }
  0x70   :  { %528 = vmatpush1.msra.mxu0 %v4934_v15  ;;  %599 = vmatpush1.msra.mxu1 %v4936_v16  ;;  %6908 = vst [vmem:[#allocation37_spill] sm:$0xff] %v4963_v0  ;;  %v4967_v16 = vld [vmem:[#allocation7 + $0x10] sm:$0xff] }
  0x71   :  { %4210 = vmatmul.mubr.msk.f32.gmra.mxu0 %vm147_vm0, %v108_v17  ;;  %4218 = vmatmul.mubr.msk.f32.gmra.mxu1 %vm147_vm0, %v108_v17  ;;  %6909 = vst [vmem:[#allocation38_spill] sm:$0xff] %v4967_v16  ;;  %v6910_v17 = vmov 0.0  }
  0x72   :  { %529 = vmatprep.subr.mxu0 %v4945_v26  ;;  %600 = vmatprep.subr.mxu1 %v4947_v35 }
  0x73   :  { %530 = vmatpush1.msra.mxu0 %v4951_v44  ;;  %601 = vmatpush1.msra.mxu1 %v4953_v53 }
  0x74   :  { %531 = vmatprep.subr.mxu0 %v4957_v62  ;;  %602 = vmatprep.subr.mxu1 %v4959_v8 }
  0x75   :  { %532 = vmatpush1.msra.mxu0 %v4963_v0  ;;  %565 = vmatprep.mubr.f32.mxu0 %v6910_v17 }
  0x76   :  { %603 = vmatpush1.msra.mxu1 %v4967_v16  ;;  %636 = vmatprep.mubr.f32.mxu1 %v6910_v17 }
  0x77   :  { %566 = vmatmul.mubr.f32.vlgmr.msra.gmra.mxu0 %v6910_v17  ;;  %637 = vmatmul.mubr.f32.vlgmr.msra.gmra.mxu1 %v6910_v17 }
  0x78   :  { %737 = vmatprep.subr.mxu0 %v4730_v18  ;;  %808 = vmatprep.subr.mxu1 %v4732_v19 }
  0x79   :  { %738 = vmatpush1.msra.mxu0 %v4734_v20  ;;  %809 = vmatpush1.msra.mxu1 %v4736_v21 }
  0x7a   :  { %739 = vmatprep.subr.mxu0 %v4740_v22  ;;  %810 = vmatprep.subr.mxu1 %v4742_v23 }
  0x7b   :  { %740 = vmatpush1.msra.mxu0 %v4748_v24  ;;  %811 = vmatpush1.msra.mxu1 %v4750_v25 }
  0x7c   :  { %741 = vmatprep.subr.mxu0 %v4759_v27  ;;  %812 = vmatprep.subr.mxu1 %v4761_v28 }
  0x7d   :  { %742 = vmatpush1.msra.mxu0 %v4765_v29  ;;  %813 = vmatpush1.msra.mxu1 %v4767_v30 }
  0x7e   :  { %743 = vmatprep.subr.mxu0 %v4771_v31  ;;  %814 = vmatprep.subr.mxu1 %v4773_v32 }
  0x7f   :  { %744 = vmatpush1.msra.mxu0 %v4779_v33  ;;  %815 = vmatpush1.msra.mxu1 %v4781_v34 }
  0x80   :  { %745 = vmatprep.subr.mxu0 %v4790_v36  ;;  %816 = vmatprep.subr.mxu1 %v4792_v37 }
  0x81   :  { %746 = vmatpush1.msra.mxu0 %v4796_v38  ;;  %817 = vmatpush1.msra.mxu1 %v4798_v39 }
  0x82   :  { %747 = vmatprep.subr.mxu0 %v4802_v40  ;;  %818 = vmatprep.subr.mxu1 %v4804_v41 }
  0x83   :  { %748 = vmatpush1.msra.mxu0 %v4810_v42  ;;  %819 = vmatpush1.msra.mxu1 %v4812_v43 }
  0x84   :  { %749 = vmatprep.subr.mxu0 %v4821_v45  ;;  %820 = vmatprep.subr.mxu1 %v4823_v46 }
  0x85   :  { %750 = vmatpush1.msra.mxu0 %v4827_v47  ;;  %821 = vmatpush1.msra.mxu1 %v4829_v48 }
  0x86   :  { %751 = vmatprep.subr.mxu0 %v4833_v49  ;;  %822 = vmatprep.subr.mxu1 %v4835_v50 }
  0x87   :  { %752 = vmatpush1.msra.mxu0 %v4841_v51  ;;  %823 = vmatpush1.msra.mxu1 %v4843_v52 }
  0x88   :  { %753 = vmatprep.subr.mxu0 %v4852_v54  ;;  %824 = vmatprep.subr.mxu1 %v4854_v55 }
  0x89   :  { %754 = vmatpush1.msra.mxu0 %v4858_v56  ;;  %825 = vmatpush1.msra.mxu1 %v4860_v57 }
  0x8a   :  { %755 = vmatprep.subr.mxu0 %v4864_v58  ;;  %826 = vmatprep.subr.mxu1 %v4866_v59 }
  0x8b   :  { %756 = vmatpush1.msra.mxu0 %v4872_v60  ;;  %827 = vmatpush1.msra.mxu1 %v4874_v61 }
  0x8c   :  { %757 = vmatprep.subr.mxu0 %v4883_v63  ;;  %828 = vmatprep.subr.mxu1 %v4885_v1 }
  0x8d   :  { %758 = vmatpush1.msra.mxu0 %v4889_v2  ;;  %829 = vmatpush1.msra.mxu1 %v4891_v3 }
  0x8e   :  { %759 = vmatprep.subr.mxu0 %v4895_v4  ;;  %830 = vmatprep.subr.mxu1 %v4897_v5  ;;  %v6911_v4 = vld [vmem:[#allocation30_spill] sm:$0xff] }
  0x8f   :  { %760 = vmatpush1.msra.mxu0 %v4903_v6  ;;  %831 = vmatpush1.msra.mxu1 %v4905_v7 }
  0x90   :  { %761 = vmatprep.subr.mxu0 %v4914_v9  ;;  %832 = vmatprep.subr.mxu1 %v4916_v10 }
  0x91   :  { %762 = vmatpush1.msra.mxu0 %v4920_v11  ;;  %833 = vmatpush1.msra.mxu1 %v4922_v12 }
  0x92   :  { %763 = vmatprep.subr.mxu0 %v4926_v13  ;;  %834 = vmatprep.subr.mxu1 %v4928_v14 }
  0x93   :  { %764 = vmatpush1.msra.mxu0 %v4934_v15  ;;  %835 = vmatpush1.msra.mxu1 %v6911_v4 }
  0x94   :  { %765 = vmatprep.subr.mxu0 %v4945_v26  ;;  %836 = vmatprep.subr.mxu1 %v4947_v35  ;;  %v127_v35 = vlaneseq }
  0x95   :  { %766 = vmatpush1.msra.mxu0 %v4951_v44  ;;  %837 = vmatpush1.msra.mxu1 %v4953_v53 }
  0x96   :  { %767 = vmatprep.subr.mxu0 %v4957_v62  ;;  %838 = vmatprep.subr.mxu1 %v4959_v8  ;;  %v5045_v44 = vshrl.u32 %v127_v35, 7 }
  0x97   :  { %768 = vmatpush1.msra.mxu0 %v4963_v0  ;;  %801 = vmatprep.mubr.f32.mxu0 %v6910_v17 }
  0x98   :  { %839 = vmatpush1.msra.mxu1 %v4967_v16  ;;  %872 = vmatprep.mubr.f32.mxu1 %v6910_v17  ;;  %6912 = vst [vmem:[#allocation39_spill] sm:$0xff] %v5045_v44  ;;  %v6725_v8 = vsub.s32 0, %v5045_v44  ;;  %v6727_v0 = vsub.s32 2, %v5045_v44  ;;  %v125_v16 = vld [vmem:[%s6697_s3] sm:$0xf]  ;;  %v6732_v35 = vsub.s32 3, %v5045_v44 }
  0x99   :  { %974 = vmatprep.subr.mxu0 %v4730_v18  ;;  %1045 = vmatprep.subr.mxu1 %v4732_v19  ;;  %v6731_v19 = vsub.s32 1, %v5045_v44 }
  0x9a   :  { %v130_v26 = vrot.slane %v125_v16, %v6725_v8  ;;  %v5066_v4 = vrot.slane %v125_v16, %v6727_v0  ;;  %v5072_v12 = vrot.slane %v125_v16, %v6732_v35 }
  0x9b   :  { %v134_v13 = vrot.slane %v125_v16, %v6731_v19 }
 0x107   :  { %v5047_v53 = vpop.f32.mrf.mxu0  ;;  %v5049_v62 = vpop.f32.mrf.mxu1 }
 0x109   :  { %v5056_v17 = vpop.f32.mrf.mxu0  ;;  %v5058_v18 = vpop.f32.mrf.mxu1 }
 0x10d   :  { %v244_v15 = vpop.f32.mrf.mxu0  ;;  %v357_v14 = vpop.f32.mrf.mxu1 }
 0x10e   :  { %v5074_v11 = vadd.f32 %v244_v15, %v130_v26  ;;  %v5077_v10 = vadd.f32 %v357_v14, %v5066_v4 }
 0x10f   :  { %v246_v9 = vpop.f32.mrf.mxu0  ;;  %v359_v8 = vpop.f32.mrf.mxu1 }
 0x110   :  { %6913 = vst [vmem:[#allocation40_spill] sm:$0xff] %v5077_v10  ;;  %v5079_v7 = vadd.f32 %v246_v9, %v134_v13  ;;  %v5082_v0 = vadd.f32 %v359_v8, %v5072_v12 }
 0x112   :  { %6914 = vst [vmem:[#allocation41_spill] sm:$0xff] %v5079_v7  ;;  %6915 = vst [vmem:[#allocation42_spill] sm:$0xff] %v5082_v0 }
 0x113   :  { %v250_v6 = vpop.f32.mrf.mxu0  ;;  %v363_v5 = vpop.f32.mrf.mxu1 }
 0x114   :  { %v5084_v3 = vadd.f32 %v250_v6, %v130_v26  ;;  %v5087_v19 = vadd.f32 %v363_v5, %v5066_v4 }
 0x115   :  { %v252_v16 = vpop.f32.mrf.mxu0  ;;  %v365_v15 = vpop.f32.mrf.mxu1 }
 0x116   :  { %6916 = vst [vmem:[#allocation43_spill] sm:$0xff] %v5084_v3  ;;  %6917 = vst [vmem:[#allocation44_spill] sm:$0xff] %v5087_v19  ;;  %v5089_v35 = vadd.f32 %v252_v16, %v134_v13  ;;  %v5092_v14 = vadd.f32 %v365_v15, %v5072_v12 }
 0x118   :  { %6918 = vst [vmem:[#allocation45_spill] sm:$0xff] %v5089_v35  ;;  %6919 = vst [vmem:[#allocation46_spill] sm:$0xff] %v5092_v14 }
 0x119   :  { %v256_v44 = vpop.f32.mrf.mxu0  ;;  %v369_v9 = vpop.f32.mrf.mxu1 }
 0x11a   :  { %v5094_v10 = vadd.f32 %v256_v44, %v130_v26  ;;  %v5097_v8 = vadd.f32 %v369_v9, %v5066_v4 }
 0x11b   :  { %v258_v0 = vpop.f32.mrf.mxu0  ;;  %v371_v6 = vpop.f32.mrf.mxu1 }
 0x11c   :  { %6920 = vst [vmem:[#allocation47_spill] sm:$0xff] %v5094_v10  ;;  %6921 = vst [vmem:[#allocation48_spill] sm:$0xff] %v5097_v8  ;;  %v5099_v3 = vadd.f32 %v258_v0, %v134_v13  ;;  %v5102_v5 = vadd.f32 %v371_v6, %v5072_v12 }
 0x11e   :  { %6922 = vst [vmem:[#allocation49_spill] sm:$0xff] %v5099_v3  ;;  %6923 = vst [vmem:[#allocation50_spill] sm:$0xff] %v5102_v5 }
 0x11f   :  { %v262_v19 = vpop.f32.mrf.mxu0  ;;  %v375_v16 = vpop.f32.mrf.mxu1 }
 0x120   :  { %v5104_v35 = vadd.f32 %v262_v19, %v130_v26  ;;  %v5107_v15 = vadd.f32 %v375_v16, %v5066_v4 }
 0x121   :  { %v264_v14 = vpop.f32.mrf.mxu0  ;;  %v377_v44 = vpop.f32.mrf.mxu1 }
 0x122   :  { %6924 = vst [vmem:[#allocation51_spill] sm:$0xff] %v5104_v35  ;;  %6925 = vst [vmem:[#allocation52_spill] sm:$0xff] %v5107_v15  ;;  %v5109_v10 = vadd.f32 %v264_v14, %v134_v13  ;;  %v5112_v9 = vadd.f32 %v377_v44, %v5072_v12 }
 0x124   :  { %6926 = vst [vmem:[#allocation53_spill] sm:$0xff] %v5109_v10  ;;  %6927 = vst [vmem:[#allocation54_spill] sm:$0xff] %v5112_v9 }
 0x125   :  { %v268_v8 = vpop.f32.mrf.mxu0  ;;  %v381_v0 = vpop.f32.mrf.mxu1 }
 0x126   :  { %v5114_v3 = vadd.f32 %v268_v8, %v130_v26  ;;  %v5117_v6 = vadd.f32 %v381_v0, %v5066_v4 }
 0x127   :  { %v270_v5 = vpop.f32.mrf.mxu0  ;;  %v383_v19 = vpop.f32.mrf.mxu1 }
 0x128   :  { %6928 = vst [vmem:[#allocation55_spill] sm:$0xff] %v5114_v3  ;;  %6929 = vst [vmem:[#allocation56_spill] sm:$0xff] %v5117_v6  ;;  %v5119_v35 = vadd.f32 %v270_v5, %v134_v13  ;;  %v5122_v16 = vadd.f32 %v383_v19, %v5072_v12 }
 0x12a   :  { %6930 = vst [vmem:[#allocation57_spill] sm:$0xff] %v5119_v35  ;;  %6931 = vst [vmem:[#allocation58_spill] sm:$0xff] %v5122_v16 }
 0x12b   :  { %v274_v15 = vpop.f32.mrf.mxu0  ;;  %v387_v14 = vpop.f32.mrf.mxu1 }
 0x12c   :  { %v5124_v10 = vadd.f32 %v274_v15, %v130_v26  ;;  %v5127_v44 = vadd.f32 %v387_v14, %v5066_v4 }
 0x12d   :  { %v276_v9 = vpop.f32.mrf.mxu0  ;;  %v389_v8 = vpop.f32.mrf.mxu1 }
 0x12e   :  { %6932 = vst [vmem:[#allocation59_spill] sm:$0xff] %v5124_v10  ;;  %6933 = vst [vmem:[#allocation60_spill] sm:$0xff] %v5127_v44  ;;  %v5129_v3 = vadd.f32 %v276_v9, %v134_v13  ;;  %v5132_v0 = vadd.f32 %v389_v8, %v5072_v12  ;;  %v239_v9 = vadd.f32 %v5047_v53, %v130_v26 }
 0x12f   :  { %v241_v8 = vadd.f32 %v5056_v17, %v134_v13 }
 0x130   :  { %6934 = vst [vmem:[#allocation61_spill] sm:$0xff] %v5129_v3  ;;  %6935 = vst [vmem:[#allocation62_spill] sm:$0xff] %v5132_v0 }
 0x131   :  { %v280_v6 = vpop.f32.mrf.mxu0  ;;  %v393_v5 = vpop.f32.mrf.mxu1 }
 0x132   :  { %v5134_v35 = vadd.f32 %v280_v6, %v130_v26  ;;  %v5137_v19 = vadd.f32 %v393_v5, %v5066_v4  ;;  %v352_v5 = vadd.f32 %v5049_v62, %v5066_v4 }
 0x133   :  { %v282_v16 = vpop.f32.mrf.mxu0  ;;  %v395_v15 = vpop.f32.mrf.mxu1 }
 0x134   :  { %6936 = vst [vmem:[#allocation63_spill] sm:$0xff] %v5134_v35  ;;  %6937 = vst [vmem:[#allocation64_spill] sm:$0xff] %v5137_v19  ;;  %v5139_v10 = vadd.f32 %v282_v16, %v134_v13  ;;  %v5142_v14 = vadd.f32 %v395_v15, %v5072_v12  ;;  %v354_v15 = vadd.f32 %v5058_v18, %v5072_v12 }
 0x136   :  { %6938 = vst [vmem:[#allocation65_spill] sm:$0xff] %v5139_v10  ;;  %6939 = vst [vmem:[#allocation66_spill] sm:$0xff] %v5142_v14  ;;  %v5407_v14 = vld [vmem:[#allocation7 + $0x30] sm:$0xff] }
 0x137   :  { %v567_v44 = vpop.f32.mrf.mxu0  ;;  %v638_v35 = vpop.f32.mrf.mxu1 }
 0x138   :  { %v643_v0 = vadd.f32 %v567_v44, %v239_v9  ;;  %v645_v16 = vadd.f32 %v638_v35, %v352_v5 }
 0x139   :  { %v569_v3 = vpop.f32.mrf.mxu0  ;;  %v640_v10 = vpop.f32.mrf.mxu1 }
 0x13a   :  { %v647_v7 = vmul.f32 0.5, %v643_v0  ;;  %v644_v6 = vadd.f32 %v569_v3, %v241_v8  ;;  %v646_v26 = vadd.f32 %v640_v10, %v354_v15 }
 0x13c   :  { %4284 = vtanh.f32 %v647_v7  ;;  %v651_v19 = vmul.f32 0.5, %v644_v6  ;;  %v656_v53 = vmul.f32 0.5, %v646_v26 }
 0x13e   :  { %4286 = vtanh.f32 %v651_v19 }
 0x13f   :  { %4288 = vtanh.f32 %v645_v16 }
 0x140   :  { %4290 = vtanh.f32 %v656_v53 }
 0x149   :  { %v4285_v13 = vpop.eup %4284 }
 0x14a   :  { %v649_v17 = vmul.f32 0.5, %v4285_v13 }
 0x14b   :  { %v4287_v44 = vpop.eup %4286 }
 0x14c   :  { %v650_v0 = vadd.f32 0.5, %v649_v17  ;;  %v653_v3 = vmul.f32 0.5, %v4287_v44  ;;  %v4289_v8 = vpop.eup %4288 }
 0x14d   :  { %v4291_v35 = vpop.eup %4290 }
 0x14e   :  { %v654_v9 = vadd.f32 0.5, %v653_v3  ;;  %v661_v7 = vmul.f32 %v4289_v8, %v650_v0  ;;  %v658_v19 = vmul.f32 0.5, %v4291_v35  ;;  %v5235_v0 = vld [vmem:[#allocation7 + $0x1e8] sm:$0xff]  ;;  %v5237_v3 = vld [vmem:[#allocation7 + $0x1f8] sm:$0xff]  ;;  %v5243_v8 = vld [vmem:[#allocation7 + $0x1f0] sm:$0xff] }
 0x14f   :  { %v5255_v35 = vld [vmem:[#allocation7 + $0x1d0] sm:$0xff] }
 0x150   :  { %v660_v4 = vmul.f32 0.0, %v654_v9  ;;  %v659_v12 = vadd.f32 0.5, %v658_v19  ;;  %v5241_v9 = vld [vmem:[#allocation7 + $0x1e0] sm:$0xff]  ;;  %v5259_v19 = vld [vmem:[#allocation7 + $0x1a8] sm:$0xff] }
 0x152   :  { %v5150_v62 = vadd.f32 %v661_v7, %v660_v4  ;;  %v5247_v4 = vld [vmem:[#allocation7 + $0x1c8] sm:$0xff]  ;;  %v5249_v7 = vld [vmem:[#allocation7 + $0x1d8] sm:$0xff] }
 0x154   :  { %4292 = vtanh.f32 %v5150_v62 }
 0x161   :  { %v4293_v18 = vpop.eup %4292 }
 0x162   :  { %v5153_v10 = vmul.f32 %v4293_v18, %v659_v12  ;;  %v5261_v12 = vld [vmem:[#allocation7 + $0x1b8] sm:$0xff]  ;;  %v5265_v18 = vld [vmem:[#allocation7 + $0x1a0] sm:$0xff] }
 0x164   :  { %6940 = vst [vmem:[#allocation67_spill] sm:$0xff] %v5153_v10  ;;  %802 = vmatmul.mubr.f32.vlgmr.msra.gmra.mxu0 %v5153_v10  ;;  %873 = vmatmul.mubr.f32.vlgmr.msra.gmra.mxu1 %v5153_v10  ;;  %v5413_v10 = vld [vmem:[#allocation7 + $0x18] sm:$0xff] }
 0x165   :  { %975 = vmatpush1.msra.mxu0 %v4734_v20  ;;  %1046 = vmatpush1.msra.mxu1 %v4736_v21  ;;  %v6941_v20 = vld [vmem:[#allocation18_spill] sm:$0xff]  ;;  %v6942_v21 = vld [vmem:[#allocation19_spill] sm:$0xff] }
 0x166   :  { %976 = vmatprep.subr.mxu0 %v4740_v22  ;;  %1047 = vmatprep.subr.mxu1 %v4742_v23  ;;  %v6943_v22 = vld [vmem:[#allocation20_spill] sm:$0xff]  ;;  %v6944_v23 = vld [vmem:[#allocation21_spill] sm:$0xff]  ;;  %6967 = vst [vmem:[#allocation19_spill] sm:$0xff] %v5235_v0 }
 0x167   :  { %977 = vmatpush1.msra.mxu0 %v4748_v24  ;;  %1048 = vmatpush1.msra.mxu1 %v4750_v25  ;;  %v6945_v24 = vld [vmem:[#allocation22_spill] sm:$0xff]  ;;  %v6946_v25 = vld [vmem:[#allocation23_spill] sm:$0xff]  ;;  %6968 = vst [vmem:[#allocation20_spill] sm:$0xff] %v5237_v3 }
 0x168   :  { %978 = vmatprep.subr.mxu0 %v4759_v27  ;;  %1049 = vmatprep.subr.mxu1 %v4761_v28  ;;  %v6947_v27 = vld [vmem:[#allocation24_spill] sm:$0xff]  ;;  %v6948_v28 = vld [vmem:[#allocation25_spill] sm:$0xff] }
 0x169   :  { %979 = vmatpush1.msra.mxu0 %v4765_v29  ;;  %1050 = vmatpush1.msra.mxu1 %v4767_v30  ;;  %v6949_v29 = vld [vmem:[#allocation26_spill] sm:$0xff]  ;;  %v6950_v30 = vld [vmem:[#allocation27_spill] sm:$0xff] }
 0x16a   :  { %980 = vmatprep.subr.mxu0 %v4771_v31  ;;  %1051 = vmatprep.subr.mxu1 %v4773_v32  ;;  %v6951_v31 = vld [vmem:[#allocation28_spill] sm:$0xff]  ;;  %v6952_v32 = vld [vmem:[#allocation29_spill] sm:$0xff] }
 0x16b   :  { %981 = vmatpush1.msra.mxu0 %v4779_v33  ;;  %1052 = vmatpush1.msra.mxu1 %v4781_v34  ;;  %v6953_v33 = vld [vmem:[#allocation30_spill] sm:$0xff]  ;;  %v6954_v34 = vld [vmem:[#allocation31_spill] sm:$0xff] }
 0x16c   :  { %982 = vmatprep.subr.mxu0 %v4790_v36  ;;  %1053 = vmatprep.subr.mxu1 %v4792_v37  ;;  %v6955_v36 = vld [vmem:[#allocation32_spill] sm:$0xff]  ;;  %v6956_v37 = vld [vmem:[#allocation33_spill] sm:$0xff] }
 0x16d   :  { %983 = vmatpush1.msra.mxu0 %v4796_v38  ;;  %1054 = vmatpush1.msra.mxu1 %v4798_v39  ;;  %v6957_v38 = vld [vmem:[#allocation34_spill] sm:$0xff]  ;;  %v6958_v39 = vld [vmem:[#allocation35_spill] sm:$0xff] }
 0x16e   :  { %984 = vmatprep.subr.mxu0 %v4802_v40  ;;  %1055 = vmatprep.subr.mxu1 %v4804_v41  ;;  %v6959_v40 = vld [vmem:[#allocation36_spill] sm:$0xff]  ;;  %v6960_v41 = vld [vmem:[#allocation37_spill] sm:$0xff]  ;;  %6983 = vst [vmem:[#allocation35_spill] sm:$0xff] %v5407_v14 }
 0x16f   :  { %985 = vmatpush1.msra.mxu0 %v4810_v42  ;;  %1056 = vmatpush1.msra.mxu1 %v4812_v43  ;;  %v6961_v42 = vmov 0.0   ;;  %v6962_v43 = vld [vmem:[#allocation38_spill] sm:$0xff]  ;;  %6985 = vst [vmem:[#allocation37_spill] sm:$0xff] %v5413_v10 }
 0x170   :  { %986 = vmatprep.subr.mxu0 %v4821_v45  ;;  %1057 = vmatprep.subr.mxu1 %v4823_v46 }
 0x171   :  { %987 = vmatpush1.msra.mxu0 %v4827_v47  ;;  %1058 = vmatpush1.msra.mxu1 %v4829_v48 }
 0x172   :  { %988 = vmatprep.subr.mxu0 %v4833_v49  ;;  %1059 = vmatprep.subr.mxu1 %v4835_v50  ;;  %v6963_v50 = vld [vmem:[#allocation41_spill] sm:$0xff] }
 0x173   :  { %989 = vmatpush1.msra.mxu0 %v4841_v51  ;;  %1060 = vmatpush1.msra.mxu1 %v4843_v52  ;;  %v6964_v52 = vld [vmem:[#allocation40_spill] sm:$0xff] }
 0x174   :  { %990 = vmatprep.subr.mxu0 %v4852_v54  ;;  %1061 = vmatprep.subr.mxu1 %v4854_v55 }
 0x175   :  { %991 = vmatpush1.msra.mxu0 %v4858_v56  ;;  %1062 = vmatpush1.msra.mxu1 %v4860_v57  ;;  %v6965_v57 = vld [vmem:[#allocation42_spill] sm:$0xff] }
 0x176   :  { %992 = vmatprep.subr.mxu0 %v4864_v58  ;;  %1063 = vmatprep.subr.mxu1 %v4866_v59 }
 0x177   :  { %993 = vmatpush1.msra.mxu0 %v4872_v60  ;;  %1064 = vmatpush1.msra.mxu1 %v4874_v61 }
 0x178   :  { %994 = vmatprep.subr.mxu0 %v4883_v63  ;;  %1065 = vmatprep.subr.mxu1 %v4885_v1 }
 0x179   :  { %995 = vmatpush1.msra.mxu0 %v4889_v2  ;;  %1066 = vmatpush1.msra.mxu1 %v6941_v20  ;;  %v5267_v20 = vld [vmem:[#allocation7 + $0x1b0] sm:$0xff] }
 0x17a   :  { %996 = vmatprep.subr.mxu0 %v6942_v21  ;;  %1067 = vmatprep.subr.mxu1 %v6943_v22  ;;  %v5271_v21 = vld [vmem:[#allocation7 + $0x188] sm:$0xff]  ;;  %v5273_v22 = vld [vmem:[#allocation7 + $0x198] sm:$0xff] }
 0x17b   :  { %997 = vmatpush1.msra.mxu0 %v6944_v23  ;;  %1068 = vmatpush1.msra.mxu1 %v6945_v24  ;;  %v5277_v23 = vld [vmem:[#allocation7 + $0x180] sm:$0xff]  ;;  %v5279_v24 = vld [vmem:[#allocation7 + $0x190] sm:$0xff] }
 0x17c   :  { %998 = vmatprep.subr.mxu0 %v6946_v25  ;;  %1069 = vmatprep.subr.mxu1 %v6947_v27  ;;  %v5283_v25 = vld [vmem:[#allocation7 + $0x168] sm:$0xff]  ;;  %v5285_v27 = vld [vmem:[#allocation7 + $0x178] sm:$0xff] }
 0x17d   :  { %999 = vmatpush1.msra.mxu0 %v6948_v28  ;;  %1070 = vmatpush1.msra.mxu1 %v6949_v29  ;;  %v5289_v28 = vld [vmem:[#allocation7 + $0x160] sm:$0xff]  ;;  %v5291_v29 = vld [vmem:[#allocation7 + $0x170] sm:$0xff] }
 0x17e   :  { %1000 = vmatprep.subr.mxu0 %v6950_v30  ;;  %1071 = vmatprep.subr.mxu1 %v6951_v31  ;;  %v5295_v30 = vld [vmem:[#allocation7 + $0x148] sm:$0xff]  ;;  %v5297_v31 = vld [vmem:[#allocation7 + $0x158] sm:$0xff] }
 0x17f   :  { %1001 = vmatpush1.msra.mxu0 %v6952_v32  ;;  %1072 = vmatpush1.msra.mxu1 %v6953_v33  ;;  %v5301_v32 = vld [vmem:[#allocation7 + $0x140] sm:$0xff]  ;;  %v5303_v33 = vld [vmem:[#allocation7 + $0x150] sm:$0xff] }
 0x180   :  { %1002 = vmatprep.subr.mxu0 %v6954_v34  ;;  %1073 = vmatprep.subr.mxu1 %v6955_v36  ;;  %v5307_v34 = vld [vmem:[#allocation7 + $0x128] sm:$0xff]  ;;  %v5309_v36 = vld [vmem:[#allocation7 + $0x138] sm:$0xff] }
 0x181   :  { %1003 = vmatpush1.msra.mxu0 %v6956_v37  ;;  %1074 = vmatpush1.msra.mxu1 %v6957_v38  ;;  %v5313_v37 = vld [vmem:[#allocation7 + $0x120] sm:$0xff]  ;;  %v5315_v38 = vld [vmem:[#allocation7 + $0x130] sm:$0xff] }
 0x182   :  { %1004 = vmatprep.subr.mxu0 %v6958_v39  ;;  %1075 = vmatprep.subr.mxu1 %v6959_v40  ;;  %v5319_v39 = vld [vmem:[#allocation7 + $0x108] sm:$0xff]  ;;  %v5321_v40 = vld [vmem:[#allocation7 + $0x118] sm:$0xff] }
 0x183   :  { %1005 = vmatpush1.msra.mxu0 %v6960_v41  ;;  %1038 = vmatprep.mubr.f32.mxu0 %v6961_v42  ;;  %v5325_v41 = vld [vmem:[#allocation7 + $0x100] sm:$0xff] }
 0x184   :  { %1076 = vmatpush1.msra.mxu1 %v6962_v43  ;;  %1109 = vmatprep.mubr.f32.mxu1 %v6961_v42  ;;  %v5327_v43 = vld [vmem:[#allocation7 + $0x110] sm:$0xff] }
 0x185   :  { %1211 = vmatprep.subr.mxu0 %v5235_v0  ;;  %1282 = vmatprep.subr.mxu1 %v5237_v3 }
 0x224   :  { %v803_v45 = vpop.f32.mrf.mxu0  ;;  %v874_v47 = vpop.f32.mrf.mxu1 }
 0x225   :  { %v879_v46 = vadd.f32 %v803_v45, %v5074_v11  ;;  %v881_v54 = vadd.f32 %v874_v47, %v6964_v52  ;;  %v5331_v45 = vld [vmem:[#allocation7 + $0xe8] sm:$0xff]  ;;  %v5335_v47 = vld [vmem:[#allocation7 + $0xe0] sm:$0xff]  ;;  %v5349_v52 = vld [vmem:[#allocation7 + $0xd0] sm:$0xff] }
 0x226   :  { %v805_v48 = vpop.f32.mrf.mxu0  ;;  %v876_v56 = vpop.f32.mrf.mxu1 }
 0x227   :  { %v883_v49 = vmul.f32 0.5, %v879_v46  ;;  %v880_v51 = vadd.f32 %v805_v48, %v6963_v50  ;;  %v882_v58 = vadd.f32 %v876_v56, %v6965_v57  ;;  %v5333_v46 = vld [vmem:[#allocation7 + $0xf8] sm:$0xff]  ;;  %v5339_v48 = vld [vmem:[#allocation7 + $0xf0] sm:$0xff]  ;;  %v5357_v56 = vld [vmem:[#allocation7 + $0xa0] sm:$0xff] }
 0x228   :  { %v5343_v50 = vld [vmem:[#allocation7 + $0xd8] sm:$0xff]  ;;  %v5359_v57 = vld [vmem:[#allocation7 + $0xb0] sm:$0xff] }
 0x229   :  { %4294 = vtanh.f32 %v883_v49  ;;  %v887_v55 = vmul.f32 0.5, %v880_v51  ;;  %v892_v59 = vmul.f32 0.5, %v882_v58  ;;  %v5341_v49 = vld [vmem:[#allocation7 + $0xc8] sm:$0xff]  ;;  %v5347_v51 = vld [vmem:[#allocation7 + $0xc0] sm:$0xff] }
 0x22a   :  { %v5363_v58 = vld [vmem:[#allocation7 + $0x88] sm:$0xff] }
 0x22b   :  { %4296 = vtanh.f32 %v887_v55  ;;  %v5355_v55 = vld [vmem:[#allocation7 + $0xb8] sm:$0xff] }
 0x22c   :  { %4298 = vtanh.f32 %v881_v54  ;;  %v5351_v54 = vld [vmem:[#allocation7 + $0xa8] sm:$0xff] }
 0x22d   :  { %4300 = vtanh.f32 %v892_v59  ;;  %v5365_v59 = vld [vmem:[#allocation7 + $0x98] sm:$0xff] }
 0x22e   :  { %6969 = vst [vmem:[#allocation21_spill] sm:$0xff] %v5365_v59 }
 0x236   :  { %v4295_v60 = vpop.eup %4294 }
 0x237   :  { %v885_v61 = vmul.f32 0.5, %v4295_v60  ;;  %v5369_v60 = vld [vmem:[#allocation7 + $0x80] sm:$0xff] }
 0x238   :  { %v4297_v63 = vpop.eup %4296  ;;  %6970 = vst [vmem:[#allocation22_spill] sm:$0xff] %v5369_v60 }
 0x239   :  { %v886_v1 = vadd.f32 0.5, %v885_v61  ;;  %v889_v2 = vmul.f32 0.5, %v4297_v63  ;;  %v4299_v11 = vpop.eup %4298  ;;  %v5371_v61 = vld [vmem:[#allocation7 + $0x90] sm:$0xff]  ;;  %v5375_v63 = vld [vmem:[#allocation7 + $0x68] sm:$0xff] }
 0x23a   :  { %v4301_v26 = vpop.eup %4300  ;;  %6971 = vst [vmem:[#allocation23_spill] sm:$0xff] %v5371_v61  ;;  %6972 = vst [vmem:[#allocation24_spill] sm:$0xff] %v5375_v63 }
 0x23b   :  { %v890_v6 = vadd.f32 0.5, %v889_v2  ;;  %v897_v5 = vmul.f32 %v4299_v11, %v886_v1  ;;  %v894_v53 = vmul.f32 0.5, %v4301_v26  ;;  %v5377_v1 = vld [vmem:[#allocation7 + $0x78] sm:$0xff]  ;;  %v5381_v2 = vld [vmem:[#allocation7 + $0x60] sm:$0xff]  ;;  %v5383_v11 = vld [vmem:[#allocation7 + $0x70] sm:$0xff] }
 0x23c   :  { %6973 = vst [vmem:[#allocation25_spill] sm:$0xff] %v5377_v1  ;;  %6974 = vst [vmem:[#allocation26_spill] sm:$0xff] %v5381_v2  ;;  %v5395_v26 = vld [vmem:[#allocation7 + $0x50] sm:$0xff] }
 0x23d   :  { %v896_v16 = vmul.f32 %v890_v6, %v5150_v62  ;;  %v895_v13 = vadd.f32 0.5, %v894_v53  ;;  %v5253_v62 = vld [vmem:[#allocation7 + $0x1c0] sm:$0xff]  ;;  %6975 = vst [vmem:[#allocation27_spill] sm:$0xff] %v5383_v11  ;;  %v5387_v6 = vld [vmem:[#allocation7 + $0x48] sm:$0xff]  ;;  %6979 = vst [vmem:[#allocation31_spill] sm:$0xff] %v5395_v26 }
 0x23e   :  { %6976 = vst [vmem:[#allocation28_spill] sm:$0xff] %v5387_v6  ;;  %v5399_v53 = vld [vmem:[#allocation7 + $0x28] sm:$0xff] }
 0x23f   :  { %v5226_v15 = vadd.f32 %v897_v5, %v896_v16  ;;  %v5389_v5 = vld [vmem:[#allocation7 + $0x58] sm:$0xff]  ;;  %v5393_v16 = vld [vmem:[#allocation7 + $0x40] sm:$0xff]  ;;  %6980 = vst [vmem:[#allocation32_spill] sm:$0xff] %v5399_v53 }
 0x240   :  { %6977 = vst [vmem:[#allocation29_spill] sm:$0xff] %v5389_v5  ;;  %6978 = vst [vmem:[#allocation30_spill] sm:$0xff] %v5393_v16 }
 0x241   :  { %4302 = vtanh.f32 %v5226_v15 }
 0x24e   :  { %v4303_v17 = vpop.eup %4302 }
 0x24f   :  { %v5229_v44 = vmul.f32 %v4303_v17, %v895_v13  ;;  %v5401_v13 = vld [vmem:[#allocation7 + $0x38] sm:$0xff]  ;;  %v5405_v17 = vld [vmem:[#allocation7 + $0x20] sm:$0xff] }
 0x250   :  { %6981 = vst [vmem:[#allocation33_spill] sm:$0xff] %v5401_v13  ;;  %6982 = vst [vmem:[#allocation34_spill] sm:$0xff] %v5405_v17 }
 0x251   :  { %6966 = vst [vmem:[#allocation18_spill] sm:$0xff] %v5229_v44  ;;  %1039 = vmatmul.mubr.f32.vlgmr.msra.gmra.mxu0 %v5229_v44  ;;  %1110 = vmatmul.mubr.f32.vlgmr.msra.gmra.mxu1 %v5229_v44  ;;  %v5411_v44 = vld [vmem:[#allocation7 + $0x8] sm:$0xff] }
 0x252   :  { %1275 = vmatprep.mubr.f32.mxu0 %v6961_v42  ;;  %1346 = vmatprep.mubr.f32.mxu1 %v6961_v42  ;;  %6984 = vst [vmem:[#allocation36_spill] sm:$0xff] %v5411_v44  ;;  %v5417_v42 = vld [vmem:[#allocation7] sm:$0xff] }
 0x253   :  { %1212 = vmatpush1.msra.mxu0 %v5241_v9  ;;  %1283 = vmatpush1.msra.mxu1 %v5243_v8  ;;  %6986 = vst [vmem:[#allocation38_spill] sm:$0xff] %v5417_v42 }
 0x254   :  { %1213 = vmatprep.subr.mxu0 %v5247_v4  ;;  %1284 = vmatprep.subr.mxu1 %v5249_v7 }
 0x255   :  { %1214 = vmatpush1.msra.mxu0 %v5253_v62  ;;  %1285 = vmatpush1.msra.mxu1 %v5255_v35 }
 0x256   :  { %1215 = vmatprep.subr.mxu0 %v5259_v19  ;;  %1286 = vmatprep.subr.mxu1 %v5261_v12 }
 0x257   :  { %1216 = vmatpush1.msra.mxu0 %v5265_v18  ;;  %1287 = vmatpush1.msra.mxu1 %v5267_v20 }
 0x258   :  { %1217 = vmatprep.subr.mxu0 %v5271_v21  ;;  %1288 = vmatprep.subr.mxu1 %v5273_v22 }
 0x259   :  { %1218 = vmatpush1.msra.mxu0 %v5277_v23  ;;  %1289 = vmatpush1.msra.mxu1 %v5279_v24 }
 0x25a   :  { %1219 = vmatprep.subr.mxu0 %v5283_v25  ;;  %1290 = vmatprep.subr.mxu1 %v5285_v27 }
 0x25b   :  { %1220 = vmatpush1.msra.mxu0 %v5289_v28  ;;  %1291 = vmatpush1.msra.mxu1 %v5291_v29 }
 0x25c   :  { %1221 = vmatprep.subr.mxu0 %v5295_v30  ;;  %1292 = vmatprep.subr.mxu1 %v5297_v31 }
 0x25d   :  { %1222 = vmatpush1.msra.mxu0 %v5301_v32  ;;  %1293 = vmatpush1.msra.mxu1 %v5303_v33 }
 0x25e   :  { %1223 = vmatprep.subr.mxu0 %v5307_v34  ;;  %1294 = vmatprep.subr.mxu1 %v5309_v36 }
 0x25f   :  { %1224 = vmatpush1.msra.mxu0 %v5313_v37  ;;  %1295 = vmatpush1.msra.mxu1 %v5315_v38 }
 0x260   :  { %1225 = vmatprep.subr.mxu0 %v5319_v39  ;;  %1296 = vmatprep.subr.mxu1 %v5321_v40 }
 0x261   :  { %1226 = vmatpush1.msra.mxu0 %v5325_v41  ;;  %1297 = vmatpush1.msra.mxu1 %v5327_v43 }
 0x262   :  { %1227 = vmatprep.subr.mxu0 %v5331_v45  ;;  %1298 = vmatprep.subr.mxu1 %v5333_v46 }
 0x263   :  { %1228 = vmatpush1.msra.mxu0 %v5335_v47  ;;  %1299 = vmatpush1.msra.mxu1 %v5339_v48 }
 0x264   :  { %1229 = vmatprep.subr.mxu0 %v5341_v49  ;;  %1300 = vmatprep.subr.mxu1 %v5343_v50 }
 0x265   :  { %1230 = vmatpush1.msra.mxu0 %v5347_v51  ;;  %1301 = vmatpush1.msra.mxu1 %v5349_v52 }
 0x266   :  { %1231 = vmatprep.subr.mxu0 %v5351_v54  ;;  %1302 = vmatprep.subr.mxu1 %v5355_v55 }
 0x267   :  { %1232 = vmatpush1.msra.mxu0 %v5357_v56  ;;  %1303 = vmatpush1.msra.mxu1 %v5359_v57 }
 0x268   :  { %1233 = vmatprep.subr.mxu0 %v5363_v58  ;;  %1304 = vmatprep.subr.mxu1 %v5365_v59 }
 0x269   :  { %1234 = vmatpush1.msra.mxu0 %v5369_v60  ;;  %1305 = vmatpush1.msra.mxu1 %v5371_v61 }
 0x26a   :  { %1235 = vmatprep.subr.mxu0 %v5375_v63  ;;  %1306 = vmatprep.subr.mxu1 %v5377_v1 }
 0x26b   :  { %1236 = vmatpush1.msra.mxu0 %v5381_v2  ;;  %1307 = vmatpush1.msra.mxu1 %v5383_v11  ;;  %v6989_v11 = vld [vmem:[#allocation45_spill] sm:$0xff] }
 0x26c   :  { %1237 = vmatprep.subr.mxu0 %v5387_v6  ;;  %1308 = vmatprep.subr.mxu1 %v5389_v5  ;;  %v5419_v6 = vld [vmem:[#allocation7 + $0x10] sm:$0xff] }
 0x26d   :  { %1238 = vmatpush1.msra.mxu0 %v5393_v16  ;;  %1309 = vmatpush1.msra.mxu1 %v5395_v26  ;;  %6987 = vst [vmem:[#allocation41_spill] sm:$0xff] %v5419_v6 }
 0x26e   :  { %1239 = vmatprep.subr.mxu0 %v5399_v53  ;;  %1310 = vmatprep.subr.mxu1 %v5401_v13  ;;  %v6988_v53 = vld [vmem:[#allocation43_spill] sm:$0xff] }
 0x26f   :  { %1240 = vmatpush1.msra.mxu0 %v5405_v17  ;;  %1311 = vmatpush1.msra.mxu1 %v5407_v14 }
 0x270   :  { %1241 = vmatprep.subr.mxu0 %v5411_v44  ;;  %1312 = vmatprep.subr.mxu1 %v5413_v10  ;;  %v6990_v44 = vld [vmem:[#allocation44_spill] sm:$0xff] }
 0x271   :  { %1242 = vmatpush1.msra.mxu0 %v5417_v42  ;;  %1313 = vmatpush1.msra.mxu1 %v5419_v6  ;;  %v6991_v6 = vld [vmem:[#allocation46_spill] sm:$0xff] }
 0x272   :  { %1448 = vmatprep.subr.mxu0 %v5235_v0  ;;  %1519 = vmatprep.subr.mxu1 %v5237_v3 }
 0x311   :  { %v1040_v13 = vpop.f32.mrf.mxu0  ;;  %v1111_v16 = vpop.f32.mrf.mxu1 }
 0x312   :  { %v1116_v26 = vadd.f32 %v1040_v13, %v6988_v53  ;;  %v1118_v2 = vadd.f32 %v1111_v16, %v6990_v44  ;;  %v7002_v16 = vld [vmem:[#allocation30_spill] sm:$0xff] }
 0x313   :  { %v1042_v5 = vpop.f32.mrf.mxu0  ;;  %v1113_v42 = vpop.f32.mrf.mxu1 }
 0x314   :  { %v1120_v17 = vmul.f32 0.5, %v1116_v26  ;;  %v1117_v14 = vadd.f32 %v1042_v5, %v6989_v11  ;;  %v1119_v1 = vadd.f32 %v1113_v42, %v6991_v6  ;;  %v7001_v6 = vld [vmem:[#allocation29_spill] sm:$0xff] }
 0x316   :  { %4304 = vtanh.f32 %v1120_v17  ;;  %v1124_v10 = vmul.f32 0.5, %v1117_v14  ;;  %v1129_v0 = vmul.f32 0.5, %v1119_v1  ;;  %v7003_v17 = vld [vmem:[#allocation31_spill] sm:$0xff] }
 0x318   :  { %4306 = vtanh.f32 %v1124_v10 }
 0x319   :  { %4308 = vtanh.f32 %v1118_v2  ;;  %v7000_v2 = vld [vmem:[#allocation28_spill] sm:$0xff] }
 0x31a   :  { %4310 = vtanh.f32 %v1129_v0  ;;  %v6994_v0 = vld [vmem:[#allocation22_spill] sm:$0xff] }
 0x323   :  { %v4305_v63 = vpop.eup %4304 }
 0x324   :  { %v1122_v3 = vmul.f32 0.5, %v4305_v63  ;;  %v6999_v63 = vld [vmem:[#allocation27_spill] sm:$0xff] }
 0x325   :  { %v4307_v61 = vpop.eup %4306 }
 0x326   :  { %v1123_v60 = vadd.f32 0.5, %v1122_v3  ;;  %v1126_v53 = vmul.f32 0.5, %v4307_v61  ;;  %v4309_v13 = vpop.eup %4308  ;;  %v6995_v3 = vld [vmem:[#allocation23_spill] sm:$0xff]  ;;  %v6998_v61 = vld [vmem:[#allocation26_spill] sm:$0xff] }
 0x327   :  { %v4311_v14 = vpop.eup %4310 }
 0x328   :  { %v1127_v26 = vadd.f32 0.5, %v1126_v53  ;;  %v1134_v59 = vmul.f32 %v4309_v13, %v1123_v60  ;;  %v1131_v10 = vmul.f32 0.5, %v4311_v14  ;;  %v6997_v60 = vld [vmem:[#allocation25_spill] sm:$0xff]  ;;  %v7004_v53 = vld [vmem:[#allocation32_spill] sm:$0xff] }
 0x329   :  { %v7005_v13 = vld [vmem:[#allocation33_spill] sm:$0xff]  ;;  %v7008_v14 = vld [vmem:[#allocation36_spill] sm:$0xff] }
 0x32a   :  { %v1133_v11 = vmul.f32 %v1127_v26, %v5226_v15  ;;  %v1132_v44 = vadd.f32 0.5, %v1131_v10  ;;  %v6993_v15 = vld [vmem:[#allocation21_spill] sm:$0xff]  ;;  %v7006_v26 = vld [vmem:[#allocation34_spill] sm:$0xff] }
 0x32b   :  { %v7009_v10 = vld [vmem:[#allocation37_spill] sm:$0xff] }
 0x32c   :  { %v5434_v5 = vadd.f32 %v1134_v59, %v1133_v11  ;;  %v6996_v59 = vld [vmem:[#allocation24_spill] sm:$0xff]  ;;  %v7007_v11 = vld [vmem:[#allocation35_spill] sm:$0xff] }
 0x32e   :  { %4312 = vtanh.f32 %v5434_v5 }
 0x33b   :  { %v4313_v42 = vpop.eup %4312 }
 0x33c   :  { %v5437_v1 = vmul.f32 %v4313_v42, %v1132_v44  ;;  %v7010_v44 = vld [vmem:[#allocation38_spill] sm:$0xff]  ;;  %v7011_v42 = vmov 0.0  }
 0x33e   :  { %6992 = vst [vmem:[#allocation40_spill] sm:$0xff] %v5437_v1  ;;  %1276 = vmatmul.mubr.f32.vlgmr.msra.gmra.mxu0 %v5437_v1  ;;  %1347 = vmatmul.mubr.f32.vlgmr.msra.gmra.mxu1 %v5437_v1  ;;  %v7012_v1 = vld [vmem:[#allocation41_spill] sm:$0xff] }
 0x33f   :  { %1449 = vmatpush1.msra.mxu0 %v5241_v9  ;;  %1520 = vmatpush1.msra.mxu1 %v5243_v8 }
 0x340   :  { %1450 = vmatprep.subr.mxu0 %v5247_v4  ;;  %1521 = vmatprep.subr.mxu1 %v5249_v7 }
 0x341   :  { %1451 = vmatpush1.msra.mxu0 %v5253_v62  ;;  %1522 = vmatpush1.msra.mxu1 %v5255_v35 }
 0x342   :  { %1452 = vmatprep.subr.mxu0 %v5259_v19  ;;  %1523 = vmatprep.subr.mxu1 %v5261_v12 }
 0x343   :  { %1453 = vmatpush1.msra.mxu0 %v5265_v18  ;;  %1524 = vmatpush1.msra.mxu1 %v5267_v20 }
 0x344   :  { %1454 = vmatprep.subr.mxu0 %v5271_v21  ;;  %1525 = vmatprep.subr.mxu1 %v5273_v22 }
 0x345   :  { %1455 = vmatpush1.msra.mxu0 %v5277_v23  ;;  %1526 = vmatpush1.msra.mxu1 %v5279_v24 }
 0x346   :  { %1456 = vmatprep.subr.mxu0 %v5283_v25  ;;  %1527 = vmatprep.subr.mxu1 %v5285_v27 }
 0x347   :  { %1457 = vmatpush1.msra.mxu0 %v5289_v28  ;;  %1528 = vmatpush1.msra.mxu1 %v5291_v29 }
 0x348   :  { %1458 = vmatprep.subr.mxu0 %v5295_v30  ;;  %1529 = vmatprep.subr.mxu1 %v5297_v31 }
 0x349   :  { %1459 = vmatpush1.msra.mxu0 %v5301_v32  ;;  %1530 = vmatpush1.msra.mxu1 %v5303_v33 }
 0x34a   :  { %1460 = vmatprep.subr.mxu0 %v5307_v34  ;;  %1531 = vmatprep.subr.mxu1 %v5309_v36 }
 0x34b   :  { %1461 = vmatpush1.msra.mxu0 %v5313_v37  ;;  %1532 = vmatpush1.msra.mxu1 %v5315_v38 }
 0x34c   :  { %1462 = vmatprep.subr.mxu0 %v5319_v39  ;;  %1533 = vmatprep.subr.mxu1 %v5321_v40 }
 0x34d   :  { %1463 = vmatpush1.msra.mxu0 %v5325_v41  ;;  %1534 = vmatpush1.msra.mxu1 %v5327_v43 }
 0x34e   :  { %1464 = vmatprep.subr.mxu0 %v5331_v45  ;;  %1535 = vmatprep.subr.mxu1 %v5333_v46 }
 0x34f   :  { %1465 = vmatpush1.msra.mxu0 %v5335_v47  ;;  %1536 = vmatpush1.msra.mxu1 %v5339_v48 }
 0x350   :  { %1466 = vmatprep.subr.mxu0 %v5341_v49  ;;  %1537 = vmatprep.subr.mxu1 %v5343_v50 }
 0x351   :  { %1467 = vmatpush1.msra.mxu0 %v5347_v51  ;;  %1538 = vmatpush1.msra.mxu1 %v5349_v52 }
 0x352   :  { %1468 = vmatprep.subr.mxu0 %v5351_v54  ;;  %1539 = vmatprep.subr.mxu1 %v5355_v55 }
 0x353   :  { %1469 = vmatpush1.msra.mxu0 %v5357_v56  ;;  %1540 = vmatpush1.msra.mxu1 %v5359_v57 }
 0x354   :  { %1470 = vmatprep.subr.mxu0 %v5363_v58  ;;  %1541 = vmatprep.subr.mxu1 %v6993_v15 }
 0x355   :  { %1471 = vmatpush1.msra.mxu0 %v6994_v0  ;;  %1542 = vmatpush1.msra.mxu1 %v6995_v3 }
 0x356   :  { %1472 = vmatprep.subr.mxu0 %v6996_v59  ;;  %1543 = vmatprep.subr.mxu1 %v6997_v60 }
 0x357   :  { %1473 = vmatpush1.msra.mxu0 %v6998_v61  ;;  %1544 = vmatpush1.msra.mxu1 %v6999_v63 }
 0x358   :  { %1474 = vmatprep.subr.mxu0 %v7000_v2  ;;  %1545 = vmatprep.subr.mxu1 %v7001_v6  ;;  %v7016_v2 = vld [vmem:[#allocation49_spill] sm:$0xff] }
 0x359   :  { %1475 = vmatpush1.msra.mxu0 %v7002_v16  ;;  %1546 = vmatpush1.msra.mxu1 %v7003_v17  ;;  %v7013_v17 = vld [vmem:[#allocation19_spill] sm:$0xff] }
 0x35a   :  { %1476 = vmatprep.subr.mxu0 %v7004_v53  ;;  %1547 = vmatprep.subr.mxu1 %v7005_v13  ;;  %v7014_v53 = vld [vmem:[#allocation20_spill] sm:$0xff] }
 0x35b   :  { %1477 = vmatpush1.msra.mxu0 %v7006_v26  ;;  %1548 = vmatpush1.msra.mxu1 %v7007_v11  ;;  %v7015_v26 = vld [vmem:[#allocation47_spill] sm:$0xff] }
 0x35c   :  { %1478 = vmatprep.subr.mxu0 %v7008_v14  ;;  %1549 = vmatprep.subr.mxu1 %v7009_v10 }
 0x35d   :  { %1479 = vmatpush1.msra.mxu0 %v7010_v44  ;;  %1512 = vmatprep.mubr.f32.mxu0 %v7011_v42  ;;  %v7017_v44 = vld [vmem:[#allocation48_spill] sm:$0xff] }
 0x35e   :  { %1550 = vmatpush1.msra.mxu1 %v7012_v1  ;;  %1583 = vmatprep.mubr.f32.mxu1 %v7011_v42  ;;  %v7018_v42 = vld [vmem:[#allocation50_spill] sm:$0xff] }
 0x35f   :  { %1685 = vmatprep.subr.mxu0 %v7013_v17  ;;  %1756 = vmatprep.subr.mxu1 %v7014_v53 }
 0x3fe   :  { %v1277_v13 = vpop.f32.mrf.mxu0  ;;  %v1348_v11 = vpop.f32.mrf.mxu1 }
 0x3ff   :  { %v1353_v16 = vadd.f32 %v1277_v13, %v7015_v26  ;;  %v1355_v63 = vadd.f32 %v1348_v11, %v7017_v44  ;;  %v7029_v44 = vld [vmem:[#allocation30_spill] sm:$0xff] }
 0x400   :  { %v1279_v6 = vpop.f32.mrf.mxu0  ;;  %v1350_v1 = vpop.f32.mrf.mxu1 }
 0x401   :  { %v1357_v14 = vmul.f32 0.5, %v1353_v16  ;;  %v1354_v10 = vadd.f32 %v1279_v6, %v7016_v2  ;;  %v1356_v60 = vadd.f32 %v1350_v1, %v7018_v42  ;;  %v7030_v42 = vld [vmem:[#allocation31_spill] sm:$0xff] }
 0x403   :  { %4314 = vtanh.f32 %v1357_v14  ;;  %v1361_v61 = vmul.f32 0.5, %v1354_v10  ;;  %v1366_v17 = vmul.f32 0.5, %v1356_v60  ;;  %v7027_v14 = vld [vmem:[#allocation28_spill] sm:$0xff]  ;;  %v7028_v10 = vld [vmem:[#allocation29_spill] sm:$0xff] }
 0x405   :  { %4316 = vtanh.f32 %v1361_v61 }
 0x406   :  { %4318 = vtanh.f32 %v1355_v63 }
 0x407   :  { %4320 = vtanh.f32 %v1366_v17  ;;  %v7025_v17 = vld [vmem:[#allocation26_spill] sm:$0xff] }
 0x410   :  { %v4315_v59 = vpop.eup %4314 }
 0x411   :  { %v1359_v53 = vmul.f32 0.5, %v4315_v59  ;;  %v7024_v59 = vld [vmem:[#allocation25_spill] sm:$0xff] }
 0x412   :  { %v4317_v3 = vpop.eup %4316 }
 0x413   :  { %v1360_v0 = vadd.f32 0.5, %v1359_v53  ;;  %v1363_v13 = vmul.f32 0.5, %v4317_v3  ;;  %v4319_v26 = vpop.eup %4318  ;;  %v7023_v3 = vld [vmem:[#allocation24_spill] sm:$0xff]  ;;  %v7026_v53 = vld [vmem:[#allocation27_spill] sm:$0xff] }
 0x414   :  { %v4321_v61 = vpop.eup %4320 }
 0x415   :  { %v1364_v16 = vadd.f32 0.5, %v1363_v13  ;;  %v1371_v15 = vmul.f32 %v4319_v26, %v1360_v0  ;;  %v1368_v63 = vmul.f32 0.5, %v4321_v61  ;;  %v7022_v0 = vld [vmem:[#allocation23_spill] sm:$0xff]  ;;  %v7031_v13 = vld [vmem:[#allocation32_spill] sm:$0xff]  ;;  %v7032_v26 = vld [vmem:[#allocation33_spill] sm:$0xff] }
 0x416   :  { %v7035_v61 = vld [vmem:[#allocation36_spill] sm:$0xff] }
 0x417   :  { %v1370_v2 = vmul.f32 %v1364_v16, %v5434_v5  ;;  %v1369_v11 = vadd.f32 0.5, %v1368_v63  ;;  %v7020_v5 = vld [vmem:[#allocation21_spill] sm:$0xff]  ;;  %v7033_v16 = vld [vmem:[#allocation34_spill] sm:$0xff] }
 0x418   :  { %v7036_v63 = vld [vmem:[#allocation37_spill] sm:$0xff] }
 0x419   :  { %v5512_v6 = vadd.f32 %v1371_v15, %v1370_v2  ;;  %v7021_v15 = vld [vmem:[#allocation22_spill] sm:$0xff]  ;;  %v7034_v2 = vld [vmem:[#allocation35_spill] sm:$0xff] }
 0x41b   :  { %4322 = vtanh.f32 %v5512_v6 }
 0x428   :  { %v4323_v1 = vpop.eup %4322 }
 0x429   :  { %v5515_v60 = vmul.f32 %v4323_v1, %v1369_v11  ;;  %v7037_v11 = vld [vmem:[#allocation38_spill] sm:$0xff]  ;;  %v7038_v1 = vmov 0.0  }
 0x42b   :  { %7019 = vst [vmem:[#allocation42_spill] sm:$0xff] %v5515_v60  ;;  %1513 = vmatmul.mubr.f32.vlgmr.msra.gmra.mxu0 %v5515_v60  ;;  %1584 = vmatmul.mubr.f32.vlgmr.msra.gmra.mxu1 %v5515_v60  ;;  %v7039_v60 = vld [vmem:[#allocation41_spill] sm:$0xff] }
 0x42c   :  { %1686 = vmatpush1.msra.mxu0 %v5241_v9  ;;  %1757 = vmatpush1.msra.mxu1 %v5243_v8 }
 0x42d   :  { %1687 = vmatprep.subr.mxu0 %v5247_v4  ;;  %1758 = vmatprep.subr.mxu1 %v5249_v7 }
 0x42e   :  { %1688 = vmatpush1.msra.mxu0 %v5253_v62  ;;  %1759 = vmatpush1.msra.mxu1 %v5255_v35 }
 0x42f   :  { %1689 = vmatprep.subr.mxu0 %v5259_v19  ;;  %1760 = vmatprep.subr.mxu1 %v5261_v12 }
 0x430   :  { %1690 = vmatpush1.msra.mxu0 %v5265_v18  ;;  %1761 = vmatpush1.msra.mxu1 %v5267_v20 }
 0x431   :  { %1691 = vmatprep.subr.mxu0 %v5271_v21  ;;  %1762 = vmatprep.subr.mxu1 %v5273_v22 }
 0x432   :  { %1692 = vmatpush1.msra.mxu0 %v5277_v23  ;;  %1763 = vmatpush1.msra.mxu1 %v5279_v24 }
 0x433   :  { %1693 = vmatprep.subr.mxu0 %v5283_v25  ;;  %1764 = vmatprep.subr.mxu1 %v5285_v27 }
 0x434   :  { %1694 = vmatpush1.msra.mxu0 %v5289_v28  ;;  %1765 = vmatpush1.msra.mxu1 %v5291_v29 }
 0x435   :  { %1695 = vmatprep.subr.mxu0 %v5295_v30  ;;  %1766 = vmatprep.subr.mxu1 %v5297_v31 }
 0x436   :  { %1696 = vmatpush1.msra.mxu0 %v5301_v32  ;;  %1767 = vmatpush1.msra.mxu1 %v5303_v33 }
 0x437   :  { %1697 = vmatprep.subr.mxu0 %v5307_v34  ;;  %1768 = vmatprep.subr.mxu1 %v5309_v36 }
 0x438   :  { %1698 = vmatpush1.msra.mxu0 %v5313_v37  ;;  %1769 = vmatpush1.msra.mxu1 %v5315_v38 }
 0x439   :  { %1699 = vmatprep.subr.mxu0 %v5319_v39  ;;  %1770 = vmatprep.subr.mxu1 %v5321_v40 }
 0x43a   :  { %1700 = vmatpush1.msra.mxu0 %v5325_v41  ;;  %1771 = vmatpush1.msra.mxu1 %v5327_v43 }
 0x43b   :  { %1701 = vmatprep.subr.mxu0 %v5331_v45  ;;  %1772 = vmatprep.subr.mxu1 %v5333_v46 }
 0x43c   :  { %1702 = vmatpush1.msra.mxu0 %v5335_v47  ;;  %1773 = vmatpush1.msra.mxu1 %v5339_v48 }
 0x43d   :  { %1703 = vmatprep.subr.mxu0 %v5341_v49  ;;  %1774 = vmatprep.subr.mxu1 %v5343_v50 }
 0x43e   :  { %1704 = vmatpush1.msra.mxu0 %v5347_v51  ;;  %1775 = vmatpush1.msra.mxu1 %v5349_v52 }
 0x43f   :  { %1705 = vmatprep.subr.mxu0 %v5351_v54  ;;  %1776 = vmatprep.subr.mxu1 %v5355_v55 }
 0x440   :  { %1706 = vmatpush1.msra.mxu0 %v5357_v56  ;;  %1777 = vmatpush1.msra.mxu1 %v5359_v57 }
 0x441   :  { %1707 = vmatprep.subr.mxu0 %v5363_v58  ;;  %1778 = vmatprep.subr.mxu1 %v7020_v5 }
 0x442   :  { %1708 = vmatpush1.msra.mxu0 %v7021_v15  ;;  %1779 = vmatpush1.msra.mxu1 %v7022_v0 }
 0x443   :  { %1709 = vmatprep.subr.mxu0 %v7023_v3  ;;  %1780 = vmatprep.subr.mxu1 %v7024_v59 }
 0x444   :  { %1710 = vmatpush1.msra.mxu0 %v7025_v17  ;;  %1781 = vmatpush1.msra.mxu1 %v7026_v53 }
 0x445   :  { %1711 = vmatprep.subr.mxu0 %v7027_v14  ;;  %1782 = vmatprep.subr.mxu1 %v7028_v10  ;;  %v7043_v14 = vld [vmem:[#allocation53_spill] sm:$0xff] }
 0x446   :  { %1712 = vmatpush1.msra.mxu0 %v7029_v44  ;;  %1783 = vmatpush1.msra.mxu1 %v7030_v42  ;;  %v7040_v42 = vld [vmem:[#allocation19_spill] sm:$0xff] }
 0x447   :  { %1713 = vmatprep.subr.mxu0 %v7031_v13  ;;  %1784 = vmatprep.subr.mxu1 %v7032_v26  ;;  %v7041_v13 = vld [vmem:[#allocation20_spill] sm:$0xff] }
 0x448   :  { %1714 = vmatpush1.msra.mxu0 %v7033_v16  ;;  %1785 = vmatpush1.msra.mxu1 %v7034_v2  ;;  %v7042_v16 = vld [vmem:[#allocation51_spill] sm:$0xff] }
 0x449   :  { %1715 = vmatprep.subr.mxu0 %v7035_v61  ;;  %1786 = vmatprep.subr.mxu1 %v7036_v63 }
 0x44a   :  { %1716 = vmatpush1.msra.mxu0 %v7037_v11  ;;  %1749 = vmatprep.mubr.f32.mxu0 %v7038_v1  ;;  %v7044_v11 = vld [vmem:[#allocation52_spill] sm:$0xff] }
 0x44b   :  { %1787 = vmatpush1.msra.mxu1 %v7039_v60  ;;  %1820 = vmatprep.mubr.f32.mxu1 %v7038_v1  ;;  %v7045_v1 = vld [vmem:[#allocation54_spill] sm:$0xff] }
 0x44c   :  { %1922 = vmatprep.subr.mxu0 %v7040_v42  ;;  %1993 = vmatprep.subr.mxu1 %v7041_v13 }
 0x4eb   :  { %v1514_v26 = vpop.f32.mrf.mxu0  ;;  %v1585_v2 = vpop.f32.mrf.mxu1 }
 0x4ec   :  { %v1590_v44 = vadd.f32 %v1514_v26, %v7042_v16  ;;  %v1592_v53 = vadd.f32 %v1585_v2, %v7044_v11  ;;  %v2156_v11 = vld [vmem:[#allocation7 + $0x1e8] sm:$0xff] }
 0x4ed   :  { %v1516_v10 = vpop.f32.mrf.mxu0  ;;  %v1587_v60 = vpop.f32.mrf.mxu1 }
 0x4ee   :  { %v1594_v61 = vmul.f32 0.5, %v1590_v44  ;;  %v1591_v63 = vadd.f32 %v1516_v10, %v7043_v14  ;;  %v1593_v59 = vadd.f32 %v1587_v60, %v7045_v1  ;;  %v2158_v1 = vld [vmem:[#allocation7 + $0x1f8] sm:$0xff] }
 0x4f0   :  { %4324 = vtanh.f32 %v1594_v61  ;;  %v1598_v17 = vmul.f32 0.5, %v1591_v63  ;;  %v1603_v42 = vmul.f32 0.5, %v1593_v59 }
 0x4f2   :  { %4326 = vtanh.f32 %v1598_v17 }
 0x4f3   :  { %4328 = vtanh.f32 %v1592_v53 }
 0x4f4   :  { %4330 = vtanh.f32 %v1603_v42  ;;  %v2155_v42 = vld [vmem:[#allocation7 + $0x1e0] sm:$0xff] }
 0x4fd   :  { %v4325_v3 = vpop.eup %4324 }
 0x4fe   :  { %v1596_v13 = vmul.f32 0.5, %v4325_v3 }
 0x4ff   :  { %v4327_v0 = vpop.eup %4326 }
 0x500   :  { %v1597_v15 = vadd.f32 0.5, %v1596_v13  ;;  %v1600_v26 = vmul.f32 0.5, %v4327_v0  ;;  %v4329_v16 = vpop.eup %4328  ;;  %v2157_v13 = vld [vmem:[#allocation7 + $0x1f0] sm:$0xff] }
 0x501   :  { %v4331_v17 = vpop.eup %4330 }
 0x502   :  { %v1601_v44 = vadd.f32 0.5, %v1600_v26  ;;  %v1608_v5 = vmul.f32 %v4329_v16, %v1597_v15  ;;  %v1605_v53 = vmul.f32 0.5, %v4331_v17  ;;  %v2152_v26 = vld [vmem:[#allocation7 + $0x1c8] sm:$0xff]  ;;  %v2154_v16 = vld [vmem:[#allocation7 + $0x1d8] sm:$0xff] }
 0x503   :  { %v2150_v17 = vld [vmem:[#allocation7 + $0x1b8] sm:$0xff] }
 0x504   :  { %v1607_v14 = vmul.f32 %v1601_v44, %v5512_v6  ;;  %v1606_v2 = vadd.f32 0.5, %v1605_v53  ;;  %v2151_v44 = vld [vmem:[#allocation7 + $0x1c0] sm:$0xff] }
 0x505   :  { %v2147_v53 = vld [vmem:[#allocation7 + $0x1a0] sm:$0xff] }
 0x506   :  { %v5590_v10 = vadd.f32 %v1608_v5, %v1607_v14  ;;  %v2153_v14 = vld [vmem:[#allocation7 + $0x1d0] sm:$0xff] }
 0x508   :  { %4332 = vtanh.f32 %v5590_v10 }
 0x515   :  { %v4333_v60 = vpop.eup %4332 }
 0x516   :  { %v5593_v59 = vmul.f32 %v4333_v60, %v1606_v2  ;;  %v2149_v2 = vld [vmem:[#allocation7 + $0x1b0] sm:$0xff]  ;;  %v2144_v60 = vld [vmem:[#allocation7 + $0x188] sm:$0xff] }
 0x518   :  { %1750 = vmatmul.mubr.f32.vlgmr.msra.gmra.mxu0 %v5593_v59  ;;  %1821 = vmatmul.mubr.f32.vlgmr.msra.gmra.mxu1 %v5593_v59 }
 0x519   :  { %1923 = vmatpush1.msra.mxu0 %v5241_v9  ;;  %1994 = vmatpush1.msra.mxu1 %v5243_v8  ;;  %v7046_v9 = vld [vmem:[#allocation21_spill] sm:$0xff]  ;;  %v7047_v8 = vld [vmem:[#allocation22_spill] sm:$0xff] }
 0x51a   :  { %1924 = vmatprep.subr.mxu0 %v5247_v4  ;;  %1995 = vmatprep.subr.mxu1 %v5249_v7  ;;  %v7048_v4 = vld [vmem:[#allocation23_spill] sm:$0xff]  ;;  %v7049_v7 = vld [vmem:[#allocation24_spill] sm:$0xff] }
 0x51b   :  { %1925 = vmatpush1.msra.mxu0 %v5253_v62  ;;  %1996 = vmatpush1.msra.mxu1 %v5255_v35  ;;  %v7050_v62 = vld [vmem:[#allocation25_spill] sm:$0xff]  ;;  %v7051_v35 = vld [vmem:[#allocation26_spill] sm:$0xff] }
 0x51c   :  { %1926 = vmatprep.subr.mxu0 %v5259_v19  ;;  %1997 = vmatprep.subr.mxu1 %v5261_v12  ;;  %v7052_v19 = vld [vmem:[#allocation27_spill] sm:$0xff]  ;;  %v7053_v12 = vld [vmem:[#allocation28_spill] sm:$0xff] }
 0x51d   :  { %1927 = vmatpush1.msra.mxu0 %v5265_v18  ;;  %1998 = vmatpush1.msra.mxu1 %v5267_v20  ;;  %v7054_v18 = vld [vmem:[#allocation29_spill] sm:$0xff]  ;;  %v7055_v20 = vld [vmem:[#allocation30_spill] sm:$0xff] }
 0x51e   :  { %1928 = vmatprep.subr.mxu0 %v5271_v21  ;;  %1999 = vmatprep.subr.mxu1 %v5273_v22  ;;  %v7056_v21 = vld [vmem:[#allocation31_spill] sm:$0xff]  ;;  %v7057_v22 = vld [vmem:[#allocation32_spill] sm:$0xff] }
 0x51f   :  { %1929 = vmatpush1.msra.mxu0 %v5277_v23  ;;  %2000 = vmatpush1.msra.mxu1 %v5279_v24  ;;  %v7058_v23 = vld [vmem:[#allocation33_spill] sm:$0xff]  ;;  %v7059_v24 = vld [vmem:[#allocation34_spill] sm:$0xff] }
 0x520   :  { %1930 = vmatprep.subr.mxu0 %v5283_v25  ;;  %2001 = vmatprep.subr.mxu1 %v5285_v27  ;;  %v7060_v25 = vld [vmem:[#allocation35_spill] sm:$0xff]  ;;  %v7061_v27 = vld [vmem:[#allocation36_spill] sm:$0xff] }
 0x521   :  { %1931 = vmatpush1.msra.mxu0 %v5289_v28  ;;  %2002 = vmatpush1.msra.mxu1 %v5291_v29  ;;  %v7062_v28 = vld [vmem:[#allocation37_spill] sm:$0xff]  ;;  %v7063_v29 = vld [vmem:[#allocation38_spill] sm:$0xff] }
 0x522   :  { %1932 = vmatprep.subr.mxu0 %v5295_v30  ;;  %2003 = vmatprep.subr.mxu1 %v5297_v31  ;;  %v7064_v30 = vmov 0.0   ;;  %v7065_v31 = vld [vmem:[#allocation41_spill] sm:$0xff] }
 0x523   :  { %1933 = vmatpush1.msra.mxu0 %v5301_v32  ;;  %2004 = vmatpush1.msra.mxu1 %v5303_v33  ;;  %v7066_v33 = vld [vmem:[#allocation55_spill] sm:$0xff] }
 0x524   :  { %1934 = vmatprep.subr.mxu0 %v5307_v34  ;;  %2005 = vmatprep.subr.mxu1 %v5309_v36 }
 0x525   :  { %1935 = vmatpush1.msra.mxu0 %v5313_v37  ;;  %2006 = vmatpush1.msra.mxu1 %v5315_v38 }
 0x526   :  { %1936 = vmatprep.subr.mxu0 %v5319_v39  ;;  %2007 = vmatprep.subr.mxu1 %v5321_v40  ;;  %v7067_v39 = vld [vmem:[#allocation57_spill] sm:$0xff] }
 0x527   :  { %1937 = vmatpush1.msra.mxu0 %v5325_v41  ;;  %2008 = vmatpush1.msra.mxu1 %v5327_v43  ;;  %v7068_v41 = vld [vmem:[#allocation56_spill] sm:$0xff] }
 0x528   :  { %1938 = vmatprep.subr.mxu0 %v5331_v45  ;;  %2009 = vmatprep.subr.mxu1 %v5333_v46 }
 0x529   :  { %1939 = vmatpush1.msra.mxu0 %v5335_v47  ;;  %2010 = vmatpush1.msra.mxu1 %v5339_v48  ;;  %v7069_v47 = vld [vmem:[#allocation58_spill] sm:$0xff] }
 0x52a   :  { %1940 = vmatprep.subr.mxu0 %v5341_v49  ;;  %2011 = vmatprep.subr.mxu1 %v5343_v50 }
 0x52b   :  { %1941 = vmatpush1.msra.mxu0 %v5347_v51  ;;  %2012 = vmatpush1.msra.mxu1 %v5349_v52 }
 0x52c   :  { %1942 = vmatprep.subr.mxu0 %v5351_v54  ;;  %2013 = vmatprep.subr.mxu1 %v5355_v55 }
 0x52d   :  { %1943 = vmatpush1.msra.mxu0 %v5357_v56  ;;  %2014 = vmatpush1.msra.mxu1 %v5359_v57 }
 0x52e   :  { %1944 = vmatprep.subr.mxu0 %v5363_v58  ;;  %2015 = vmatprep.subr.mxu1 %v7046_v9  ;;  %v2146_v9 = vld [vmem:[#allocation7 + $0x198] sm:$0xff] }
 0x52f   :  { %1945 = vmatpush1.msra.mxu0 %v7047_v8  ;;  %2016 = vmatpush1.msra.mxu1 %v7048_v4  ;;  %v2143_v8 = vld [vmem:[#allocation7 + $0x180] sm:$0xff]  ;;  %v2145_v4 = vld [vmem:[#allocation7 + $0x190] sm:$0xff] }
 0x530   :  { %1946 = vmatprep.subr.mxu0 %v7049_v7  ;;  %2017 = vmatprep.subr.mxu1 %v7050_v62  ;;  %v2140_v7 = vld [vmem:[#allocation7 + $0x168] sm:$0xff]  ;;  %v2142_v62 = vld [vmem:[#allocation7 + $0x178] sm:$0xff] }
 0x531   :  { %1947 = vmatpush1.msra.mxu0 %v7051_v35  ;;  %2018 = vmatpush1.msra.mxu1 %v7052_v19  ;;  %v2139_v35 = vld [vmem:[#allocation7 + $0x160] sm:$0xff]  ;;  %v2141_v19 = vld [vmem:[#allocation7 + $0x170] sm:$0xff] }
 0x532   :  { %1948 = vmatprep.subr.mxu0 %v7053_v12  ;;  %2019 = vmatprep.subr.mxu1 %v7054_v18  ;;  %v2136_v12 = vld [vmem:[#allocation7 + $0x148] sm:$0xff]  ;;  %v2138_v18 = vld [vmem:[#allocation7 + $0x158] sm:$0xff] }
 0x533   :  { %1949 = vmatpush1.msra.mxu0 %v7055_v20  ;;  %2020 = vmatpush1.msra.mxu1 %v7056_v21  ;;  %v2135_v20 = vld [vmem:[#allocation7 + $0x140] sm:$0xff]  ;;  %v2137_v21 = vld [vmem:[#allocation7 + $0x150] sm:$0xff] }
 0x534   :  { %1950 = vmatprep.subr.mxu0 %v7057_v22  ;;  %2021 = vmatprep.subr.mxu1 %v7058_v23  ;;  %v2132_v22 = vld [vmem:[#allocation7 + $0x128] sm:$0xff]  ;;  %v2134_v23 = vld [vmem:[#allocation7 + $0x138] sm:$0xff] }
 0x535   :  { %1951 = vmatpush1.msra.mxu0 %v7059_v24  ;;  %2022 = vmatpush1.msra.mxu1 %v7060_v25  ;;  %v2131_v24 = vld [vmem:[#allocation7 + $0x120] sm:$0xff]  ;;  %v2133_v25 = vld [vmem:[#allocation7 + $0x130] sm:$0xff] }
 0x536   :  { %1952 = vmatprep.subr.mxu0 %v7061_v27  ;;  %2023 = vmatprep.subr.mxu1 %v7062_v28  ;;  %v2128_v27 = vld [vmem:[#allocation7 + $0x108] sm:$0xff]  ;;  %v2130_v28 = vld [vmem:[#allocation7 + $0x118] sm:$0xff] }
 0x537   :  { %1953 = vmatpush1.msra.mxu0 %v7063_v29  ;;  %1986 = vmatprep.mubr.f32.mxu0 %v7064_v30  ;;  %v2127_v29 = vld [vmem:[#allocation7 + $0x100] sm:$0xff] }
 0x538   :  { %2024 = vmatpush1.msra.mxu1 %v7065_v31  ;;  %2057 = vmatprep.mubr.f32.mxu1 %v7064_v30  ;;  %v2129_v31 = vld [vmem:[#allocation7 + $0x110] sm:$0xff] }
 0x539   :  { %2159 = vmatprep.subr.mxu0 %v2156_v11  ;;  %2230 = vmatprep.subr.mxu1 %v2158_v1  ;;  %v2096_v11 = vld [vmem:[#allocation7 + $0x8] sm:$0xff]  ;;  %v2098_v1 = vld [vmem:[#allocation7 + $0x18] sm:$0xff] }
 0x5d8   :  { %v1751_v32 = vpop.f32.mrf.mxu0  ;;  %v1822_v36 = vpop.f32.mrf.mxu1 }
 0x5d9   :  { %v1827_v34 = vadd.f32 %v1751_v32, %v7066_v33  ;;  %v1829_v43 = vadd.f32 %v1822_v36, %v7068_v41  ;;  %v2124_v32 = vld [vmem:[#allocation7 + $0xe8] sm:$0xff]  ;;  %v2126_v33 = vld [vmem:[#allocation7 + $0xf8] sm:$0xff]  ;;  %v2125_v36 = vld [vmem:[#allocation7 + $0xf0] sm:$0xff] }
 0x5da   :  { %v1753_v37 = vpop.f32.mrf.mxu0  ;;  %v1824_v46 = vpop.f32.mrf.mxu1  ;;  %v2116_v41 = vld [vmem:[#allocation7 + $0xa8] sm:$0xff] }
 0x5db   :  { %v1831_v38 = vmul.f32 0.5, %v1827_v34  ;;  %v1828_v40 = vadd.f32 %v1753_v37, %v7067_v39  ;;  %v1830_v48 = vadd.f32 %v1824_v46, %v7069_v47  ;;  %v2123_v34 = vld [vmem:[#allocation7 + $0xe0] sm:$0xff]  ;;  %v2120_v37 = vld [vmem:[#allocation7 + $0xc8] sm:$0xff]  ;;  %v2117_v46 = vld [vmem:[#allocation7 + $0xb0] sm:$0xff] }
 0x5dc   :  { %v2119_v39 = vld [vmem:[#allocation7 + $0xc0] sm:$0xff]  ;;  %v2112_v47 = vld [vmem:[#allocation7 + $0x88] sm:$0xff] }
 0x5dd   :  { %4334 = vtanh.f32 %v1831_v38  ;;  %v1835_v45 = vmul.f32 0.5, %v1828_v40  ;;  %v1840_v49 = vmul.f32 0.5, %v1830_v48  ;;  %v2122_v38 = vld [vmem:[#allocation7 + $0xd8] sm:$0xff]  ;;  %v2121_v40 = vld [vmem:[#allocation7 + $0xd0] sm:$0xff] }
 0x5de   :  { %v2114_v48 = vld [vmem:[#allocation7 + $0x98] sm:$0xff] }
 0x5df   :  { %4336 = vtanh.f32 %v1835_v45  ;;  %v2115_v45 = vld [vmem:[#allocation7 + $0xa0] sm:$0xff] }
 0x5e0   :  { %4338 = vtanh.f32 %v1829_v43  ;;  %v2118_v43 = vld [vmem:[#allocation7 + $0xb8] sm:$0xff] }
 0x5e1   :  { %4340 = vtanh.f32 %v1840_v49  ;;  %v2111_v49 = vld [vmem:[#allocation7 + $0x80] sm:$0xff] }
 0x5ea   :  { %v4335_v50 = vpop.eup %4334 }
 0x5eb   :  { %v1833_v51 = vmul.f32 0.5, %v4335_v50  ;;  %v2113_v50 = vld [vmem:[#allocation7 + $0x90] sm:$0xff] }
 0x5ec   :  { %v4337_v52 = vpop.eup %4336 }
 0x5ed   :  { %v1834_v54 = vadd.f32 0.5, %v1833_v51  ;;  %v1837_v55 = vmul.f32 0.5, %v4337_v52  ;;  %v4339_v56 = vpop.eup %4338  ;;  %v2108_v51 = vld [vmem:[#allocation7 + $0x68] sm:$0xff]  ;;  %v2110_v52 = vld [vmem:[#allocation7 + $0x78] sm:$0xff] }
 0x5ee   :  { %v4341_v15 = vpop.eup %4340 }
 0x5ef   :  { %v1838_v57 = vadd.f32 0.5, %v1837_v55  ;;  %v1845_v58 = vmul.f32 %v4339_v56, %v1834_v54  ;;  %v1842_v0 = vmul.f32 0.5, %v4341_v15  ;;  %v2107_v54 = vld [vmem:[#allocation7 + $0x60] sm:$0xff]  ;;  %v2109_v55 = vld [vmem:[#allocation7 + $0x70] sm:$0xff]  ;;  %v2104_v56 = vld [vmem:[#allocation7 + $0x48] sm:$0xff] }
 0x5f0   :  { %v2100_v15 = vld [vmem:[#allocation7 + $0x28] sm:$0xff] }
 0x5f1   :  { %v1844_v6 = vmul.f32 %v1838_v57, %v5590_v10  ;;  %v1843_v3 = vadd.f32 0.5, %v1842_v0  ;;  %v2148_v10 = vld [vmem:[#allocation7 + $0x1a8] sm:$0xff]  ;;  %v2106_v57 = vld [vmem:[#allocation7 + $0x58] sm:$0xff] }
 0x5f2   :  { %v2102_v0 = vld [vmem:[#allocation7 + $0x38] sm:$0xff] }
 0x5f3   :  { %v5666_v5 = vadd.f32 %v1845_v58, %v1844_v6  ;;  %v2103_v58 = vld [vmem:[#allocation7 + $0x40] sm:$0xff]  ;;  %v2105_v6 = vld [vmem:[#allocation7 + $0x50] sm:$0xff] }
 0x5f5   :  { %4342 = vtanh.f32 %v5666_v5 }
 0x602   :  { %v4343_v61 = vpop.eup %4342 }
 0x603   :  { %v5669_v63 = vmul.f32 %v4343_v61, %v1843_v3  ;;  %v2099_v3 = vld [vmem:[#allocation7 + $0x20] sm:$0xff]  ;;  %v2101_v61 = vld [vmem:[#allocation7 + $0x30] sm:$0xff] }
 0x605   :  { %1987 = vmatmul.mubr.f32.vlgmr.msra.gmra.mxu0 %v5669_v63  ;;  %2058 = vmatmul.mubr.f32.vlgmr.msra.gmra.mxu1 %v5669_v63 }
 0x606   :  { %2223 = vmatprep.mubr.f32.mxu0 %v7064_v30  ;;  %2294 = vmatprep.mubr.f32.mxu1 %v7064_v30 }
 0x607   :  { %2160 = vmatpush1.msra.mxu0 %v2155_v42  ;;  %2231 = vmatpush1.msra.mxu1 %v2157_v13  ;;  %v2095_v42 = vld [vmem:[#allocation7] sm:$0xff]  ;;  %v2097_v13 = vld [vmem:[#allocation7 + $0x10] sm:$0xff] }
 0x608   :  { %2161 = vmatprep.subr.mxu0 %v2152_v26  ;;  %2232 = vmatprep.subr.mxu1 %v2154_v16  ;;  %v2394_v26 = vld [vmem:[#allocation9 + $0x1e8] sm:$0xff]  ;;  %v2396_v16 = vld [vmem:[#allocation9 + $0x1f8] sm:$0xff] }
 0x609   :  { %2162 = vmatpush1.msra.mxu0 %v2151_v44  ;;  %2233 = vmatpush1.msra.mxu1 %v2153_v14  ;;  %v7070_v14 = vld [vmem:[#allocation59_spill] sm:$0xff] }
 0x60a   :  { %2163 = vmatprep.subr.mxu0 %v2148_v10  ;;  %2234 = vmatprep.subr.mxu1 %v2150_v17 }
 0x60b   :  { %2164 = vmatpush1.msra.mxu0 %v2147_v53  ;;  %2235 = vmatpush1.msra.mxu1 %v2149_v2 }
 0x60c   :  { %2165 = vmatprep.subr.mxu0 %v2144_v60  ;;  %2236 = vmatprep.subr.mxu1 %v2146_v9  ;;  %v7071_v60 = vld [vmem:[#allocation61_spill] sm:$0xff] }
 0x60d   :  { %2166 = vmatpush1.msra.mxu0 %v2143_v8  ;;  %2237 = vmatpush1.msra.mxu1 %v2145_v4  ;;  %v7072_v8 = vld [vmem:[#allocation60_spill] sm:$0xff] }
 0x60e   :  { %2167 = vmatprep.subr.mxu0 %v2140_v7  ;;  %2238 = vmatprep.subr.mxu1 %v2142_v62 }
 0x60f   :  { %2168 = vmatpush1.msra.mxu0 %v2139_v35  ;;  %2239 = vmatpush1.msra.mxu1 %v2141_v19  ;;  %v7073_v35 = vld [vmem:[#allocation62_spill] sm:$0xff] }
 0x610   :  { %2169 = vmatprep.subr.mxu0 %v2136_v12  ;;  %2240 = vmatprep.subr.mxu1 %v2138_v18 }
 0x611   :  { %2170 = vmatpush1.msra.mxu0 %v2135_v20  ;;  %2241 = vmatpush1.msra.mxu1 %v2137_v21 }
 0x612   :  { %2171 = vmatprep.subr.mxu0 %v2132_v22  ;;  %2242 = vmatprep.subr.mxu1 %v2134_v23 }
 0x613   :  { %2172 = vmatpush1.msra.mxu0 %v2131_v24  ;;  %2243 = vmatpush1.msra.mxu1 %v2133_v25 }
 0x614   :  { %2173 = vmatprep.subr.mxu0 %v2128_v27  ;;  %2244 = vmatprep.subr.mxu1 %v2130_v28 }
 0x615   :  { %2174 = vmatpush1.msra.mxu0 %v2127_v29  ;;  %2245 = vmatpush1.msra.mxu1 %v2129_v31 }
 0x616   :  { %2175 = vmatprep.subr.mxu0 %v2124_v32  ;;  %2246 = vmatprep.subr.mxu1 %v2126_v33 }
 0x617   :  { %2176 = vmatpush1.msra.mxu0 %v2123_v34  ;;  %2247 = vmatpush1.msra.mxu1 %v2125_v36 }
 0x618   :  { %2177 = vmatprep.subr.mxu0 %v2120_v37  ;;  %2248 = vmatprep.subr.mxu1 %v2122_v38  ;;  %v2393_v37 = vld [vmem:[#allocation9 + $0x1e0] sm:$0xff]  ;;  %v2395_v38 = vld [vmem:[#allocation9 + $0x1f0] sm:$0xff] }
 0x619   :  { %2178 = vmatpush1.msra.mxu0 %v2119_v39  ;;  %2249 = vmatpush1.msra.mxu1 %v2121_v40  ;;  %v2390_v39 = vld [vmem:[#allocation9 + $0x1c8] sm:$0xff]  ;;  %v2392_v40 = vld [vmem:[#allocation9 + $0x1d8] sm:$0xff] }
 0x61a   :  { %2179 = vmatprep.subr.mxu0 %v2116_v41  ;;  %2250 = vmatprep.subr.mxu1 %v2118_v43  ;;  %v2389_v41 = vld [vmem:[#allocation9 + $0x1c0] sm:$0xff]  ;;  %v2386_v43 = vld [vmem:[#allocation9 + $0x1a8] sm:$0xff] }
 0x61b   :  { %2180 = vmatpush1.msra.mxu0 %v2115_v45  ;;  %2251 = vmatpush1.msra.mxu1 %v2117_v46  ;;  %v2388_v45 = vld [vmem:[#allocation9 + $0x1b8] sm:$0xff]  ;;  %v2385_v46 = vld [vmem:[#allocation9 + $0x1a0] sm:$0xff] }
 0x61c   :  { %2181 = vmatprep.subr.mxu0 %v2112_v47  ;;  %2252 = vmatprep.subr.mxu1 %v2114_v48  ;;  %v2387_v47 = vld [vmem:[#allocation9 + $0x1b0] sm:$0xff]  ;;  %v2382_v48 = vld [vmem:[#allocation9 + $0x188] sm:$0xff] }
 0x61d   :  { %2182 = vmatpush1.msra.mxu0 %v2111_v49  ;;  %2253 = vmatpush1.msra.mxu1 %v2113_v50  ;;  %v2384_v49 = vld [vmem:[#allocation9 + $0x198] sm:$0xff]  ;;  %v2381_v50 = vld [vmem:[#allocation9 + $0x180] sm:$0xff] }
 0x61e   :  { %2183 = vmatprep.subr.mxu0 %v2108_v51  ;;  %2254 = vmatprep.subr.mxu1 %v2110_v52  ;;  %v2383_v51 = vld [vmem:[#allocation9 + $0x190] sm:$0xff]  ;;  %v2378_v52 = vld [vmem:[#allocation9 + $0x168] sm:$0xff] }
 0x61f   :  { %2184 = vmatpush1.msra.mxu0 %v2107_v54  ;;  %2255 = vmatpush1.msra.mxu1 %v2109_v55  ;;  %v2380_v54 = vld [vmem:[#allocation9 + $0x178] sm:$0xff]  ;;  %v2377_v55 = vld [vmem:[#allocation9 + $0x160] sm:$0xff] }
 0x620   :  { %2185 = vmatprep.subr.mxu0 %v2104_v56  ;;  %2256 = vmatprep.subr.mxu1 %v2106_v57  ;;  %v2379_v56 = vld [vmem:[#allocation9 + $0x170] sm:$0xff]  ;;  %v2374_v57 = vld [vmem:[#allocation9 + $0x148] sm:$0xff] }
 0x621   :  { %2186 = vmatpush1.msra.mxu0 %v2103_v58  ;;  %2257 = vmatpush1.msra.mxu1 %v2105_v6  ;;  %v2376_v58 = vld [vmem:[#allocation9 + $0x158] sm:$0xff]  ;;  %v2373_v6 = vld [vmem:[#allocation9 + $0x140] sm:$0xff] }
 0x622   :  { %2187 = vmatprep.subr.mxu0 %v2100_v15  ;;  %2258 = vmatprep.subr.mxu1 %v2102_v0  ;;  %v2375_v15 = vld [vmem:[#allocation9 + $0x150] sm:$0xff]  ;;  %v2370_v0 = vld [vmem:[#allocation9 + $0x128] sm:$0xff] }
 0x623   :  { %2188 = vmatpush1.msra.mxu0 %v2099_v3  ;;  %2259 = vmatpush1.msra.mxu1 %v2101_v61  ;;  %v2372_v3 = vld [vmem:[#allocation9 + $0x138] sm:$0xff]  ;;  %v2369_v61 = vld [vmem:[#allocation9 + $0x120] sm:$0xff] }
 0x624   :  { %2189 = vmatprep.subr.mxu0 %v2096_v11  ;;  %2260 = vmatprep.subr.mxu1 %v2098_v1  ;;  %v2371_v11 = vld [vmem:[#allocation9 + $0x130] sm:$0xff]  ;;  %v2366_v1 = vld [vmem:[#allocation9 + $0x108] sm:$0xff] }
 0x625   :  { %2190 = vmatpush1.msra.mxu0 %v2095_v42  ;;  %2261 = vmatpush1.msra.mxu1 %v2097_v13  ;;  %v2368_v42 = vld [vmem:[#allocation9 + $0x118] sm:$0xff]  ;;  %v2365_v13 = vld [vmem:[#allocation9 + $0x100] sm:$0xff] }
 0x626   :  { %2419 = vmatprep.subr.mxu0 %v2394_v26  ;;  %2532 = vmatprep.subr.mxu1 %v2396_v16  ;;  %v2367_v26 = vld [vmem:[#allocation9 + $0x110] sm:$0xff]  ;;  %v2362_v16 = vld [vmem:[#allocation9 + $0xe8] sm:$0xff] }
 0x6c5   :  { %v1988_v44 = vpop.f32.mrf.mxu0  ;;  %v2059_v17 = vpop.f32.mrf.mxu1 }
 0x6c6   :  { %v2064_v10 = vadd.f32 %v1988_v44, %v7070_v14  ;;  %v2066_v4 = vadd.f32 %v2059_v17, %v7072_v8  ;;  %v2364_v44 = vld [vmem:[#allocation9 + $0xf8] sm:$0xff]  ;;  %v2361_v14 = vld [vmem:[#allocation9 + $0xe0] sm:$0xff]  ;;  %v2358_v17 = vld [vmem:[#allocation9 + $0xc8] sm:$0xff] }
 0x6c7   :  { %v1990_v53 = vpop.f32.mrf.mxu0  ;;  %v2061_v62 = vpop.f32.mrf.mxu1  ;;  %v2356_v8 = vld [vmem:[#allocation9 + $0xb8] sm:$0xff] }
 0x6c8   :  { %v2068_v2 = vmul.f32 0.5, %v2064_v10  ;;  %v2065_v9 = vadd.f32 %v1990_v53, %v7071_v60  ;;  %v2067_v19 = vadd.f32 %v2061_v62, %v7073_v35  ;;  %v2363_v10 = vld [vmem:[#allocation9 + $0xf0] sm:$0xff]  ;;  %v2360_v53 = vld [vmem:[#allocation9 + $0xd8] sm:$0xff]  ;;  %v2350_v62 = vld [vmem:[#allocation9 + $0x88] sm:$0xff] }
 0x6c9   :  { %v2359_v60 = vld [vmem:[#allocation9 + $0xd0] sm:$0xff]  ;;  %v2352_v35 = vld [vmem:[#allocation9 + $0x98] sm:$0xff] }
 0x6ca   :  { %4344 = vtanh.f32 %v2068_v2  ;;  %v2072_v7 = vmul.f32 0.5, %v2065_v9  ;;  %v2077_v12 = vmul.f32 0.5, %v2067_v19  ;;  %v2357_v2 = vld [vmem:[#allocation9 + $0xc0] sm:$0xff]  ;;  %v2354_v9 = vld [vmem:[#allocation9 + $0xa8] sm:$0xff] }
 0x6cb   :  { %v2349_v19 = vld [vmem:[#allocation9 + $0x80] sm:$0xff] }
 0x6cc   :  { %4346 = vtanh.f32 %v2072_v7  ;;  %v2355_v7 = vld [vmem:[#allocation9 + $0xb0] sm:$0xff] }
 0x6cd   :  { %4348 = vtanh.f32 %v2066_v4  ;;  %v2353_v4 = vld [vmem:[#allocation9 + $0xa0] sm:$0xff] }
 0x6ce   :  { %4350 = vtanh.f32 %v2077_v12  ;;  %v2351_v12 = vld [vmem:[#allocation9 + $0x90] sm:$0xff] }
 0x6d7   :  { %v4345_v18 = vpop.eup %4344 }
 0x6d8   :  { %v2070_v20 = vmul.f32 0.5, %v4345_v18  ;;  %v2346_v18 = vld [vmem:[#allocation9 + $0x68] sm:$0xff] }
 0x6d9   :  { %v4347_v21 = vpop.eup %4346 }
 0x6da   :  { %v2071_v22 = vadd.f32 0.5, %v2070_v20  ;;  %v2074_v23 = vmul.f32 0.5, %v4347_v21  ;;  %v4349_v24 = vpop.eup %4348  ;;  %v2348_v20 = vld [vmem:[#allocation9 + $0x78] sm:$0xff]  ;;  %v2345_v21 = vld [vmem:[#allocation9 + $0x60] sm:$0xff] }
 0x6db   :  { %v4351_v31 = vpop.eup %4350 }
 0x6dc   :  { %v2075_v25 = vadd.f32 0.5, %v2074_v23  ;;  %v2082_v27 = vmul.f32 %v4349_v24, %v2071_v22  ;;  %v2079_v32 = vmul.f32 0.5, %v4351_v31  ;;  %v2347_v22 = vld [vmem:[#allocation9 + $0x70] sm:$0xff]  ;;  %v2342_v23 = vld [vmem:[#allocation9 + $0x48] sm:$0xff]  ;;  %v2344_v24 = vld [vmem:[#allocation9 + $0x58] sm:$0xff] }
 0x6dd   :  { %v2340_v31 = vld [vmem:[#allocation9 + $0x38] sm:$0xff] }
 0x6de   :  { %v2081_v28 = vmul.f32 %v2075_v25, %v5666_v5  ;;  %v2080_v33 = vadd.f32 0.5, %v2079_v32  ;;  %v2391_v5 = vld [vmem:[#allocation9 + $0x1d0] sm:$0xff]  ;;  %v2341_v25 = vld [vmem:[#allocation9 + $0x40] sm:$0xff] }
 0x6df   :  { %v2337_v32 = vld [vmem:[#allocation9 + $0x20] sm:$0xff] }
 0x6e0   :  { %v5680_v29 = vadd.f32 %v2082_v27, %v2081_v28  ;;  %v2343_v27 = vld [vmem:[#allocation9 + $0x50] sm:$0xff]  ;;  %v2338_v28 = vld [vmem:[#allocation9 + $0x28] sm:$0xff] }
 0x6e2   :  { %4352 = vtanh.f32 %v5680_v29 }
 0x6ef   :  { %v4353_v34 = vpop.eup %4352 }
 0x6f0   :  { %v5683_v36 = vmul.f32 %v4353_v34, %v2080_v33  ;;  %v2339_v33 = vld [vmem:[#allocation9 + $0x30] sm:$0xff]  ;;  %v2334_v34 = vld [vmem:[#allocation9 + $0x8] sm:$0xff] }
 0x6f2   :  { %2224 = vmatmul.mubr.f32.vlgmr.msra.gmra.mxu0 %v5683_v36  ;;  %2295 = vmatmul.mubr.f32.vlgmr.msra.gmra.mxu1 %v5683_v36 }
 0x6f3   :  { %2420 = vmatpush1.msra.mxu0 %v2393_v37  ;;  %2533 = vmatpush1.msra.mxu1 %v2395_v38  ;;  %v2336_v37 = vld [vmem:[#allocation9 + $0x18] sm:$0xff]  ;;  %v2333_v38 = vld [vmem:[#allocation9] sm:$0xff] }
 0x6f4   :  { %2421 = vmatprep.subr.mxu0 %v2390_v39  ;;  %2534 = vmatprep.subr.mxu1 %v2392_v40  ;;  %v2335_v39 = vld [vmem:[#allocation9 + $0x10] sm:$0xff] }
 0x6f5   :  { %2422 = vmatpush1.msra.mxu0 %v2389_v41  ;;  %2535 = vmatpush1.msra.mxu1 %v2391_v5  ;;  %v7074_v40 = vld [vmem:[#allocation67_spill] sm:$0xff]  ;;  %v7075_v41 = vld [vmem:[#allocation18_spill] sm:$0xff]  ;;  %v7076_v5 = vld [vmem:[#allocation40_spill] sm:$0xff] }
 0x6f6   :  { %2423 = vmatprep.subr.mxu0 %v2386_v43  ;;  %2536 = vmatprep.subr.mxu1 %v2388_v45  ;;  %v7077_v43 = vld [vmem:[#allocation42_spill] sm:$0xff]  ;;  %v5719_v45 = vld [vmem:[#allocation10 + $0x1f8] sm:$0xff] }
 0x6f7   :  { %2424 = vmatpush1.msra.mxu0 %v2385_v46  ;;  %2537 = vmatpush1.msra.mxu1 %v2387_v47  ;;  %7079 = vst [vmem:[#allocation45_spill] sm:$0xff] %v5719_v45  ;;  %v5725_v46 = vld [vmem:[#allocation10 + $0x1f0] sm:$0xff]  ;;  %v5731_v47 = vld [vmem:[#allocation10 + $0x1d8] sm:$0xff] }
 0x6f8   :  { %2425 = vmatprep.subr.mxu0 %v2382_v48  ;;  %2538 = vmatprep.subr.mxu1 %v2384_v49  ;;  %v5735_v48 = vld [vmem:[#allocation10 + $0x1c0] sm:$0xff]  ;;  %v5737_v49 = vld [vmem:[#allocation10 + $0x1d0] sm:$0xff] }
 0x6f9   :  { %2426 = vmatpush1.msra.mxu0 %v2381_v50  ;;  %2539 = vmatpush1.msra.mxu1 %v2383_v51  ;;  %v5741_v50 = vld [vmem:[#allocation10 + $0x1a8] sm:$0xff]  ;;  %v5743_v51 = vld [vmem:[#allocation10 + $0x1b8] sm:$0xff] }
 0x6fa   :  { %2427 = vmatprep.subr.mxu0 %v2378_v52  ;;  %2540 = vmatprep.subr.mxu1 %v2380_v54  ;;  %v5747_v52 = vld [vmem:[#allocation10 + $0x1a0] sm:$0xff]  ;;  %v5749_v54 = vld [vmem:[#allocation10 + $0x1b0] sm:$0xff] }
 0x6fb   :  { %2428 = vmatpush1.msra.mxu0 %v2377_v55  ;;  %2541 = vmatpush1.msra.mxu1 %v2379_v56  ;;  %v5753_v55 = vld [vmem:[#allocation10 + $0x188] sm:$0xff]  ;;  %v5755_v56 = vld [vmem:[#allocation10 + $0x198] sm:$0xff] }
 0x6fc   :  { %2429 = vmatprep.subr.mxu0 %v2374_v57  ;;  %2542 = vmatprep.subr.mxu1 %v2376_v58  ;;  %v5759_v57 = vld [vmem:[#allocation10 + $0x180] sm:$0xff]  ;;  %v5761_v58 = vld [vmem:[#allocation10 + $0x190] sm:$0xff] }
 0x6fd   :  { %2430 = vmatpush1.msra.mxu0 %v2373_v6  ;;  %2543 = vmatpush1.msra.mxu1 %v2375_v15  ;;  %v5765_v6 = vld [vmem:[#allocation10 + $0x168] sm:$0xff]  ;;  %v5767_v15 = vld [vmem:[#allocation10 + $0x178] sm:$0xff] }
 0x6fe   :  { %2431 = vmatprep.subr.mxu0 %v2370_v0  ;;  %2544 = vmatprep.subr.mxu1 %v2372_v3  ;;  %v5771_v0 = vld [vmem:[#allocation10 + $0x160] sm:$0xff]  ;;  %v5773_v3 = vld [vmem:[#allocation10 + $0x170] sm:$0xff] }
 0x6ff   :  { %2432 = vmatpush1.msra.mxu0 %v2369_v61  ;;  %2545 = vmatpush1.msra.mxu1 %v2371_v11  ;;  %v5777_v61 = vld [vmem:[#allocation10 + $0x148] sm:$0xff]  ;;  %v5779_v11 = vld [vmem:[#allocation10 + $0x158] sm:$0xff] }
 0x700   :  { %2433 = vmatprep.subr.mxu0 %v2366_v1  ;;  %2546 = vmatprep.subr.mxu1 %v2368_v42  ;;  %v5783_v1 = vld [vmem:[#allocation10 + $0x140] sm:$0xff]  ;;  %v5785_v42 = vld [vmem:[#allocation10 + $0x150] sm:$0xff] }
 0x701   :  { %2434 = vmatpush1.msra.mxu0 %v2365_v13  ;;  %2547 = vmatpush1.msra.mxu1 %v2367_v26  ;;  %v5787_v13 = vld [vmem:[#allocation10 + $0x128] sm:$0xff]  ;;  %v5791_v26 = vld [vmem:[#allocation10 + $0x138] sm:$0xff] }
 0x702   :  { %2435 = vmatprep.subr.mxu0 %v2362_v16  ;;  %2548 = vmatprep.subr.mxu1 %v2364_v44  ;;  %v5793_v16 = vld [vmem:[#allocation10 + $0x120] sm:$0xff]  ;;  %v5795_v44 = vld [vmem:[#allocation10 + $0x130] sm:$0xff] }
 0x703   :  { %2436 = vmatpush1.msra.mxu0 %v2361_v14  ;;  %2549 = vmatpush1.msra.mxu1 %v2363_v10  ;;  %v5801_v14 = vld [vmem:[#allocation10 + $0x108] sm:$0xff]  ;;  %v5803_v10 = vld [vmem:[#allocation10 + $0x118] sm:$0xff] }
 0x704   :  { %2437 = vmatprep.subr.mxu0 %v2358_v17  ;;  %2550 = vmatprep.subr.mxu1 %v2360_v53  ;;  %v5807_v17 = vld [vmem:[#allocation10 + $0x100] sm:$0xff]  ;;  %v5809_v53 = vld [vmem:[#allocation10 + $0x110] sm:$0xff] }
 0x705   :  { %2438 = vmatpush1.msra.mxu0 %v2357_v2  ;;  %2551 = vmatpush1.msra.mxu1 %v2359_v60  ;;  %v5813_v2 = vld [vmem:[#allocation10 + $0xe8] sm:$0xff]  ;;  %v5815_v60 = vld [vmem:[#allocation10 + $0xf8] sm:$0xff] }
 0x706   :  { %2439 = vmatprep.subr.mxu0 %v2354_v9  ;;  %2552 = vmatprep.subr.mxu1 %v2356_v8  ;;  %v5819_v9 = vld [vmem:[#allocation10 + $0xe0] sm:$0xff]  ;;  %v5821_v8 = vld [vmem:[#allocation10 + $0xf0] sm:$0xff] }
 0x707   :  { %2440 = vmatpush1.msra.mxu0 %v2353_v4  ;;  %2553 = vmatpush1.msra.mxu1 %v2355_v7  ;;  %v5825_v4 = vld [vmem:[#allocation10 + $0xc8] sm:$0xff]  ;;  %v5827_v7 = vld [vmem:[#allocation10 + $0xd8] sm:$0xff] }
 0x708   :  { %2441 = vmatprep.subr.mxu0 %v2350_v62  ;;  %2554 = vmatprep.subr.mxu1 %v2352_v35  ;;  %v5831_v62 = vld [vmem:[#allocation10 + $0xc0] sm:$0xff]  ;;  %v5833_v35 = vld [vmem:[#allocation10 + $0xd0] sm:$0xff] }
 0x709   :  { %2442 = vmatpush1.msra.mxu0 %v2349_v19  ;;  %2555 = vmatpush1.msra.mxu1 %v2351_v12  ;;  %v5837_v19 = vld [vmem:[#allocation10 + $0xa8] sm:$0xff]  ;;  %v5839_v12 = vld [vmem:[#allocation10 + $0xb8] sm:$0xff] }
 0x70a   :  { %2443 = vmatprep.subr.mxu0 %v2346_v18  ;;  %2556 = vmatprep.subr.mxu1 %v2348_v20  ;;  %v5843_v18 = vld [vmem:[#allocation10 + $0xa0] sm:$0xff]  ;;  %v5845_v20 = vld [vmem:[#allocation10 + $0xb0] sm:$0xff] }
 0x70b   :  { %2444 = vmatpush1.msra.mxu0 %v2345_v21  ;;  %2557 = vmatpush1.msra.mxu1 %v2347_v22  ;;  %7080 = vst [vmem:[#allocation44_spill] sm:$0xff] %v5845_v20  ;;  %v5849_v21 = vld [vmem:[#allocation10 + $0x88] sm:$0xff]  ;;  %v5851_v22 = vld [vmem:[#allocation10 + $0x98] sm:$0xff] }
 0x70c   :  { %2445 = vmatprep.subr.mxu0 %v2342_v23  ;;  %2558 = vmatprep.subr.mxu1 %v2344_v24  ;;  %7081 = vst [vmem:[#allocation46_spill] sm:$0xff] %v5849_v21  ;;  %7082 = vst [vmem:[#allocation47_spill] sm:$0xff] %v5851_v22  ;;  %v5855_v23 = vld [vmem:[#allocation10 + $0x80] sm:$0xff]  ;;  %v5857_v24 = vld [vmem:[#allocation10 + $0x90] sm:$0xff] }
 0x70d   :  { %2446 = vmatpush1.msra.mxu0 %v2341_v25  ;;  %2559 = vmatpush1.msra.mxu1 %v2343_v27  ;;  %7083 = vst [vmem:[#allocation49_spill] sm:$0xff] %v5855_v23  ;;  %7084 = vst [vmem:[#allocation48_spill] sm:$0xff] %v5857_v24  ;;  %v5861_v25 = vld [vmem:[#allocation10 + $0x68] sm:$0xff]  ;;  %v5863_v27 = vld [vmem:[#allocation10 + $0x78] sm:$0xff] }
 0x70e   :  { %2447 = vmatprep.subr.mxu0 %v2338_v28  ;;  %2560 = vmatprep.subr.mxu1 %v2340_v31  ;;  %7085 = vst [vmem:[#allocation50_spill] sm:$0xff] %v5861_v25  ;;  %7086 = vst [vmem:[#allocation19_spill] sm:$0xff] %v5863_v27  ;;  %v5867_v28 = vld [vmem:[#allocation10 + $0x60] sm:$0xff]  ;;  %v5869_v31 = vld [vmem:[#allocation10 + $0x70] sm:$0xff] }
 0x70f   :  { %2448 = vmatpush1.msra.mxu0 %v2337_v32  ;;  %2561 = vmatpush1.msra.mxu1 %v2339_v33  ;;  %7087 = vst [vmem:[#allocation20_spill] sm:$0xff] %v5867_v28  ;;  %7088 = vst [vmem:[#allocation51_spill] sm:$0xff] %v5869_v31  ;;  %v5873_v32 = vld [vmem:[#allocation10 + $0x48] sm:$0xff]  ;;  %v5875_v33 = vld [vmem:[#allocation10 + $0x58] sm:$0xff] }
 0x710   :  { %2449 = vmatprep.subr.mxu0 %v2334_v34  ;;  %2562 = vmatprep.subr.mxu1 %v2336_v37  ;;  %7089 = vst [vmem:[#allocation53_spill] sm:$0xff] %v5873_v32  ;;  %7090 = vst [vmem:[#allocation52_spill] sm:$0xff] %v5875_v33  ;;  %v5879_v34 = vld [vmem:[#allocation10 + $0x40] sm:$0xff]  ;;  %v5881_v37 = vld [vmem:[#allocation10 + $0x50] sm:$0xff] }
 0x711   :  { %2450 = vmatpush1.msra.mxu0 %v2333_v38  ;;  %2483 = vmatprep.mubr.f32.mxu0 %v7064_v30  ;;  %7091 = vst [vmem:[#allocation54_spill] sm:$0xff] %v5879_v34  ;;  %7092 = vst [vmem:[#allocation21_spill] sm:$0xff] %v5881_v37  ;;  %v5885_v38 = vld [vmem:[#allocation10 + $0x28] sm:$0xff] }
 0x712   :  { %2563 = vmatpush1.msra.mxu1 %v2335_v39  ;;  %2596 = vmatprep.mubr.f32.mxu1 %v7064_v30  ;;  %7093 = vst [vmem:[#allocation22_spill] sm:$0xff] %v5885_v38  ;;  %v5887_v39 = vld [vmem:[#allocation10 + $0x38] sm:$0xff] }
 0x713   :  { %2484 = vmatmul.mubr.f32.vlgmr.msra.gmra.mxu0 %v7074_v40  ;;  %2597 = vmatmul.mubr.f32.vlgmr.msra.gmra.mxu1 %v7074_v40  ;;  %7094 = vst [vmem:[#allocation23_spill] sm:$0xff] %v5887_v39  ;;  %v5891_v40 = vld [vmem:[#allocation10 + $0x20] sm:$0xff] }
 0x714   :  { %2489 = vmatprep.mubr.f32.mxu0 %v7064_v30  ;;  %2602 = vmatprep.mubr.f32.mxu1 %v7064_v30  ;;  %7095 = vst [vmem:[#allocation24_spill] sm:$0xff] %v5891_v40 }
 0x715   :  { %2816 = vmatprep.subr.mxu1 %v5719_v45 }
 0x716   :  { %2817 = vmatpush1.msra.mxu1 %v5725_v46 }
 0x717   :  { %2490 = vmatmul.mubr.f32.gmra.mxu0 %v7075_v41  ;;  %2603 = vmatmul.mubr.f32.gmra.mxu1 %v7075_v41  ;;  %v5893_v41 = vld [vmem:[#allocation10 + $0x30] sm:$0xff] }
 0x718   :  { %2495 = vmatprep.mubr.f32.mxu0 %v7064_v30  ;;  %2608 = vmatprep.mubr.f32.mxu1 %v7064_v30  ;;  %7096 = vst [vmem:[#allocation25_spill] sm:$0xff] %v5893_v41 }
 0x719   :  { %2818 = vmatprep.subr.mxu1 %v5731_v47 }
 0x71a   :  { %2819 = vmatpush1.msra.mxu1 %v5737_v49 }
 0x71b   :  { %2496 = vmatmul.mubr.f32.gmra.mxu0 %v7076_v5  ;;  %2609 = vmatmul.mubr.f32.gmra.mxu1 %v7076_v5  ;;  %v5897_v5 = vld [vmem:[#allocation10 + $0x8] sm:$0xff] }
 0x71c   :  { %2501 = vmatprep.mubr.f32.mxu0 %v7064_v30  ;;  %2614 = vmatprep.mubr.f32.mxu1 %v7064_v30  ;;  %7097 = vst [vmem:[#allocation26_spill] sm:$0xff] %v5897_v5 }
 0x71d   :  { %2820 = vmatprep.subr.mxu1 %v5743_v51 }
 0x71e   :  { %2821 = vmatpush1.msra.mxu1 %v5749_v54 }
 0x71f   :  { %2502 = vmatmul.mubr.f32.gmra.mxu0 %v7077_v43  ;;  %2615 = vmatmul.mubr.f32.gmra.mxu1 %v7077_v43  ;;  %v5899_v43 = vld [vmem:[#allocation10 + $0x18] sm:$0xff] }
 0x720   :  { %2507 = vmatprep.mubr.f32.mxu0 %v7064_v30  ;;  %2620 = vmatprep.mubr.f32.mxu1 %v7064_v30  ;;  %7098 = vst [vmem:[#allocation27_spill] sm:$0xff] %v5899_v43 }
 0x721   :  { %2822 = vmatprep.subr.mxu1 %v5755_v56 }
 0x722   :  { %2823 = vmatpush1.msra.mxu1 %v5761_v58 }
 0x723   :  { %2508 = vmatmul.mubr.f32.gmra.mxu0 %v5593_v59  ;;  %2621 = vmatmul.mubr.f32.gmra.mxu1 %v5593_v59  ;;  %v5717_v59 = vld [vmem:[#allocation10 + $0x1e8] sm:$0xff] }
 0x724   :  { %2513 = vmatprep.mubr.f32.mxu0 %v7064_v30  ;;  %2626 = vmatprep.mubr.f32.mxu1 %v7064_v30  ;;  %7078 = vst [vmem:[#allocation43_spill] sm:$0xff] %v5717_v59 }
 0x725   :  { %2745 = vmatprep.subr.mxu0 %v5717_v59  ;;  %2824 = vmatprep.subr.mxu1 %v5767_v15 }
 0x726   :  { %2825 = vmatpush1.msra.mxu1 %v5773_v3 }
 0x727   :  { %2514 = vmatmul.mubr.f32.gmra.mxu0 %v5669_v63  ;;  %2627 = vmatmul.mubr.f32.gmra.mxu1 %v5669_v63  ;;  %v5723_v63 = vld [vmem:[#allocation10 + $0x1e0] sm:$0xff] }
 0x728   :  { %2519 = vmatprep.mubr.f32.mxu0 %v7064_v30  ;;  %2632 = vmatprep.mubr.f32.mxu1 %v7064_v30 }
 0x729   :  { %2746 = vmatpush1.msra.mxu0 %v5723_v63  ;;  %2826 = vmatprep.subr.mxu1 %v5779_v11 }
 0x72a   :  { %2827 = vmatpush1.msra.mxu1 %v5785_v42 }
 0x72b   :  { %2520 = vmatmul.mubr.f32.gmra.mxu0 %v5683_v36  ;;  %2633 = vmatmul.mubr.f32.gmra.mxu1 %v5683_v36  ;;  %v5729_v36 = vld [vmem:[#allocation10 + $0x1c8] sm:$0xff] }
 0x72c   :  { %2525 = vmatprep.mubr.f32.mxu0 %v7064_v30  ;;  %2638 = vmatprep.mubr.f32.mxu1 %v7064_v30 }
 0x72d   :  { %2747 = vmatprep.subr.mxu0 %v5729_v36  ;;  %2828 = vmatprep.subr.mxu1 %v5791_v26 }
 0x72e   :  { %2748 = vmatpush1.msra.mxu0 %v5735_v48  ;;  %2829 = vmatpush1.msra.mxu1 %v5795_v44 }
 0x72f   :  { %2749 = vmatprep.subr.mxu0 %v5741_v50  ;;  %2830 = vmatprep.subr.mxu1 %v5803_v10 }
 0x730   :  { %2750 = vmatpush1.msra.mxu0 %v5747_v52  ;;  %2831 = vmatpush1.msra.mxu1 %v5809_v53 }
 0x731   :  { %2751 = vmatprep.subr.mxu0 %v5753_v55  ;;  %2832 = vmatprep.subr.mxu1 %v5815_v60 }
 0x732   :  { %2752 = vmatpush1.msra.mxu0 %v5759_v57  ;;  %2833 = vmatpush1.msra.mxu1 %v5821_v8 }
 0x733   :  { %2753 = vmatprep.subr.mxu0 %v5765_v6  ;;  %2834 = vmatprep.subr.mxu1 %v5827_v7 }
 0x734   :  { %2754 = vmatpush1.msra.mxu0 %v5771_v0  ;;  %2835 = vmatpush1.msra.mxu1 %v5833_v35 }
 0x735   :  { %2755 = vmatprep.subr.mxu0 %v5777_v61  ;;  %2836 = vmatprep.subr.mxu1 %v5839_v12 }
 0x736   :  { %2756 = vmatpush1.msra.mxu0 %v5783_v1  ;;  %2837 = vmatpush1.msra.mxu1 %v5845_v20 }
 0x737   :  { %2757 = vmatprep.subr.mxu0 %v5787_v13  ;;  %2838 = vmatprep.subr.mxu1 %v5851_v22 }
 0x738   :  { %2758 = vmatpush1.msra.mxu0 %v5793_v16  ;;  %2839 = vmatpush1.msra.mxu1 %v5857_v24 }
 0x739   :  { %2759 = vmatprep.subr.mxu0 %v5801_v14  ;;  %2840 = vmatprep.subr.mxu1 %v5863_v27 }
 0x73a   :  { %2760 = vmatpush1.msra.mxu0 %v5807_v17  ;;  %2841 = vmatpush1.msra.mxu1 %v5869_v31  ;;  %v7103_v31 = vld [vmem:[#allocation64_spill] sm:$0xff] }
 0x73b   :  { %2761 = vmatprep.subr.mxu0 %v5813_v2  ;;  %2842 = vmatprep.subr.mxu1 %v5875_v33 }
 0x73c   :  { %2762 = vmatpush1.msra.mxu0 %v5819_v9  ;;  %2843 = vmatpush1.msra.mxu1 %v5881_v37  ;;  %v5903_v37 = vld [vmem:[#allocation10] sm:$0xff] }
 0x73d   :  { %2763 = vmatprep.subr.mxu0 %v5825_v4  ;;  %2844 = vmatprep.subr.mxu1 %v5887_v39  ;;  %7099 = vst [vmem:[#allocation28_spill] sm:$0xff] %v5903_v37 }
 0x73e   :  { %2764 = vmatpush1.msra.mxu0 %v5831_v62  ;;  %2845 = vmatpush1.msra.mxu1 %v5893_v41 }
 0x73f   :  { %2765 = vmatprep.subr.mxu0 %v5837_v19  ;;  %2846 = vmatprep.subr.mxu1 %v5899_v43 }
 0x740   :  { %2766 = vmatpush1.msra.mxu0 %v5843_v18 }
 0x741   :  { %2767 = vmatprep.subr.mxu0 %v5849_v21 }
 0x742   :  { %2768 = vmatpush1.msra.mxu0 %v5855_v23 }
 0x743   :  { %2769 = vmatprep.subr.mxu0 %v5861_v25 }
 0x744   :  { %2770 = vmatpush1.msra.mxu0 %v5867_v28 }
 0x745   :  { %2771 = vmatprep.subr.mxu0 %v5873_v32  ;;  %v7102_v32 = vld [vmem:[#allocation65_spill] sm:$0xff] }
 0x746   :  { %2772 = vmatpush1.msra.mxu0 %v5879_v34 }
 0x747   :  { %2773 = vmatprep.subr.mxu0 %v5885_v38  ;;  %v5905_v38 = vld [vmem:[#allocation10 + $0x10] sm:$0xff] }
 0x748   :  { %2774 = vmatpush1.msra.mxu0 %v5891_v40  ;;  %7100 = vst [vmem:[#allocation29_spill] sm:$0xff] %v5905_v38  ;;  %2847 = vmatpush1.msra.mxu1 %v5905_v38  ;;  %v7101_v40 = vld [vmem:[#allocation63_spill] sm:$0xff]  ;;  %v7104_v38 = vld [vmem:[#allocation66_spill] sm:$0xff] }
 0x749   :  { %2775 = vmatprep.subr.mxu0 %v5897_v5  ;;  %2984 = vmatprep.subr.mxu1 %v5719_v45 }
 0x74a   :  { %2776 = vmatpush1.msra.mxu0 %v5903_v37 }
 0x74b   :  { %2913 = vmatprep.subr.mxu0 %v5717_v59 }
 0x7b2   :  { %v2225_v41 = vpop.f32.mrf.mxu0  ;;  %v2296_v34 = vpop.f32.mrf.mxu1 }
 0x7b3   :  { %v2301_v39 = vadd.f32 %v2225_v41, %v7101_v40  ;;  %v2303_v28 = vadd.f32 %v2296_v34, %v7103_v31 }
 0x7b4   :  { %v2227_v33 = vpop.f32.mrf.mxu0  ;;  %v2298_v37 = vpop.f32.mrf.mxu1 }
 0x7b5   :  { %v2305_v5 = vmul.f32 0.5, %v2301_v39  ;;  %v2302_v43 = vadd.f32 %v2227_v33, %v7102_v32  ;;  %v2304_v25 = vadd.f32 %v2298_v37, %v7104_v38  ;;  %v7113_v37 = vld [vmem:[#allocation53_spill] sm:$0xff]  ;;  %v7114_v38 = vld [vmem:[#allocation52_spill] sm:$0xff] }
 0x7b7   :  { %4354 = vtanh.f32 %v2305_v5  ;;  %v2309_v27 = vmul.f32 0.5, %v2302_v43  ;;  %v2314_v59 = vmul.f32 0.5, %v2304_v25  ;;  %v7112_v25 = vld [vmem:[#allocation51_spill] sm:$0xff]  ;;  %v7115_v43 = vld [vmem:[#allocation54_spill] sm:$0xff] }
 0x7b9   :  { %4356 = vtanh.f32 %v2309_v27 }
 0x7ba   :  { %4358 = vtanh.f32 %v2303_v28 }
 0x7bb   :  { %4360 = vtanh.f32 %v2314_v59  ;;  %v7106_v59 = vld [vmem:[#allocation47_spill] sm:$0xff] }
 0x7c4   :  { %v4355_v24 = vpop.eup %4354 }
 0x7c5   :  { %v2307_v45 = vmul.f32 0.5, %v4355_v24  ;;  %v7111_v24 = vld [vmem:[#allocation20_spill] sm:$0xff] }
 0x7c6   :  { %v4357_v23 = vpop.eup %4356 }
 0x7c7   :  { %v2308_v22 = vadd.f32 0.5, %v2307_v45  ;;  %v2311_v40 = vmul.f32 0.5, %v4357_v23  ;;  %v4359_v41 = vpop.eup %4358  ;;  %v7107_v45 = vld [vmem:[#allocation49_spill] sm:$0xff]  ;;  %v7110_v23 = vld [vmem:[#allocation19_spill] sm:$0xff] }
 0x7c8   :  { %v4361_v31 = vpop.eup %4360 }
 0x7c9   :  { %v2312_v39 = vadd.f32 0.5, %v2311_v40  ;;  %v2319_v21 = vmul.f32 %v4359_v41, %v2308_v22  ;;  %v2316_v27 = vmul.f32 0.5, %v4361_v31  ;;  %v7109_v22 = vld [vmem:[#allocation50_spill] sm:$0xff]  ;;  %v7116_v40 = vld [vmem:[#allocation21_spill] sm:$0xff] }
 0x7ca   :  { %v7117_v41 = vld [vmem:[#allocation22_spill] sm:$0xff] }
 0x7cb   :  { %v2318_v32 = vmul.f32 %v2312_v39, %v5680_v29  ;;  %v2317_v28 = vadd.f32 0.5, %v2316_v27  ;;  %v7105_v29 = vld [vmem:[#allocation46_spill] sm:$0xff]  ;;  %v7118_v39 = vld [vmem:[#allocation23_spill] sm:$0xff] }
 0x7cc   :  { %v7121_v31 = vld [vmem:[#allocation26_spill] sm:$0xff]  ;;  %v7122_v27 = vld [vmem:[#allocation27_spill] sm:$0xff] }
 0x7cd   :  { %v2320_v33 = vadd.f32 %v2319_v21, %v2318_v32  ;;  %v7108_v21 = vld [vmem:[#allocation48_spill] sm:$0xff] }
 0x7ce   :  { %v7119_v32 = vld [vmem:[#allocation24_spill] sm:$0xff] }
 0x7cf   :  { %4362 = vtanh.f32 %v2320_v33  ;;  %v7120_v33 = vld [vmem:[#allocation25_spill] sm:$0xff] }
 0x7dc   :  { %v4363_v34 = vpop.eup %4362 }
 0x7dd   :  { %v2322_v5 = vmul.f32 %v4363_v34, %v2317_v28  ;;  %v7123_v28 = vld [vmem:[#allocation28_spill] sm:$0xff]  ;;  %v7124_v34 = vld [vmem:[#allocation29_spill] sm:$0xff] }
 0x7df   :  { %2526 = vmatmul.mubr.f32.gmra.mxu0 %v2322_v5  ;;  %2639 = vmatmul.mubr.f32.gmra.mxu1 %v2322_v5  ;;  %v7125_v5 = vld [vmem:[#allocation43_spill] sm:$0xff] }
 0x7e0   :  { %2809 = vmatprep.mubr.f32.mxu0 %v7064_v30  ;;  %2880 = vmatprep.mubr.f32.mxu1 %v7064_v30 }
 0x7e3   :  { %2810 = vmatmul.mubr.f32.vlgmr.msra.gmra.mxu0 %v7064_v30  ;;  %2881 = vmatmul.mubr.f32.vlgmr.msra.gmra.mxu1 %v7064_v30 }
 0x7e4   :  { %2914 = vmatpush1.msra.mxu0 %v5723_v63  ;;  %2985 = vmatpush1.msra.mxu1 %v5725_v46 }
 0x7e5   :  { %2915 = vmatprep.subr.mxu0 %v5729_v36  ;;  %2986 = vmatprep.subr.mxu1 %v5731_v47 }
 0x7e6   :  { %2916 = vmatpush1.msra.mxu0 %v5735_v48  ;;  %2987 = vmatpush1.msra.mxu1 %v5737_v49 }
 0x7e7   :  { %2917 = vmatprep.subr.mxu0 %v5741_v50  ;;  %2988 = vmatprep.subr.mxu1 %v5743_v51 }
 0x7e8   :  { %2918 = vmatpush1.msra.mxu0 %v5747_v52  ;;  %2989 = vmatpush1.msra.mxu1 %v5749_v54 }
 0x7e9   :  { %2919 = vmatprep.subr.mxu0 %v5753_v55  ;;  %2990 = vmatprep.subr.mxu1 %v5755_v56 }
 0x7ea   :  { %2920 = vmatpush1.msra.mxu0 %v5759_v57  ;;  %2991 = vmatpush1.msra.mxu1 %v5761_v58 }
 0x7eb   :  { %2921 = vmatprep.subr.mxu0 %v5765_v6  ;;  %2992 = vmatprep.subr.mxu1 %v5767_v15 }
 0x7ec   :  { %2922 = vmatpush1.msra.mxu0 %v5771_v0  ;;  %2993 = vmatpush1.msra.mxu1 %v5773_v3 }
 0x7ed   :  { %2923 = vmatprep.subr.mxu0 %v5777_v61  ;;  %2994 = vmatprep.subr.mxu1 %v5779_v11 }
 0x7ee   :  { %2924 = vmatpush1.msra.mxu0 %v5783_v1  ;;  %2995 = vmatpush1.msra.mxu1 %v5785_v42 }
 0x7ef   :  { %2925 = vmatprep.subr.mxu0 %v5787_v13  ;;  %2996 = vmatprep.subr.mxu1 %v5791_v26 }
 0x7f0   :  { %2926 = vmatpush1.msra.mxu0 %v5793_v16  ;;  %2997 = vmatpush1.msra.mxu1 %v5795_v44 }
 0x7f1   :  { %2927 = vmatprep.subr.mxu0 %v5801_v14  ;;  %2998 = vmatprep.subr.mxu1 %v5803_v10 }
 0x7f2   :  { %2928 = vmatpush1.msra.mxu0 %v5807_v17  ;;  %2999 = vmatpush1.msra.mxu1 %v5809_v53 }
 0x7f3   :  { %2929 = vmatprep.subr.mxu0 %v5813_v2  ;;  %3000 = vmatprep.subr.mxu1 %v5815_v60 }
 0x7f4   :  { %2930 = vmatpush1.msra.mxu0 %v5819_v9  ;;  %3001 = vmatpush1.msra.mxu1 %v5821_v8 }
 0x7f5   :  { %2931 = vmatprep.subr.mxu0 %v5825_v4  ;;  %3002 = vmatprep.subr.mxu1 %v5827_v7 }
 0x7f6   :  { %2932 = vmatpush1.msra.mxu0 %v5831_v62  ;;  %3003 = vmatpush1.msra.mxu1 %v5833_v35 }
 0x7f7   :  { %2933 = vmatprep.subr.mxu0 %v5837_v19  ;;  %3004 = vmatprep.subr.mxu1 %v5839_v12 }
 0x7f8   :  { %2934 = vmatpush1.msra.mxu0 %v5843_v18  ;;  %3005 = vmatpush1.msra.mxu1 %v5845_v20 }
 0x7f9   :  { %2935 = vmatprep.subr.mxu0 %v7105_v29  ;;  %3006 = vmatprep.subr.mxu1 %v7106_v59 }
 0x7fa   :  { %2936 = vmatpush1.msra.mxu0 %v7107_v45  ;;  %3007 = vmatpush1.msra.mxu1 %v7108_v21 }
 0x7fb   :  { %2937 = vmatprep.subr.mxu0 %v7109_v22  ;;  %3008 = vmatprep.subr.mxu1 %v7110_v23 }
 0x7fc   :  { %2938 = vmatpush1.msra.mxu0 %v7111_v24  ;;  %3009 = vmatpush1.msra.mxu1 %v7112_v25 }
 0x7fd   :  { %2939 = vmatprep.subr.mxu0 %v7113_v37  ;;  %3010 = vmatprep.subr.mxu1 %v7114_v38 }
 0x7fe   :  { %2940 = vmatpush1.msra.mxu0 %v7115_v43  ;;  %3011 = vmatpush1.msra.mxu1 %v7116_v40 }
 0x7ff   :  { %2941 = vmatprep.subr.mxu0 %v7117_v41  ;;  %3012 = vmatprep.subr.mxu1 %v7118_v39  ;;  %v7126_v41 = vld [vmem:[#allocation45_spill] sm:$0xff]  ;;  %v2485_v39 = vpop.f32.mrf.mxu0 }
 0x800   :  { %2942 = vmatpush1.msra.mxu0 %v7119_v32  ;;  %3013 = vmatpush1.msra.mxu1 %v7120_v33  ;;  %v2598_v32 = vpop.f32.mrf.mxu1 }
 0x801   :  { %2943 = vmatprep.subr.mxu0 %v7121_v31  ;;  %3014 = vmatprep.subr.mxu1 %v7122_v27  ;;  %v2487_v40 = vpop.f32.mrf.mxu0 }
 0x802   :  { %2944 = vmatpush1.msra.mxu0 %v7123_v28  ;;  %2977 = vmatprep.mubr.f32.mxu0 %v7064_v30  ;;  %v2600_v33 = vpop.f32.mrf.mxu1 }
 0x803   :  { %3015 = vmatpush1.msra.mxu1 %v7124_v34  ;;  %3048 = vmatprep.mubr.f32.mxu1 %v7064_v30  ;;  %v5986_v43 = vpop.f32.mrf.mxu0 }
 0x804   :  { %3081 = vmatprep.subr.mxu0 %v7125_v5  ;;  %3152 = vmatprep.subr.mxu1 %v7126_v41  ;;  %7127 = vst [vmem:[#allocation30_spill] sm:$0xff] %v5986_v43  ;;  %v5988_v31 = vpop.f32.mrf.mxu1 }
 0x805   :  { %7128 = vst [vmem:[#allocation31_spill] sm:$0xff] %v5988_v31  ;;  %v5990_v27 = vpop.f32.mrf.mxu0 }
 0x806   :  { %7129 = vst [vmem:[#allocation32_spill] sm:$0xff] %v5990_v27  ;;  %v5992_v28 = vpop.f32.mrf.mxu1 }
 0x807   :  { %7130 = vst [vmem:[#allocation33_spill] sm:$0xff] %v5992_v28  ;;  %v5994_v38 = vpop.f32.mrf.mxu0 }
 0x808   :  { %7131 = vst [vmem:[#allocation34_spill] sm:$0xff] %v5994_v38  ;;  %v5996_v34 = vpop.f32.mrf.mxu1 }
 0x809   :  { %7132 = vst [vmem:[#allocation35_spill] sm:$0xff] %v5996_v34  ;;  %v5998_v30 = vpop.f32.mrf.mxu0 }
 0x80a   :  { %7133 = vst [vmem:[#allocation36_spill] sm:$0xff] %v5998_v30  ;;  %v6000_v5 = vpop.f32.mrf.mxu1 }
 0x80b   :  { %7134 = vst [vmem:[#allocation37_spill] sm:$0xff] %v6000_v5  ;;  %v6002_v41 = vpop.f32.mrf.mxu0 }
 0x80c   :  { %7135 = vst [vmem:[#allocation38_spill] sm:$0xff] %v6002_v41  ;;  %v6004_v37 = vpop.f32.mrf.mxu1 }
 0x80d   :  { %7136 = vst [vmem:[#allocation41_spill] sm:$0xff] %v6004_v37  ;;  %v6006_v25 = vpop.f32.mrf.mxu0 }
 0x80e   :  { %7137 = vst [vmem:[#allocation55_spill] sm:$0xff] %v6006_v25  ;;  %v6008_v43 = vpop.f32.mrf.mxu1 }
 0x80f   :  { %7138 = vst [vmem:[#allocation57_spill] sm:$0xff] %v6008_v43  ;;  %v6010_v31 = vpop.f32.mrf.mxu0 }
 0x810   :  { %7139 = vst [vmem:[#allocation56_spill] sm:$0xff] %v6010_v31  ;;  %v6012_v27 = vpop.f32.mrf.mxu1 }
 0x811   :  { %7140 = vst [vmem:[#allocation58_spill] sm:$0xff] %v6012_v27  ;;  %v6014_v28 = vpop.f32.mrf.mxu0  ;;  %v2397_v27 = vld [vmem:[%s6700_s6] sm:$0xf] }
 0x812   :  { %7141 = vst [vmem:[#allocation59_spill] sm:$0xff] %v6014_v28  ;;  %v6016_v38 = vpop.f32.mrf.mxu1 }
 0x813   :  { %7142 = vst [vmem:[#allocation61_spill] sm:$0xff] %v6016_v38  ;;  %v6018_v34 = vpop.f32.mrf.mxu0  ;;  %v7151_v38 = vld [vmem:[#allocation39_spill] sm:$0xff] }
 0x814   :  { %7143 = vst [vmem:[#allocation60_spill] sm:$0xff] %v6018_v34  ;;  %v6020_v30 = vpop.f32.mrf.mxu1  ;;  %v7152_v34 = vsub.s32 0, %v7151_v38 }
 0x815   :  { %7144 = vst [vmem:[#allocation62_spill] sm:$0xff] %v6020_v30  ;;  %v6022_v5 = vpop.f32.mrf.mxu0 }
 0x816   :  { %7145 = vst [vmem:[#allocation67_spill] sm:$0xff] %v6022_v5  ;;  %v6024_v41 = vpop.f32.mrf.mxu1  ;;  %v6039_v43 = vrot.slane %v2397_v27, %v7152_v34 }
 0x817   :  { %7146 = vst [vmem:[#allocation18_spill] sm:$0xff] %v6024_v41  ;;  %v6026_v37 = vpop.f32.mrf.mxu0 }
 0x818   :  { %7147 = vst [vmem:[#allocation40_spill] sm:$0xff] %v6026_v37  ;;  %v6028_v25 = vpop.f32.mrf.mxu1  ;;  %7153 = vst [vmem:[#allocation64_spill] sm:$0xff] %v6039_v43  ;;  %v7156_v37 = vsub.s32 1, %v7151_v38  ;;  %v2486_v24 = vadd.f32 %v2485_v39, %v6039_v43  ;;  %v7161_v39 = vsub.s32 3, %v7151_v38 }
 0x819   :  { %7148 = vst [vmem:[#allocation42_spill] sm:$0xff] %v6028_v25  ;;  %v6033_v31 = vpop.f32.mrf.mxu0 }
 0x81a   :  { %7149 = vst [vmem:[#allocation63_spill] sm:$0xff] %v6033_v31  ;;  %v6035_v28 = vpop.f32.mrf.mxu1  ;;  %v6047_v41 = vrot.slane %v2397_v27, %v7156_v37  ;;  %v6062_v43 = vrot.slane %v2397_v27, %v7161_v39  ;;  %v7164_v39 = vld [vmem:[#allocation49_spill] sm:$0xff] }
 0x81b   :  { %7150 = vst [vmem:[#allocation65_spill] sm:$0xff] %v6035_v28  ;;  %v7160_v28 = vsub.s32 2, %v7151_v38 }
 0x81c   :  { %7157 = vst [vmem:[#allocation68_spill] sm:$0xff] %v6047_v41  ;;  %v2488_v34 = vadd.f32 %v2487_v40, %v6047_v41 }
 0x81d   :  { %v6056_v22 = vrot.slane %v2397_v27, %v7160_v28  ;;  %v2601_v28 = vadd.f32 %v2600_v33, %v6062_v43 }
 0x81f   :  { %v2599_v37 = vadd.f32 %v2598_v32, %v6056_v22 }
 0x89f   :  { %v6041_v30 = vpop.f32.mrf.mxu0  ;;  %v6043_v5 = vpop.f32.mrf.mxu1 }
 0x8a0   :  { %7154 = vst [vmem:[#allocation66_spill] sm:$0xff] %v6041_v30  ;;  %7155 = vst [vmem:[#allocation39_spill] sm:$0xff] %v6043_v5 }
 0x8a1   :  { %v6049_v25 = vpop.f32.mrf.mxu0  ;;  %v6052_v23 = vpop.f32.mrf.mxu1 }
 0x8a2   :  { %7158 = vst [vmem:[#allocation69_spill] sm:$0xff] %v6049_v25  ;;  %7159 = vst [vmem:[#allocation70_spill] sm:$0xff] %v6052_v23 }
 0x8a3   :  { %v2811_v31 = vpop.f32.mrf.mxu0  ;;  %v2882_v59 = vpop.f32.mrf.mxu1 }
 0x8a4   :  { %v2887_v30 = vadd.f32 %v2811_v31, %v2486_v24  ;;  %v2889_v23 = vadd.f32 %v2882_v59, %v2599_v37  ;;  %v7163_v37 = vld [vmem:[#allocation47_spill] sm:$0xff] }
 0x8a5   :  { %v2813_v21 = vpop.f32.mrf.mxu0  ;;  %v2884_v29 = vpop.f32.mrf.mxu1 }
 0x8a6   :  { %v2891_v5 = vmul.f32 0.5, %v2887_v30  ;;  %v2888_v45 = vadd.f32 %v2813_v21, %v2488_v34  ;;  %v2890_v40 = vadd.f32 %v2884_v29, %v2601_v28  ;;  %v7165_v28 = vld [vmem:[#allocation48_spill] sm:$0xff] }
 0x8a8   :  { %4364 = vtanh.f32 %v2891_v5  ;;  %v2895_v25 = vmul.f32 0.5, %v2888_v45  ;;  %v2900_v24 = vmul.f32 0.5, %v2890_v40  ;;  %v7166_v40 = vld [vmem:[#allocation50_spill] sm:$0xff] }
 0x8aa   :  { %4366 = vtanh.f32 %v2895_v25 }
 0x8ab   :  { %4368 = vtanh.f32 %v2889_v23 }
 0x8ac   :  { %4370 = vtanh.f32 %v2900_v24  ;;  %v7167_v24 = vld [vmem:[#allocation19_spill] sm:$0xff] }
 0x8b5   :  { %v4365_v31 = vpop.eup %4364 }
 0x8b6   :  { %v2893_v30 = vmul.f32 0.5, %v4365_v31  ;;  %v7168_v31 = vld [vmem:[#allocation20_spill] sm:$0xff] }
 0x8b7   :  { %v4367_v21 = vpop.eup %4366 }
 0x8b8   :  { %v2894_v34 = vadd.f32 0.5, %v2893_v30  ;;  %v2897_v41 = vmul.f32 0.5, %v4367_v21  ;;  %v4369_v45 = vpop.eup %4368  ;;  %v7169_v30 = vld [vmem:[#allocation51_spill] sm:$0xff]  ;;  %v7170_v21 = vld [vmem:[#allocation53_spill] sm:$0xff] }
 0x8b9   :  { %v4371_v59 = vpop.eup %4370 }
 0x8ba   :  { %v2898_v32 = vadd.f32 0.5, %v2897_v41  ;;  %v2905_v38 = vmul.f32 %v4369_v45, %v2894_v34  ;;  %v2902_v25 = vmul.f32 0.5, %v4371_v59  ;;  %v7162_v41 = vld [vmem:[#allocation46_spill] sm:$0xff]  ;;  %v7171_v34 = vld [vmem:[#allocation52_spill] sm:$0xff]  ;;  %v7173_v45 = vld [vmem:[#allocation21_spill] sm:$0xff] }
 0x8bb   :  { %v7176_v59 = vld [vmem:[#allocation24_spill] sm:$0xff] }
 0x8bc   :  { %v2904_v5 = vmul.f32 0.0, %v2898_v32  ;;  %v2903_v33 = vadd.f32 0.5, %v2902_v25  ;;  %v7172_v32 = vld [vmem:[#allocation54_spill] sm:$0xff]  ;;  %v7177_v25 = vld [vmem:[#allocation25_spill] sm:$0xff] }
 0x8be   :  { %v6065_v27 = vadd.f32 %v2905_v38, %v2904_v5  ;;  %v7174_v5 = vld [vmem:[#allocation22_spill] sm:$0xff]  ;;  %v7175_v38 = vld [vmem:[#allocation23_spill] sm:$0xff] }
 0x8c0   :  { %4372 = vtanh.f32 %v6065_v27 }
 0x8cd   :  { %v4373_v23 = vpop.eup %4372 }
 0x8ce   :  { %v2908_v29 = vmul.f32 %v4373_v23, %v2903_v33  ;;  %v7178_v33 = vld [vmem:[#allocation26_spill] sm:$0xff]  ;;  %v7179_v23 = vld [vmem:[#allocation27_spill] sm:$0xff] }
 0x8d0   :  { %2978 = vmatmul.mubr.f32.vlgmr.msra.gmra.mxu0 %v2908_v29  ;;  %3049 = vmatmul.mubr.f32.vlgmr.msra.gmra.mxu1 %v2908_v29  ;;  %v7180_v29 = vld [vmem:[#allocation28_spill] sm:$0xff] }
 0x8d1   :  { %3082 = vmatpush1.msra.mxu0 %v5723_v63  ;;  %3153 = vmatpush1.msra.mxu1 %v5725_v46 }
 0x8d2   :  { %3083 = vmatprep.subr.mxu0 %v5729_v36  ;;  %3154 = vmatprep.subr.mxu1 %v5731_v47 }
 0x8d3   :  { %3084 = vmatpush1.msra.mxu0 %v5735_v48  ;;  %3155 = vmatpush1.msra.mxu1 %v5737_v49 }
 0x8d4   :  { %3085 = vmatprep.subr.mxu0 %v5741_v50  ;;  %3156 = vmatprep.subr.mxu1 %v5743_v51 }
 0x8d5   :  { %3086 = vmatpush1.msra.mxu0 %v5747_v52  ;;  %3157 = vmatpush1.msra.mxu1 %v5749_v54 }
 0x8d6   :  { %3087 = vmatprep.subr.mxu0 %v5753_v55  ;;  %3158 = vmatprep.subr.mxu1 %v5755_v56 }
 0x8d7   :  { %3088 = vmatpush1.msra.mxu0 %v5759_v57  ;;  %3159 = vmatpush1.msra.mxu1 %v5761_v58 }
 0x8d8   :  { %3089 = vmatprep.subr.mxu0 %v5765_v6  ;;  %3160 = vmatprep.subr.mxu1 %v5767_v15 }
 0x8d9   :  { %3090 = vmatpush1.msra.mxu0 %v5771_v0  ;;  %3161 = vmatpush1.msra.mxu1 %v5773_v3 }
 0x8da   :  { %3091 = vmatprep.subr.mxu0 %v5777_v61  ;;  %3162 = vmatprep.subr.mxu1 %v5779_v11 }
 0x8db   :  { %3092 = vmatpush1.msra.mxu0 %v5783_v1  ;;  %3163 = vmatpush1.msra.mxu1 %v5785_v42 }
 0x8dc   :  { %3093 = vmatprep.subr.mxu0 %v5787_v13  ;;  %3164 = vmatprep.subr.mxu1 %v5791_v26 }
 0x8dd   :  { %3094 = vmatpush1.msra.mxu0 %v5793_v16  ;;  %3165 = vmatpush1.msra.mxu1 %v5795_v44 }
 0x8de   :  { %3095 = vmatprep.subr.mxu0 %v5801_v14  ;;  %3166 = vmatprep.subr.mxu1 %v5803_v10 }
 0x8df   :  { %3096 = vmatpush1.msra.mxu0 %v5807_v17  ;;  %3167 = vmatpush1.msra.mxu1 %v5809_v53 }
 0x8e0   :  { %3097 = vmatprep.subr.mxu0 %v5813_v2  ;;  %3168 = vmatprep.subr.mxu1 %v5815_v60 }
 0x8e1   :  { %3098 = vmatpush1.msra.mxu0 %v5819_v9  ;;  %3169 = vmatpush1.msra.mxu1 %v5821_v8 }
 0x8e2   :  { %3099 = vmatprep.subr.mxu0 %v5825_v4  ;;  %3170 = vmatprep.subr.mxu1 %v5827_v7 }
 0x8e3   :  { %3100 = vmatpush1.msra.mxu0 %v5831_v62  ;;  %3171 = vmatpush1.msra.mxu1 %v5833_v35 }
 0x8e4   :  { %3101 = vmatprep.subr.mxu0 %v5837_v19  ;;  %3172 = vmatprep.subr.mxu1 %v5839_v12 }
 0x8e5   :  { %3102 = vmatpush1.msra.mxu0 %v5843_v18  ;;  %3173 = vmatpush1.msra.mxu1 %v5845_v20 }
 0x8e6   :  { %3103 = vmatprep.subr.mxu0 %v7162_v41  ;;  %3174 = vmatprep.subr.mxu1 %v7163_v37 }
 0x8e7   :  { %3104 = vmatpush1.msra.mxu0 %v7164_v39  ;;  %3175 = vmatpush1.msra.mxu1 %v7165_v28 }
 0x8e8   :  { %3105 = vmatprep.subr.mxu0 %v7166_v40  ;;  %3176 = vmatprep.subr.mxu1 %v7167_v24  ;;  %v7189_v40 = vld [vmem:[#allocation31_spill] sm:$0xff] }
 0x8e9   :  { %3106 = vmatpush1.msra.mxu0 %v7168_v31  ;;  %3177 = vmatpush1.msra.mxu1 %v7169_v30  ;;  %v7187_v30 = vld [vmem:[#allocation68_spill] sm:$0xff]  ;;  %v2605_v28 = vadd.f32 %v7189_v40, %v6056_v22 }
 0x8ea   :  { %3107 = vmatprep.subr.mxu0 %v7170_v21  ;;  %3178 = vmatprep.subr.mxu1 %v7171_v34  ;;  %v7181_v21 = vmov 0.0   ;;  %v7182_v34 = vld [vmem:[#allocation29_spill] sm:$0xff] }
 0x8eb   :  { %3108 = vmatpush1.msra.mxu0 %v7172_v32  ;;  %3179 = vmatpush1.msra.mxu1 %v7173_v45  ;;  %v7183_v45 = vld [vmem:[#allocation43_spill] sm:$0xff] }
 0x8ec   :  { %3109 = vmatprep.subr.mxu0 %v7174_v5  ;;  %3180 = vmatprep.subr.mxu1 %v7175_v38  ;;  %v7184_v5 = vld [vmem:[#allocation45_spill] sm:$0xff]  ;;  %v7185_v38 = vld [vmem:[#allocation64_spill] sm:$0xff] }
 0x8ed   :  { %3110 = vmatpush1.msra.mxu0 %v7176_v59  ;;  %3181 = vmatpush1.msra.mxu1 %v7177_v25  ;;  %v7186_v59 = vld [vmem:[#allocation30_spill] sm:$0xff] }
 0x8ee   :  { %3111 = vmatprep.subr.mxu0 %v7178_v33  ;;  %3182 = vmatprep.subr.mxu1 %v7179_v23  ;;  %v2492_v32 = vadd.f32 %v7186_v59, %v7185_v38  ;;  %v7188_v33 = vld [vmem:[#allocation32_spill] sm:$0xff]  ;;  %v7190_v59 = vld [vmem:[#allocation33_spill] sm:$0xff] }
 0x8ef   :  { %3112 = vmatpush1.msra.mxu0 %v7180_v29  ;;  %3145 = vmatprep.mubr.f32.mxu0 %v7181_v21  ;;  %v2494_v31 = vadd.f32 %v7188_v33, %v7187_v30  ;;  %v2607_v38 = vadd.f32 %v7190_v59, %v6062_v43  ;;  %v7198_v59 = vld [vmem:[#allocation20_spill] sm:$0xff] }
 0x8f0   :  { %3183 = vmatpush1.msra.mxu1 %v7182_v34  ;;  %3216 = vmatprep.mubr.f32.mxu1 %v7181_v21 }
 0x8f1   :  { %3249 = vmatprep.subr.mxu0 %v7183_v45  ;;  %3320 = vmatprep.subr.mxu1 %v7184_v5 }
 0x990   :  { %v2979_v25 = vpop.f32.mrf.mxu0  ;;  %v3050_v24 = vpop.f32.mrf.mxu1 }
 0x991   :  { %v3055_v23 = vadd.f32 %v2979_v25, %v2492_v32  ;;  %v3057_v21 = vadd.f32 %v3050_v24, %v2605_v28 }
 0x992   :  { %v2981_v29 = vpop.f32.mrf.mxu0  ;;  %v3052_v5 = vpop.f32.mrf.mxu1 }
 0x993   :  { %v3059_v34 = vmul.f32 0.5, %v3055_v23  ;;  %v3056_v39 = vadd.f32 %v2981_v29, %v2494_v31  ;;  %v3058_v37 = vadd.f32 %v3052_v5, %v2607_v38  ;;  %v7195_v5 = vld [vmem:[#allocation48_spill] sm:$0xff]  ;;  %v7196_v38 = vld [vmem:[#allocation50_spill] sm:$0xff]  ;;  %v7197_v29 = vld [vmem:[#allocation19_spill] sm:$0xff] }
 0x995   :  { %4374 = vtanh.f32 %v3059_v34  ;;  %v3063_v45 = vmul.f32 0.5, %v3056_v39  ;;  %v3068_v41 = vmul.f32 0.5, %v3058_v37 }
 0x997   :  { %4376 = vtanh.f32 %v3063_v45 }
 0x998   :  { %4378 = vtanh.f32 %v3057_v21 }
 0x999   :  { %4380 = vtanh.f32 %v3068_v41  ;;  %v7193_v41 = vld [vmem:[#allocation47_spill] sm:$0xff] }
 0x9a2   :  { %v4375_v33 = vpop.eup %4374 }
 0x9a3   :  { %v3061_v32 = vmul.f32 0.5, %v4375_v33  ;;  %v7199_v33 = vld [vmem:[#allocation51_spill] sm:$0xff] }
 0x9a4   :  { %v4377_v25 = vpop.eup %4376 }
 0x9a5   :  { %v3062_v30 = vadd.f32 0.5, %v3061_v32  ;;  %v3065_v20 = vmul.f32 0.5, %v4377_v25  ;;  %v4379_v40 = vpop.eup %4378  ;;  %v7200_v32 = vld [vmem:[#allocation53_spill] sm:$0xff]  ;;  %v7201_v25 = vld [vmem:[#allocation52_spill] sm:$0xff] }
 0x9a6   :  { %v4381_v24 = vpop.eup %4380 }
 0x9a7   :  { %v3066_v23 = vadd.f32 0.5, %v3065_v20  ;;  %v3073_v31 = vmul.f32 %v4379_v40, %v3062_v30  ;;  %v3070_v21 = vmul.f32 0.5, %v4381_v24  ;;  %v7191_v20 = vld [vmem:[#allocation44_spill] sm:$0xff]  ;;  %v7194_v30 = vld [vmem:[#allocation49_spill] sm:$0xff]  ;;  %v7202_v40 = vld [vmem:[#allocation54_spill] sm:$0xff] }
 0x9a8   :  { %v7206_v24 = vld [vmem:[#allocation24_spill] sm:$0xff] }
 0x9a9   :  { %v3072_v28 = vmul.f32 %v3066_v23, %v6065_v27  ;;  %v3071_v34 = vadd.f32 0.5, %v3070_v21  ;;  %v7192_v27 = vld [vmem:[#allocation46_spill] sm:$0xff]  ;;  %v7203_v23 = vld [vmem:[#allocation21_spill] sm:$0xff] }
 0x9aa   :  { %v7207_v21 = vld [vmem:[#allocation25_spill] sm:$0xff] }
 0x9ab   :  { %v6143_v39 = vadd.f32 %v3073_v31, %v3072_v28  ;;  %v7204_v31 = vld [vmem:[#allocation22_spill] sm:$0xff]  ;;  %v7205_v28 = vld [vmem:[#allocation23_spill] sm:$0xff] }
 0x9ad   :  { %4382 = vtanh.f32 %v6143_v39 }
 0x9ba   :  { %v4383_v45 = vpop.eup %4382 }
 0x9bb   :  { %v3076_v37 = vmul.f32 %v4383_v45, %v3071_v34  ;;  %v7208_v34 = vld [vmem:[#allocation26_spill] sm:$0xff]  ;;  %v7209_v45 = vld [vmem:[#allocation27_spill] sm:$0xff] }
 0x9bd   :  { %3146 = vmatmul.mubr.f32.vlgmr.msra.gmra.mxu0 %v3076_v37  ;;  %3217 = vmatmul.mubr.f32.vlgmr.msra.gmra.mxu1 %v3076_v37  ;;  %v7210_v37 = vld [vmem:[#allocation28_spill] sm:$0xff] }
 0x9be   :  { %3250 = vmatpush1.msra.mxu0 %v5723_v63  ;;  %3321 = vmatpush1.msra.mxu1 %v5725_v46 }
 0x9bf   :  { %3251 = vmatprep.subr.mxu0 %v5729_v36  ;;  %3322 = vmatprep.subr.mxu1 %v5731_v47 }
 0x9c0   :  { %3252 = vmatpush1.msra.mxu0 %v5735_v48  ;;  %3323 = vmatpush1.msra.mxu1 %v5737_v49 }
 0x9c1   :  { %3253 = vmatprep.subr.mxu0 %v5741_v50  ;;  %3324 = vmatprep.subr.mxu1 %v5743_v51 }
 0x9c2   :  { %3254 = vmatpush1.msra.mxu0 %v5747_v52  ;;  %3325 = vmatpush1.msra.mxu1 %v5749_v54 }
 0x9c3   :  { %3255 = vmatprep.subr.mxu0 %v5753_v55  ;;  %3326 = vmatprep.subr.mxu1 %v5755_v56 }
 0x9c4   :  { %3256 = vmatpush1.msra.mxu0 %v5759_v57  ;;  %3327 = vmatpush1.msra.mxu1 %v5761_v58 }
 0x9c5   :  { %3257 = vmatprep.subr.mxu0 %v5765_v6  ;;  %3328 = vmatprep.subr.mxu1 %v5767_v15 }
 0x9c6   :  { %3258 = vmatpush1.msra.mxu0 %v5771_v0  ;;  %3329 = vmatpush1.msra.mxu1 %v5773_v3 }
 0x9c7   :  { %3259 = vmatprep.subr.mxu0 %v5777_v61  ;;  %3330 = vmatprep.subr.mxu1 %v5779_v11 }
 0x9c8   :  { %3260 = vmatpush1.msra.mxu0 %v5783_v1  ;;  %3331 = vmatpush1.msra.mxu1 %v5785_v42 }
 0x9c9   :  { %3261 = vmatprep.subr.mxu0 %v5787_v13  ;;  %3332 = vmatprep.subr.mxu1 %v5791_v26 }
 0x9ca   :  { %3262 = vmatpush1.msra.mxu0 %v5793_v16  ;;  %3333 = vmatpush1.msra.mxu1 %v5795_v44 }
 0x9cb   :  { %3263 = vmatprep.subr.mxu0 %v5801_v14  ;;  %3334 = vmatprep.subr.mxu1 %v5803_v10 }
 0x9cc   :  { %3264 = vmatpush1.msra.mxu0 %v5807_v17  ;;  %3335 = vmatpush1.msra.mxu1 %v5809_v53 }
 0x9cd   :  { %3265 = vmatprep.subr.mxu0 %v5813_v2  ;;  %3336 = vmatprep.subr.mxu1 %v5815_v60 }
 0x9ce   :  { %3266 = vmatpush1.msra.mxu0 %v5819_v9  ;;  %3337 = vmatpush1.msra.mxu1 %v5821_v8 }
 0x9cf   :  { %3267 = vmatprep.subr.mxu0 %v5825_v4  ;;  %3338 = vmatprep.subr.mxu1 %v5827_v7 }
 0x9d0   :  { %3268 = vmatpush1.msra.mxu0 %v5831_v62  ;;  %3339 = vmatpush1.msra.mxu1 %v5833_v35 }
 0x9d1   :  { %3269 = vmatprep.subr.mxu0 %v5837_v19  ;;  %3340 = vmatprep.subr.mxu1 %v5839_v12 }
 0x9d2   :  { %3270 = vmatpush1.msra.mxu0 %v5843_v18  ;;  %3341 = vmatpush1.msra.mxu1 %v7191_v20 }
 0x9d3   :  { %3271 = vmatprep.subr.mxu0 %v7192_v27  ;;  %3342 = vmatprep.subr.mxu1 %v7193_v41 }
 0x9d4   :  { %3272 = vmatpush1.msra.mxu0 %v7194_v30  ;;  %3343 = vmatpush1.msra.mxu1 %v7195_v5 }
 0x9d5   :  { %3273 = vmatprep.subr.mxu0 %v7196_v38  ;;  %3344 = vmatprep.subr.mxu1 %v7197_v29  ;;  %v7219_v38 = vld [vmem:[#allocation35_spill] sm:$0xff] }
 0x9d6   :  { %3274 = vmatpush1.msra.mxu0 %v7198_v59  ;;  %3345 = vmatpush1.msra.mxu1 %v7199_v33  ;;  %v7217_v33 = vld [vmem:[#allocation68_spill] sm:$0xff]  ;;  %v2611_v5 = vadd.f32 %v7219_v38, %v6056_v22 }
 0x9d7   :  { %3275 = vmatprep.subr.mxu0 %v7200_v32  ;;  %3346 = vmatprep.subr.mxu1 %v7201_v25  ;;  %v7211_v32 = vmov 0.0   ;;  %v7212_v25 = vld [vmem:[#allocation29_spill] sm:$0xff] }
 0x9d8   :  { %3276 = vmatpush1.msra.mxu0 %v7202_v40  ;;  %3347 = vmatpush1.msra.mxu1 %v7203_v23  ;;  %v7213_v23 = vld [vmem:[#allocation43_spill] sm:$0xff] }
 0x9d9   :  { %3277 = vmatprep.subr.mxu0 %v7204_v31  ;;  %3348 = vmatprep.subr.mxu1 %v7205_v28  ;;  %v7214_v31 = vld [vmem:[#allocation45_spill] sm:$0xff]  ;;  %v7215_v28 = vld [vmem:[#allocation64_spill] sm:$0xff] }
 0x9da   :  { %3278 = vmatpush1.msra.mxu0 %v7206_v24  ;;  %3349 = vmatpush1.msra.mxu1 %v7207_v21  ;;  %v7216_v24 = vld [vmem:[#allocation34_spill] sm:$0xff] }
 0x9db   :  { %3279 = vmatprep.subr.mxu0 %v7208_v34  ;;  %3350 = vmatprep.subr.mxu1 %v7209_v45  ;;  %v2498_v40 = vadd.f32 %v7216_v24, %v7215_v28  ;;  %v7218_v34 = vld [vmem:[#allocation36_spill] sm:$0xff]  ;;  %v7220_v24 = vld [vmem:[#allocation37_spill] sm:$0xff] }
 0x9dc   :  { %3280 = vmatpush1.msra.mxu0 %v7210_v37  ;;  %3313 = vmatprep.mubr.f32.mxu0 %v7211_v32  ;;  %v2500_v59 = vadd.f32 %v7218_v34, %v7217_v33  ;;  %v2613_v28 = vadd.f32 %v7220_v24, %v6062_v43 }
 0x9dd   :  { %3351 = vmatpush1.msra.mxu1 %v7212_v25  ;;  %3384 = vmatprep.mubr.f32.mxu1 %v7211_v32 }
 0x9de   :  { %3417 = vmatprep.subr.mxu0 %v7213_v23  ;;  %3488 = vmatprep.subr.mxu1 %v7214_v31 }
 0xa7d   :  { %v3147_v21 = vpop.f32.mrf.mxu0  ;;  %v3218_v29 = vpop.f32.mrf.mxu1 }
 0xa7e   :  { %v3223_v45 = vadd.f32 %v3147_v21, %v2498_v40  ;;  %v3225_v32 = vadd.f32 %v3218_v29, %v2611_v5 }
 0xa7f   :  { %v3149_v37 = vpop.f32.mrf.mxu0  ;;  %v3220_v31 = vpop.f32.mrf.mxu1 }
 0xa80   :  { %v3227_v25 = vmul.f32 0.5, %v3223_v45  ;;  %v3224_v30 = vadd.f32 %v3149_v37, %v2500_v59  ;;  %v3226_v41 = vadd.f32 %v3220_v31, %v2613_v28 }
 0xa82   :  { %4384 = vtanh.f32 %v3227_v25  ;;  %v3231_v23 = vmul.f32 0.5, %v3224_v30  ;;  %v3236_v27 = vmul.f32 0.5, %v3226_v41 }
 0xa84   :  { %4386 = vtanh.f32 %v3231_v23 }
 0xa85   :  { %4388 = vtanh.f32 %v3225_v32 }
 0xa86   :  { %4390 = vtanh.f32 %v3236_v27 }
 0xa8f   :  { %v4385_v34 = vpop.eup %4384 }
 0xa90   :  { %v3229_v40 = vmul.f32 0.5, %v4385_v34 }
 0xa91   :  { %v4387_v21 = vpop.eup %4386 }
 0xa92   :  { %v3230_v33 = vadd.f32 0.5, %v3229_v40  ;;  %v3233_v20 = vmul.f32 0.5, %v4387_v21  ;;  %v4389_v38 = vpop.eup %4388 }
 0xa93   :  { %v4391_v29 = vpop.eup %4390 }
 0xa94   :  { %v3234_v45 = vadd.f32 0.5, %v3233_v20  ;;  %v3241_v59 = vmul.f32 %v4389_v38, %v3230_v33  ;;  %v3238_v32 = vmul.f32 0.5, %v4391_v29 }
 0xa96   :  { %v3240_v5 = vmul.f32 %v3234_v45, %v6143_v39  ;;  %v3239_v25 = vadd.f32 0.5, %v3238_v32  ;;  %v7250_v39 = vld [vmem:[#allocation57_spill] sm:$0xff] }
 0xa97   :  { %v2619_v20 = vadd.f32 %v7250_v39, %v6062_v43  ;;  %v6420_v39 = vld [vmem:[#allocation10 + $0xa8] sm:$0xff] }
 0xa98   :  { %v6221_v30 = vadd.f32 %v3241_v59, %v3240_v5 }
 0xa9a   :  { %4392 = vtanh.f32 %v6221_v30 }
 0xaa7   :  { %v4393_v28 = vpop.eup %4392 }
 0xaa8   :  { %v3244_v41 = vmul.f32 %v4393_v28, %v3239_v25 }
 0xaaa   :  { %3314 = vmatmul.mubr.f32.vlgmr.msra.gmra.mxu0 %v3244_v41  ;;  %3385 = vmatmul.mubr.f32.vlgmr.msra.gmra.mxu1 %v3244_v41  ;;  %v6306_v41 = vld [vmem:[#allocation10 + $0x1e0] sm:$0xff] }
 0xaab   :  { %3418 = vmatpush1.msra.mxu0 %v5723_v63  ;;  %3489 = vmatpush1.msra.mxu1 %v5725_v46  ;;  %v7221_v63 = vld [vmem:[#allocation44_spill] sm:$0xff]  ;;  %v7222_v46 = vld [vmem:[#allocation46_spill] sm:$0xff] }
 0xaac   :  { %3419 = vmatprep.subr.mxu0 %v5729_v36  ;;  %3490 = vmatprep.subr.mxu1 %v5731_v47  ;;  %v7223_v36 = vld [vmem:[#allocation47_spill] sm:$0xff]  ;;  %v7224_v47 = vld [vmem:[#allocation49_spill] sm:$0xff] }
 0xaad   :  { %3420 = vmatpush1.msra.mxu0 %v5735_v48  ;;  %3491 = vmatpush1.msra.mxu1 %v5737_v49  ;;  %v7225_v48 = vld [vmem:[#allocation48_spill] sm:$0xff]  ;;  %v7226_v49 = vld [vmem:[#allocation50_spill] sm:$0xff] }
 0xaae   :  { %3421 = vmatprep.subr.mxu0 %v5741_v50  ;;  %3492 = vmatprep.subr.mxu1 %v5743_v51  ;;  %v7227_v50 = vld [vmem:[#allocation19_spill] sm:$0xff]  ;;  %v7228_v51 = vld [vmem:[#allocation20_spill] sm:$0xff] }
 0xaaf   :  { %3422 = vmatpush1.msra.mxu0 %v5747_v52  ;;  %3493 = vmatpush1.msra.mxu1 %v5749_v54  ;;  %v7229_v52 = vld [vmem:[#allocation51_spill] sm:$0xff]  ;;  %v7230_v54 = vld [vmem:[#allocation53_spill] sm:$0xff] }
 0xab0   :  { %3423 = vmatprep.subr.mxu0 %v5753_v55  ;;  %3494 = vmatprep.subr.mxu1 %v5755_v56  ;;  %v7231_v55 = vld [vmem:[#allocation52_spill] sm:$0xff]  ;;  %v7232_v56 = vld [vmem:[#allocation54_spill] sm:$0xff] }
 0xab1   :  { %3424 = vmatpush1.msra.mxu0 %v5759_v57  ;;  %3495 = vmatpush1.msra.mxu1 %v5761_v58  ;;  %v7233_v57 = vld [vmem:[#allocation21_spill] sm:$0xff]  ;;  %v7234_v58 = vld [vmem:[#allocation22_spill] sm:$0xff] }
 0xab2   :  { %3425 = vmatprep.subr.mxu0 %v5765_v6  ;;  %3496 = vmatprep.subr.mxu1 %v5767_v15  ;;  %v7235_v6 = vld [vmem:[#allocation23_spill] sm:$0xff]  ;;  %v7236_v15 = vld [vmem:[#allocation24_spill] sm:$0xff] }
 0xab3   :  { %3426 = vmatpush1.msra.mxu0 %v5771_v0  ;;  %3497 = vmatpush1.msra.mxu1 %v5773_v3  ;;  %v7237_v0 = vld [vmem:[#allocation25_spill] sm:$0xff]  ;;  %v7238_v3 = vld [vmem:[#allocation26_spill] sm:$0xff] }
 0xab4   :  { %3427 = vmatprep.subr.mxu0 %v5777_v61  ;;  %3498 = vmatprep.subr.mxu1 %v5779_v11  ;;  %v7239_v61 = vld [vmem:[#allocation27_spill] sm:$0xff]  ;;  %v7240_v11 = vld [vmem:[#allocation28_spill] sm:$0xff] }
 0xab5   :  { %3428 = vmatpush1.msra.mxu0 %v5783_v1  ;;  %3499 = vmatpush1.msra.mxu1 %v5785_v42  ;;  %v7241_v1 = vmov 0.0   ;;  %v7242_v42 = vld [vmem:[#allocation29_spill] sm:$0xff] }
 0xab6   :  { %3429 = vmatprep.subr.mxu0 %v5787_v13  ;;  %3500 = vmatprep.subr.mxu1 %v5791_v26  ;;  %v6288_v13 = vld [vmem:[#allocation10 + $0x1e8] sm:$0xff]  ;;  %v6291_v26 = vld [vmem:[#allocation10 + $0x1f8] sm:$0xff] }
 0xab7   :  { %3430 = vmatpush1.msra.mxu0 %v5793_v16  ;;  %3501 = vmatpush1.msra.mxu1 %v5795_v44  ;;  %7243 = vst [vmem:[#allocation30_spill] sm:$0xff] %v6288_v13  ;;  %7244 = vst [vmem:[#allocation32_spill] sm:$0xff] %v6291_v26  ;;  %v7245_v16 = vld [vmem:[#allocation64_spill] sm:$0xff]  ;;  %v7246_v44 = vld [vmem:[#allocation38_spill] sm:$0xff] }
 0xab8   :  { %3431 = vmatprep.subr.mxu0 %v5801_v14  ;;  %3502 = vmatprep.subr.mxu1 %v5803_v10  ;;  %v2504_v14 = vadd.f32 %v7246_v44, %v7245_v16  ;;  %v6375_v44 = vld [vmem:[#allocation10 + $0x138] sm:$0xff] }
 0xab9   :  { %3432 = vmatpush1.msra.mxu0 %v5807_v17  ;;  %3503 = vmatpush1.msra.mxu1 %v5809_v53  ;;  %v7247_v17 = vld [vmem:[#allocation68_spill] sm:$0xff]  ;;  %v7248_v53 = vld [vmem:[#allocation55_spill] sm:$0xff] }
 0xaba   :  { %3433 = vmatprep.subr.mxu0 %v5813_v2  ;;  %3504 = vmatprep.subr.mxu1 %v5815_v60  ;;  %v2506_v2 = vadd.f32 %v7248_v53, %v7247_v17  ;;  %v6384_v53 = vld [vmem:[#allocation10 + $0x108] sm:$0xff] }
 0xabb   :  { %3434 = vmatpush1.msra.mxu0 %v5819_v9  ;;  %3505 = vmatpush1.msra.mxu1 %v5821_v8 }
 0xabc   :  { %3435 = vmatprep.subr.mxu0 %v5825_v4  ;;  %3506 = vmatprep.subr.mxu1 %v5827_v7  ;;  %v7249_v4 = vld [vmem:[#allocation41_spill] sm:$0xff] }
 0xabd   :  { %3436 = vmatpush1.msra.mxu0 %v5831_v62  ;;  %3507 = vmatpush1.msra.mxu1 %v5833_v35  ;;  %v2617_v7 = vadd.f32 %v7249_v4, %v6056_v22  ;;  %v6399_v4 = vld [vmem:[#allocation10 + $0xf8] sm:$0xff] }
 0xabe   :  { %3437 = vmatprep.subr.mxu0 %v5837_v19  ;;  %3508 = vmatprep.subr.mxu1 %v5839_v12 }
 0xabf   :  { %3438 = vmatpush1.msra.mxu0 %v5843_v18  ;;  %3509 = vmatpush1.msra.mxu1 %v7221_v63  ;;  %v6309_v63 = vld [vmem:[#allocation10 + $0x1f0] sm:$0xff] }
 0xac0   :  { %3439 = vmatprep.subr.mxu0 %v7222_v46  ;;  %3510 = vmatprep.subr.mxu1 %v7223_v36  ;;  %v6315_v46 = vld [vmem:[#allocation10 + $0x1d8] sm:$0xff]  ;;  %v6318_v36 = vld [vmem:[#allocation10 + $0x1c0] sm:$0xff] }
 0xac1   :  { %3440 = vmatpush1.msra.mxu0 %v7224_v47  ;;  %3511 = vmatpush1.msra.mxu1 %v7225_v48  ;;  %v6321_v47 = vld [vmem:[#allocation10 + $0x1d0] sm:$0xff]  ;;  %v6324_v48 = vld [vmem:[#allocation10 + $0x1a8] sm:$0xff] }
 0xac2   :  { %3441 = vmatprep.subr.mxu0 %v7226_v49  ;;  %3512 = vmatprep.subr.mxu1 %v7227_v50  ;;  %v6327_v49 = vld [vmem:[#allocation10 + $0x1b8] sm:$0xff]  ;;  %v6330_v50 = vld [vmem:[#allocation10 + $0x1a0] sm:$0xff] }
 0xac3   :  { %3442 = vmatpush1.msra.mxu0 %v7228_v51  ;;  %3513 = vmatpush1.msra.mxu1 %v7229_v52  ;;  %v6333_v51 = vld [vmem:[#allocation10 + $0x1b0] sm:$0xff]  ;;  %v6336_v52 = vld [vmem:[#allocation10 + $0x188] sm:$0xff] }
 0xac4   :  { %3443 = vmatprep.subr.mxu0 %v7230_v54  ;;  %3514 = vmatprep.subr.mxu1 %v7231_v55  ;;  %v6339_v54 = vld [vmem:[#allocation10 + $0x198] sm:$0xff]  ;;  %v6342_v55 = vld [vmem:[#allocation10 + $0x180] sm:$0xff] }
 0xac5   :  { %3444 = vmatpush1.msra.mxu0 %v7232_v56  ;;  %3515 = vmatpush1.msra.mxu1 %v7233_v57  ;;  %v6345_v56 = vld [vmem:[#allocation10 + $0x190] sm:$0xff]  ;;  %v6348_v57 = vld [vmem:[#allocation10 + $0x168] sm:$0xff] }
 0xac6   :  { %3445 = vmatprep.subr.mxu0 %v7234_v58  ;;  %3516 = vmatprep.subr.mxu1 %v7235_v6  ;;  %v6351_v58 = vld [vmem:[#allocation10 + $0x178] sm:$0xff]  ;;  %v6354_v6 = vld [vmem:[#allocation10 + $0x160] sm:$0xff] }
 0xac7   :  { %3446 = vmatpush1.msra.mxu0 %v7236_v15  ;;  %3517 = vmatpush1.msra.mxu1 %v7237_v0  ;;  %v6357_v15 = vld [vmem:[#allocation10 + $0x170] sm:$0xff]  ;;  %v6360_v0 = vld [vmem:[#allocation10 + $0x148] sm:$0xff] }
 0xac8   :  { %3447 = vmatprep.subr.mxu0 %v7238_v3  ;;  %3518 = vmatprep.subr.mxu1 %v7239_v61  ;;  %v6363_v3 = vld [vmem:[#allocation10 + $0x158] sm:$0xff]  ;;  %v6366_v61 = vld [vmem:[#allocation10 + $0x140] sm:$0xff] }
 0xac9   :  { %3448 = vmatpush1.msra.mxu0 %v7240_v11  ;;  %3481 = vmatprep.mubr.f32.mxu0 %v7241_v1  ;;  %v6369_v11 = vld [vmem:[#allocation10 + $0x150] sm:$0xff] }
 0xaca   :  { %3519 = vmatpush1.msra.mxu1 %v7242_v42  ;;  %3552 = vmatprep.mubr.f32.mxu1 %v7241_v1  ;;  %v6372_v42 = vld [vmem:[#allocation10 + $0x128] sm:$0xff] }
 0xacb   :  { %3585 = vmatprep.subr.mxu0 %v6288_v13  ;;  %3656 = vmatprep.subr.mxu1 %v6291_v26 }
 0xb6a   :  { %v3315_v10 = vpop.f32.mrf.mxu0  ;;  %v3386_v9 = vpop.f32.mrf.mxu1 }
 0xb6b   :  { %v3391_v60 = vadd.f32 %v3315_v10, %v2504_v14  ;;  %v3393_v19 = vadd.f32 %v3386_v9, %v2617_v7  ;;  %v6378_v14 = vld [vmem:[#allocation10 + $0x120] sm:$0xff]  ;;  %v6381_v10 = vld [vmem:[#allocation10 + $0x130] sm:$0xff] }
 0xb6c   :  { %v3317_v8 = vpop.f32.mrf.mxu0  ;;  %v3388_v18 = vpop.f32.mrf.mxu1  ;;  %v6393_v9 = vld [vmem:[#allocation10 + $0x110] sm:$0xff]  ;;  %v6402_v7 = vld [vmem:[#allocation10 + $0xe0] sm:$0xff] }
 0xb6d   :  { %v3395_v62 = vmul.f32 0.5, %v3391_v60  ;;  %v3392_v35 = vadd.f32 %v3317_v8, %v2506_v2  ;;  %v3394_v27 = vadd.f32 %v3388_v18, %v2619_v20  ;;  %v6387_v2 = vld [vmem:[#allocation10 + $0x118] sm:$0xff]  ;;  %v6390_v60 = vld [vmem:[#allocation10 + $0x100] sm:$0xff]  ;;  %v6396_v8 = vld [vmem:[#allocation10 + $0xe8] sm:$0xff] }
 0xb6e   :  { %v6417_v18 = vld [vmem:[#allocation10 + $0xd0] sm:$0xff]  ;;  %v6423_v20 = vld [vmem:[#allocation10 + $0xb8] sm:$0xff] }
 0xb6f   :  { %4394 = vtanh.f32 %v3395_v62  ;;  %v3399_v12 = vmul.f32 0.5, %v3392_v35  ;;  %v3404_v33 = vmul.f32 0.5, %v3394_v27  ;;  %v6405_v62 = vld [vmem:[#allocation10 + $0xf0] sm:$0xff]  ;;  %v6408_v35 = vld [vmem:[#allocation10 + $0xc8] sm:$0xff]  ;;  %v6426_v27 = vld [vmem:[#allocation10 + $0xa0] sm:$0xff] }
 0xb71   :  { %4396 = vtanh.f32 %v3399_v12  ;;  %v6414_v12 = vld [vmem:[#allocation10 + $0xc0] sm:$0xff] }
 0xb72   :  { %4398 = vtanh.f32 %v3393_v19  ;;  %v6411_v19 = vld [vmem:[#allocation10 + $0xd8] sm:$0xff] }
 0xb73   :  { %4400 = vtanh.f32 %v3404_v33  ;;  %v6429_v33 = vld [vmem:[#allocation10 + $0xb0] sm:$0xff] }
 0xb74   :  { %7251 = vst [vmem:[#allocation31_spill] sm:$0xff] %v6429_v33 }
 0xb7c   :  { %v4395_v37 = vpop.eup %4394 }
 0xb7d   :  { %v3397_v23 = vmul.f32 0.5, %v4395_v37  ;;  %v6432_v37 = vld [vmem:[#allocation10 + $0x88] sm:$0xff] }
 0xb7e   :  { %v4397_v31 = vpop.eup %4396  ;;  %7252 = vst [vmem:[#allocation33_spill] sm:$0xff] %v6432_v37 }
 0xb7f   :  { %v3398_v24 = vadd.f32 0.5, %v3397_v23  ;;  %v3401_v34 = vmul.f32 0.5, %v4397_v31  ;;  %v4399_v40 = vpop.eup %4398  ;;  %v6435_v23 = vld [vmem:[#allocation10 + $0x98] sm:$0xff]  ;;  %v6438_v31 = vld [vmem:[#allocation10 + $0x80] sm:$0xff] }
 0xb80   :  { %v4401_v5 = vpop.eup %4400  ;;  %7253 = vst [vmem:[#allocation43_spill] sm:$0xff] %v6435_v23  ;;  %7254 = vst [vmem:[#allocation45_spill] sm:$0xff] %v6438_v31 }
 0xb81   :  { %v3402_v21 = vadd.f32 0.5, %v3401_v34  ;;  %v3409_v38 = vmul.f32 %v4399_v40, %v3398_v24  ;;  %v3406_v29 = vmul.f32 0.5, %v4401_v5  ;;  %v6441_v24 = vld [vmem:[#allocation10 + $0x90] sm:$0xff]  ;;  %v6444_v34 = vld [vmem:[#allocation10 + $0x68] sm:$0xff]  ;;  %v6447_v40 = vld [vmem:[#allocation10 + $0x78] sm:$0xff] }
 0xb82   :  { %7255 = vst [vmem:[#allocation34_spill] sm:$0xff] %v6441_v24  ;;  %7256 = vst [vmem:[#allocation36_spill] sm:$0xff] %v6444_v34  ;;  %v6459_v5 = vld [vmem:[#allocation10 + $0x58] sm:$0xff] }
 0xb83   :  { %v3408_v45 = vmul.f32 %v3402_v21, %v6221_v30  ;;  %v3407_v32 = vadd.f32 0.5, %v3406_v29  ;;  %v6312_v30 = vld [vmem:[#allocation10 + $0x1c8] sm:$0xff]  ;;  %7257 = vst [vmem:[#allocation35_spill] sm:$0xff] %v6447_v40  ;;  %v6450_v21 = vld [vmem:[#allocation10 + $0x60] sm:$0xff]  ;;  %7261 = vst [vmem:[#allocation47_spill] sm:$0xff] %v6459_v5 }
 0xb84   :  { %7258 = vst [vmem:[#allocation37_spill] sm:$0xff] %v6450_v21  ;;  %v6462_v29 = vld [vmem:[#allocation10 + $0x40] sm:$0xff] }
 0xb85   :  { %v6303_v59 = vadd.f32 %v3409_v38, %v3408_v45  ;;  %v6453_v38 = vld [vmem:[#allocation10 + $0x70] sm:$0xff]  ;;  %v6456_v45 = vld [vmem:[#allocation10 + $0x48] sm:$0xff]  ;;  %7262 = vst [vmem:[#allocation49_spill] sm:$0xff] %v6462_v29 }
 0xb86   :  { %7259 = vst [vmem:[#allocation44_spill] sm:$0xff] %v6453_v38  ;;  %7260 = vst [vmem:[#allocation46_spill] sm:$0xff] %v6456_v45 }
 0xb87   :  { %4402 = vtanh.f32 %v6303_v59 }
 0xb94   :  { %v4403_v25 = vpop.eup %4402 }
 0xb95   :  { %v3412_v28 = vmul.f32 %v4403_v25, %v3407_v32  ;;  %v6465_v32 = vld [vmem:[#allocation10 + $0x50] sm:$0xff]  ;;  %v6468_v25 = vld [vmem:[#allocation10 + $0x28] sm:$0xff] }
 0xb96   :  { %7263 = vst [vmem:[#allocation48_spill] sm:$0xff] %v6465_v32  ;;  %7264 = vst [vmem:[#allocation50_spill] sm:$0xff] %v6468_v25 }
 0xb97   :  { %3482 = vmatmul.mubr.f32.vlgmr.msra.gmra.mxu0 %v3412_v28  ;;  %3553 = vmatmul.mubr.f32.vlgmr.msra.gmra.mxu1 %v3412_v28  ;;  %v6471_v28 = vld [vmem:[#allocation10 + $0x38] sm:$0xff] }
 0xb98   :  { %3586 = vmatpush1.msra.mxu0 %v6306_v41  ;;  %3657 = vmatpush1.msra.mxu1 %v6309_v63  ;;  %7265 = vst [vmem:[#allocation19_spill] sm:$0xff] %v6471_v28 }
 0xb99   :  { %3587 = vmatprep.subr.mxu0 %v6312_v30  ;;  %3658 = vmatprep.subr.mxu1 %v6315_v46 }
 0xb9a   :  { %3588 = vmatpush1.msra.mxu0 %v6318_v36  ;;  %3659 = vmatpush1.msra.mxu1 %v6321_v47 }
 0xb9b   :  { %3589 = vmatprep.subr.mxu0 %v6324_v48  ;;  %3660 = vmatprep.subr.mxu1 %v6327_v49 }
 0xb9c   :  { %3590 = vmatpush1.msra.mxu0 %v6330_v50  ;;  %3661 = vmatpush1.msra.mxu1 %v6333_v51 }
 0xb9d   :  { %3591 = vmatprep.subr.mxu0 %v6336_v52  ;;  %3662 = vmatprep.subr.mxu1 %v6339_v54 }
 0xb9e   :  { %3592 = vmatpush1.msra.mxu0 %v6342_v55  ;;  %3663 = vmatpush1.msra.mxu1 %v6345_v56 }
 0xb9f   :  { %3593 = vmatprep.subr.mxu0 %v6348_v57  ;;  %3664 = vmatprep.subr.mxu1 %v6351_v58 }
 0xba0   :  { %3594 = vmatpush1.msra.mxu0 %v6354_v6  ;;  %3665 = vmatpush1.msra.mxu1 %v6357_v15 }
 0xba1   :  { %3595 = vmatprep.subr.mxu0 %v6360_v0  ;;  %3666 = vmatprep.subr.mxu1 %v6363_v3 }
 0xba2   :  { %3596 = vmatpush1.msra.mxu0 %v6366_v61  ;;  %3667 = vmatpush1.msra.mxu1 %v6369_v11 }
 0xba3   :  { %3597 = vmatprep.subr.mxu0 %v6372_v42  ;;  %3668 = vmatprep.subr.mxu1 %v6375_v44 }
 0xba4   :  { %3598 = vmatpush1.msra.mxu0 %v6378_v14  ;;  %3669 = vmatpush1.msra.mxu1 %v6381_v10 }
 0xba5   :  { %3599 = vmatprep.subr.mxu0 %v6384_v53  ;;  %3670 = vmatprep.subr.mxu1 %v6387_v2 }
 0xba6   :  { %3600 = vmatpush1.msra.mxu0 %v6390_v60  ;;  %3671 = vmatpush1.msra.mxu1 %v6393_v9 }
 0xba7   :  { %3601 = vmatprep.subr.mxu0 %v6396_v8  ;;  %3672 = vmatprep.subr.mxu1 %v6399_v4 }
 0xba8   :  { %3602 = vmatpush1.msra.mxu0 %v6402_v7  ;;  %3673 = vmatpush1.msra.mxu1 %v6405_v62 }
 0xba9   :  { %3603 = vmatprep.subr.mxu0 %v6408_v35  ;;  %3674 = vmatprep.subr.mxu1 %v6411_v19 }
 0xbaa   :  { %3604 = vmatpush1.msra.mxu0 %v6414_v12  ;;  %3675 = vmatpush1.msra.mxu1 %v6417_v18 }
 0xbab   :  { %3605 = vmatprep.subr.mxu0 %v6420_v39  ;;  %3676 = vmatprep.subr.mxu1 %v6423_v20 }
 0xbac   :  { %3606 = vmatpush1.msra.mxu0 %v6426_v27  ;;  %3677 = vmatpush1.msra.mxu1 %v6429_v33 }
 0xbad   :  { %3607 = vmatprep.subr.mxu0 %v6432_v37  ;;  %3678 = vmatprep.subr.mxu1 %v6435_v23 }
 0xbae   :  { %3608 = vmatpush1.msra.mxu0 %v6438_v31  ;;  %3679 = vmatpush1.msra.mxu1 %v6441_v24 }
 0xbaf   :  { %3609 = vmatprep.subr.mxu0 %v6444_v34  ;;  %3680 = vmatprep.subr.mxu1 %v6447_v40  ;;  %v7274_v34 = vld [vmem:[#allocation58_spill] sm:$0xff] }
 0xbb0   :  { %3610 = vmatpush1.msra.mxu0 %v6450_v21  ;;  %3681 = vmatpush1.msra.mxu1 %v6453_v38  ;;  %v2623_v24 = vadd.f32 %v7274_v34, %v6056_v22 }
 0xbb1   :  { %3611 = vmatprep.subr.mxu0 %v6456_v45  ;;  %3682 = vmatprep.subr.mxu1 %v6459_v5  ;;  %v6474_v45 = vld [vmem:[#allocation10 + $0x20] sm:$0xff]  ;;  %v6477_v5 = vld [vmem:[#allocation10 + $0x30] sm:$0xff] }
 0xbb2   :  { %3612 = vmatpush1.msra.mxu0 %v6462_v29  ;;  %3683 = vmatpush1.msra.mxu1 %v6465_v32  ;;  %7266 = vst [vmem:[#allocation20_spill] sm:$0xff] %v6474_v45  ;;  %7267 = vst [vmem:[#allocation51_spill] sm:$0xff] %v6477_v5  ;;  %v6480_v29 = vld [vmem:[#allocation10 + $0x8] sm:$0xff]  ;;  %v6483_v32 = vld [vmem:[#allocation10 + $0x18] sm:$0xff] }
 0xbb3   :  { %3613 = vmatprep.subr.mxu0 %v6468_v25  ;;  %3684 = vmatprep.subr.mxu1 %v6471_v28  ;;  %7268 = vst [vmem:[#allocation53_spill] sm:$0xff] %v6480_v29  ;;  %7269 = vst [vmem:[#allocation52_spill] sm:$0xff] %v6483_v32  ;;  %v6486_v25 = vld [vmem:[#allocation10] sm:$0xff]  ;;  %v6490_v28 = vld [vmem:[#allocation10 + $0x10] sm:$0xff] }
 0xbb4   :  { %3614 = vmatpush1.msra.mxu0 %v6474_v45  ;;  %3685 = vmatpush1.msra.mxu1 %v6477_v5  ;;  %7270 = vst [vmem:[#allocation54_spill] sm:$0xff] %v6486_v25  ;;  %7271 = vst [vmem:[#allocation21_spill] sm:$0xff] %v6490_v28  ;;  %v7273_v45 = vld [vmem:[#allocation59_spill] sm:$0xff] }
 0xbb5   :  { %3615 = vmatprep.subr.mxu0 %v6480_v29  ;;  %3686 = vmatprep.subr.mxu1 %v6483_v32  ;;  %v7272_v29 = vld [vmem:[#allocation56_spill] sm:$0xff]  ;;  %v2512_v38 = vadd.f32 %v7273_v45, %v7247_v17 }
 0xbb6   :  { %3616 = vmatpush1.msra.mxu0 %v6486_v25  ;;  %3649 = vmatprep.mubr.f32.mxu0 %v7241_v1  ;;  %v2510_v5 = vadd.f32 %v7272_v29, %v7245_v16  ;;  %v7275_v29 = vld [vmem:[#allocation61_spill] sm:$0xff] }
 0xbb7   :  { %3687 = vmatpush1.msra.mxu1 %v6490_v28  ;;  %3720 = vmatprep.mubr.f32.mxu1 %v7241_v1  ;;  %v2625_v16 = vadd.f32 %v7275_v29, %v6062_v43  ;;  %v7283_v29 = vld [vmem:[#allocation37_spill] sm:$0xff] }
 0xbb8   :  { %3753 = vmatprep.subr.mxu0 %v6288_v13  ;;  %3824 = vmatprep.subr.mxu1 %v6291_v26 }
 0xc57   :  { %v3483_v32 = vpop.f32.mrf.mxu0  ;;  %v3554_v21 = vpop.f32.mrf.mxu1 }
 0xc58   :  { %v3559_v25 = vadd.f32 %v3483_v32, %v2510_v5  ;;  %v3561_v1 = vadd.f32 %v3554_v21, %v2623_v24 }
 0xc59   :  { %v3485_v40 = vpop.f32.mrf.mxu0  ;;  %v3556_v26 = vpop.f32.mrf.mxu1 }
 0xc5a   :  { %v3563_v28 = vmul.f32 0.5, %v3559_v25  ;;  %v3560_v31 = vadd.f32 %v3485_v40, %v2512_v38  ;;  %v3562_v23 = vadd.f32 %v3556_v26, %v2625_v16  ;;  %v7281_v38 = vld [vmem:[#allocation36_spill] sm:$0xff] }
 0xc5c   :  { %4404 = vtanh.f32 %v3563_v28  ;;  %v3567_v13 = vmul.f32 0.5, %v3560_v31  ;;  %v3572_v37 = vmul.f32 0.5, %v3562_v23  ;;  %v7280_v23 = vld [vmem:[#allocation34_spill] sm:$0xff]  ;;  %v7282_v28 = vld [vmem:[#allocation35_spill] sm:$0xff] }
 0xc5e   :  { %4406 = vtanh.f32 %v3567_v13 }
 0xc5f   :  { %4408 = vtanh.f32 %v3561_v1 }
 0xc60   :  { %4410 = vtanh.f32 %v3572_v37  ;;  %v7279_v37 = vld [vmem:[#allocation45_spill] sm:$0xff] }
 0xc69   :  { %v4405_v45 = vpop.eup %4404 }
 0xc6a   :  { %v3565_v5 = vmul.f32 0.5, %v4405_v45  ;;  %v7284_v45 = vld [vmem:[#allocation44_spill] sm:$0xff] }
 0xc6b   :  { %v4407_v32 = vpop.eup %4406 }
 0xc6c   :  { %v3566_v17 = vadd.f32 0.5, %v3565_v5  ;;  %v3569_v33 = vmul.f32 0.5, %v4407_v32  ;;  %v4409_v34 = vpop.eup %4408  ;;  %v7285_v5 = vld [vmem:[#allocation46_spill] sm:$0xff]  ;;  %v7286_v32 = vld [vmem:[#allocation47_spill] sm:$0xff] }
 0xc6d   :  { %v4411_v1 = vpop.eup %4410 }
 0xc6e   :  { %v3570_v25 = vadd.f32 0.5, %v3569_v33  ;;  %v3577_v40 = vmul.f32 %v4409_v34, %v3566_v17  ;;  %v3574_v13 = vmul.f32 0.5, %v4411_v1  ;;  %v7276_v17 = vld [vmem:[#allocation31_spill] sm:$0xff]  ;;  %v7287_v34 = vld [vmem:[#allocation49_spill] sm:$0xff]  ;;  %v7291_v1 = vld [vmem:[#allocation20_spill] sm:$0xff] }
 0xc6f   :  { %v7278_v33 = vld [vmem:[#allocation43_spill] sm:$0xff] }
 0xc70   :  { %v3576_v24 = vmul.f32 %v3570_v25, %v6303_v59  ;;  %v3575_v21 = vadd.f32 0.5, %v3574_v13  ;;  %v7277_v59 = vld [vmem:[#allocation33_spill] sm:$0xff]  ;;  %v7288_v25 = vld [vmem:[#allocation48_spill] sm:$0xff]  ;;  %v7292_v13 = vld [vmem:[#allocation51_spill] sm:$0xff] }
 0xc72   :  { %v6505_v31 = vadd.f32 %v3577_v40, %v3576_v24  ;;  %v7289_v40 = vld [vmem:[#allocation50_spill] sm:$0xff]  ;;  %v7290_v24 = vld [vmem:[#allocation19_spill] sm:$0xff] }
 0xc74   :  { %4412 = vtanh.f32 %v6505_v31 }
 0xc81   :  { %v4413_v26 = vpop.eup %4412 }
 0xc82   :  { %v3580_v16 = vmul.f32 %v4413_v26, %v3575_v21  ;;  %v7293_v21 = vld [vmem:[#allocation53_spill] sm:$0xff]  ;;  %v7294_v26 = vld [vmem:[#allocation52_spill] sm:$0xff] }
 0xc84   :  { %3650 = vmatmul.mubr.f32.vlgmr.msra.gmra.mxu0 %v3580_v16  ;;  %3721 = vmatmul.mubr.f32.vlgmr.msra.gmra.mxu1 %v3580_v16  ;;  %v7295_v16 = vld [vmem:[#allocation54_spill] sm:$0xff] }
 0xc85   :  { %3754 = vmatpush1.msra.mxu0 %v6306_v41  ;;  %3825 = vmatpush1.msra.mxu1 %v6309_v63 }
 0xc86   :  { %3755 = vmatprep.subr.mxu0 %v6312_v30  ;;  %3826 = vmatprep.subr.mxu1 %v6315_v46 }
 0xc87   :  { %3756 = vmatpush1.msra.mxu0 %v6318_v36  ;;  %3827 = vmatpush1.msra.mxu1 %v6321_v47 }
 0xc88   :  { %3757 = vmatprep.subr.mxu0 %v6324_v48  ;;  %3828 = vmatprep.subr.mxu1 %v6327_v49 }
 0xc89   :  { %3758 = vmatpush1.msra.mxu0 %v6330_v50  ;;  %3829 = vmatpush1.msra.mxu1 %v6333_v51 }
 0xc8a   :  { %3759 = vmatprep.subr.mxu0 %v6336_v52  ;;  %3830 = vmatprep.subr.mxu1 %v6339_v54 }
 0xc8b   :  { %3760 = vmatpush1.msra.mxu0 %v6342_v55  ;;  %3831 = vmatpush1.msra.mxu1 %v6345_v56 }
 0xc8c   :  { %3761 = vmatprep.subr.mxu0 %v6348_v57  ;;  %3832 = vmatprep.subr.mxu1 %v6351_v58 }
 0xc8d   :  { %3762 = vmatpush1.msra.mxu0 %v6354_v6  ;;  %3833 = vmatpush1.msra.mxu1 %v6357_v15 }
 0xc8e   :  { %3763 = vmatprep.subr.mxu0 %v6360_v0  ;;  %3834 = vmatprep.subr.mxu1 %v6363_v3 }
 0xc8f   :  { %3764 = vmatpush1.msra.mxu0 %v6366_v61  ;;  %3835 = vmatpush1.msra.mxu1 %v6369_v11 }
 0xc90   :  { %3765 = vmatprep.subr.mxu0 %v6372_v42  ;;  %3836 = vmatprep.subr.mxu1 %v6375_v44 }
 0xc91   :  { %3766 = vmatpush1.msra.mxu0 %v6378_v14  ;;  %3837 = vmatpush1.msra.mxu1 %v6381_v10 }
 0xc92   :  { %3767 = vmatprep.subr.mxu0 %v6384_v53  ;;  %3838 = vmatprep.subr.mxu1 %v6387_v2 }
 0xc93   :  { %3768 = vmatpush1.msra.mxu0 %v6390_v60  ;;  %3839 = vmatpush1.msra.mxu1 %v6393_v9 }
 0xc94   :  { %3769 = vmatprep.subr.mxu0 %v6396_v8  ;;  %3840 = vmatprep.subr.mxu1 %v6399_v4 }
 0xc95   :  { %3770 = vmatpush1.msra.mxu0 %v6402_v7  ;;  %3841 = vmatpush1.msra.mxu1 %v6405_v62 }
 0xc96   :  { %3771 = vmatprep.subr.mxu0 %v6408_v35  ;;  %3842 = vmatprep.subr.mxu1 %v6411_v19 }
 0xc97   :  { %3772 = vmatpush1.msra.mxu0 %v6414_v12  ;;  %3843 = vmatpush1.msra.mxu1 %v6417_v18 }
 0xc98   :  { %3773 = vmatprep.subr.mxu0 %v6420_v39  ;;  %3844 = vmatprep.subr.mxu1 %v6423_v20 }
 0xc99   :  { %3774 = vmatpush1.msra.mxu0 %v6426_v27  ;;  %3845 = vmatpush1.msra.mxu1 %v7276_v17 }
 0xc9a   :  { %3775 = vmatprep.subr.mxu0 %v7277_v59  ;;  %3846 = vmatprep.subr.mxu1 %v7278_v33 }
 0xc9b   :  { %3776 = vmatpush1.msra.mxu0 %v7279_v37  ;;  %3847 = vmatpush1.msra.mxu1 %v7280_v23 }
 0xc9c   :  { %3777 = vmatprep.subr.mxu0 %v7281_v38  ;;  %3848 = vmatprep.subr.mxu1 %v7282_v28  ;;  %v7304_v38 = vld [vmem:[#allocation62_spill] sm:$0xff] }
 0xc9d   :  { %3778 = vmatpush1.msra.mxu0 %v7283_v29  ;;  %3849 = vmatpush1.msra.mxu1 %v7284_v45  ;;  %v7302_v45 = vld [vmem:[#allocation68_spill] sm:$0xff]  ;;  %v2629_v23 = vadd.f32 %v7304_v38, %v6056_v22 }
 0xc9e   :  { %3779 = vmatprep.subr.mxu0 %v7285_v5  ;;  %3850 = vmatprep.subr.mxu1 %v7286_v32  ;;  %v7296_v5 = vmov 0.0   ;;  %v7297_v32 = vld [vmem:[#allocation21_spill] sm:$0xff] }
 0xc9f   :  { %3780 = vmatpush1.msra.mxu0 %v7287_v34  ;;  %3851 = vmatpush1.msra.mxu1 %v7288_v25  ;;  %v7298_v25 = vld [vmem:[#allocation30_spill] sm:$0xff] }
 0xca0   :  { %3781 = vmatprep.subr.mxu0 %v7289_v40  ;;  %3852 = vmatprep.subr.mxu1 %v7290_v24  ;;  %v7299_v40 = vld [vmem:[#allocation32_spill] sm:$0xff] }
 0xca1   :  { %3782 = vmatpush1.msra.mxu0 %v7291_v1  ;;  %3853 = vmatpush1.msra.mxu1 %v7292_v13  ;;  %v7300_v24 = vld [vmem:[#allocation64_spill] sm:$0xff] }
 0xca2   :  { %3783 = vmatprep.subr.mxu0 %v7293_v21  ;;  %3854 = vmatprep.subr.mxu1 %v7294_v26  ;;  %v7301_v1 = vld [vmem:[#allocation60_spill] sm:$0xff]  ;;  %v7303_v21 = vld [vmem:[#allocation67_spill] sm:$0xff] }
 0xca3   :  { %3784 = vmatpush1.msra.mxu0 %v7295_v16  ;;  %3817 = vmatprep.mubr.f32.mxu0 %v7296_v5  ;;  %v2516_v34 = vadd.f32 %v7301_v1, %v7300_v24  ;;  %v2518_v29 = vadd.f32 %v7303_v21, %v7302_v45  ;;  %v7305_v1 = vld [vmem:[#allocation18_spill] sm:$0xff] }
 0xca4   :  { %3855 = vmatpush1.msra.mxu1 %v7297_v32  ;;  %3888 = vmatprep.mubr.f32.mxu1 %v7296_v5  ;;  %v2631_v24 = vadd.f32 %v7305_v1, %v6062_v43 }
 0xca5   :  { %3921 = vmatprep.subr.mxu0 %v7298_v25  ;;  %3992 = vmatprep.subr.mxu1 %v7299_v40 }
 0xd44   :  { %v3651_v13 = vpop.f32.mrf.mxu0  ;;  %v3722_v28 = vpop.f32.mrf.mxu1 }
 0xd45   :  { %v3727_v26 = vadd.f32 %v3651_v13, %v2516_v34  ;;  %v3729_v5 = vadd.f32 %v3722_v28, %v2629_v23 }
 0xd46   :  { %v3653_v16 = vpop.f32.mrf.mxu0  ;;  %v3724_v40 = vpop.f32.mrf.mxu1 }
 0xd47   :  { %v3731_v32 = vmul.f32 0.5, %v3727_v26  ;;  %v3728_v37 = vadd.f32 %v3653_v16, %v2518_v29  ;;  %v3730_v33 = vadd.f32 %v3724_v40, %v2631_v24 }
 0xd49   :  { %4414 = vtanh.f32 %v3731_v32  ;;  %v3735_v25 = vmul.f32 0.5, %v3728_v37  ;;  %v3740_v59 = vmul.f32 0.5, %v3730_v33 }
 0xd4b   :  { %4416 = vtanh.f32 %v3735_v25 }
 0xd4c   :  { %4418 = vtanh.f32 %v3729_v5 }
 0xd4d   :  { %4420 = vtanh.f32 %v3740_v59 }
 0xd56   :  { %v4415_v21 = vpop.eup %4414 }
 0xd57   :  { %v3733_v34 = vmul.f32 0.5, %v4415_v21 }
 0xd58   :  { %v4417_v13 = vpop.eup %4416 }
 0xd59   :  { %v3734_v45 = vadd.f32 0.5, %v3733_v34  ;;  %v3737_v17 = vmul.f32 0.5, %v4417_v13  ;;  %v4419_v38 = vpop.eup %4418 }
 0xd5a   :  { %v4421_v28 = vpop.eup %4420 }
 0xd5b   :  { %v3738_v26 = vadd.f32 0.5, %v3737_v17  ;;  %v3745_v29 = vmul.f32 %v4419_v38, %v3734_v45  ;;  %v3742_v5 = vmul.f32 0.5, %v4421_v28 }
 0xd5d   :  { %v3744_v23 = vmul.f32 %v3738_v26, %v6505_v31  ;;  %v3743_v32 = vadd.f32 0.5, %v3742_v5 }
 0xd5f   :  { %v6583_v37 = vadd.f32 %v3745_v29, %v3744_v23 }
 0xd61   :  { %4422 = vtanh.f32 %v6583_v37 }
 0xd6e   :  { %v4423_v24 = vpop.eup %4422 }
 0xd6f   :  { %v3748_v33 = vmul.f32 %v4423_v24, %v3743_v32  ;;  %v4100_v32 = vld [vmem:[#allocation12 + $0x78] sm:$0xff]  ;;  %v4099_v24 = vld [vmem:[#allocation12 + $0x70] sm:$0xff] }
 0xd71   :  { %3818 = vmatmul.mubr.f32.vlgmr.msra.gmra.mxu0 %v3748_v33  ;;  %3889 = vmatmul.mubr.f32.vlgmr.msra.gmra.mxu1 %v3748_v33  ;;  %v4097_v33 = vld [vmem:[#allocation12 + $0x60] sm:$0xff] }
 0xd72   :  { %3922 = vmatpush1.msra.mxu0 %v6306_v41  ;;  %3993 = vmatpush1.msra.mxu1 %v6309_v63  ;;  %v7306_v41 = vld [vmem:[#allocation31_spill] sm:$0xff]  ;;  %v7307_v63 = vld [vmem:[#allocation33_spill] sm:$0xff] }
 0xd73   :  { %3923 = vmatprep.subr.mxu0 %v6312_v30  ;;  %3994 = vmatprep.subr.mxu1 %v6315_v46  ;;  %v7308_v30 = vld [vmem:[#allocation43_spill] sm:$0xff]  ;;  %v7309_v46 = vld [vmem:[#allocation45_spill] sm:$0xff] }
 0xd74   :  { %3924 = vmatpush1.msra.mxu0 %v6318_v36  ;;  %3995 = vmatpush1.msra.mxu1 %v6321_v47  ;;  %v7310_v36 = vld [vmem:[#allocation34_spill] sm:$0xff]  ;;  %v7311_v47 = vld [vmem:[#allocation36_spill] sm:$0xff] }
 0xd75   :  { %3925 = vmatprep.subr.mxu0 %v6324_v48  ;;  %3996 = vmatprep.subr.mxu1 %v6327_v49  ;;  %v7312_v48 = vld [vmem:[#allocation35_spill] sm:$0xff]  ;;  %v7313_v49 = vld [vmem:[#allocation37_spill] sm:$0xff] }
 0xd76   :  { %3926 = vmatpush1.msra.mxu0 %v6330_v50  ;;  %3997 = vmatpush1.msra.mxu1 %v6333_v51  ;;  %v7314_v50 = vld [vmem:[#allocation44_spill] sm:$0xff]  ;;  %v7315_v51 = vld [vmem:[#allocation46_spill] sm:$0xff] }
 0xd77   :  { %3927 = vmatprep.subr.mxu0 %v6336_v52  ;;  %3998 = vmatprep.subr.mxu1 %v6339_v54  ;;  %v7316_v52 = vld [vmem:[#allocation47_spill] sm:$0xff]  ;;  %v7317_v54 = vld [vmem:[#allocation49_spill] sm:$0xff] }
 0xd78   :  { %3928 = vmatpush1.msra.mxu0 %v6342_v55  ;;  %3999 = vmatpush1.msra.mxu1 %v6345_v56  ;;  %v7318_v55 = vld [vmem:[#allocation48_spill] sm:$0xff]  ;;  %v7319_v56 = vld [vmem:[#allocation50_spill] sm:$0xff] }
 0xd79   :  { %3929 = vmatprep.subr.mxu0 %v6348_v57  ;;  %4000 = vmatprep.subr.mxu1 %v6351_v58  ;;  %v7320_v57 = vld [vmem:[#allocation19_spill] sm:$0xff]  ;;  %v7321_v58 = vld [vmem:[#allocation20_spill] sm:$0xff] }
 0xd7a   :  { %3930 = vmatpush1.msra.mxu0 %v6354_v6  ;;  %4001 = vmatpush1.msra.mxu1 %v6357_v15  ;;  %v7322_v6 = vld [vmem:[#allocation51_spill] sm:$0xff]  ;;  %v7323_v15 = vld [vmem:[#allocation53_spill] sm:$0xff] }
 0xd7b   :  { %3931 = vmatprep.subr.mxu0 %v6360_v0  ;;  %4002 = vmatprep.subr.mxu1 %v6363_v3  ;;  %v7324_v0 = vld [vmem:[#allocation52_spill] sm:$0xff]  ;;  %v7325_v3 = vld [vmem:[#allocation54_spill] sm:$0xff] }
 0xd7c   :  { %3932 = vmatpush1.msra.mxu0 %v6366_v61  ;;  %4003 = vmatpush1.msra.mxu1 %v6369_v11  ;;  %v7326_v61 = vmov 0.0   ;;  %v7327_v11 = vld [vmem:[#allocation21_spill] sm:$0xff] }
 0xd7d   :  { %3933 = vmatprep.subr.mxu0 %v6372_v42  ;;  %4004 = vmatprep.subr.mxu1 %v6375_v44  ;;  %v7328_v42 = vld [vmem:[#allocation64_spill] sm:$0xff] }
 0xd7e   :  { %3934 = vmatpush1.msra.mxu0 %v6378_v14  ;;  %4005 = vmatpush1.msra.mxu1 %v6381_v10  ;;  %v7329_v44 = vld [vmem:[#allocation40_spill] sm:$0xff] }
 0xd7f   :  { %3935 = vmatprep.subr.mxu0 %v6384_v53  ;;  %4006 = vmatprep.subr.mxu1 %v6387_v2  ;;  %v2522_v14 = vadd.f32 %v7329_v44, %v7328_v42  ;;  %v7330_v53 = vld [vmem:[#allocation68_spill] sm:$0xff]  ;;  %v7331_v2 = vld [vmem:[#allocation63_spill] sm:$0xff] }
 0xd80   :  { %3936 = vmatpush1.msra.mxu0 %v6390_v60  ;;  %4007 = vmatpush1.msra.mxu1 %v6393_v9  ;;  %v2524_v60 = vadd.f32 %v7331_v2, %v7330_v53 }
 0xd81   :  { %3937 = vmatprep.subr.mxu0 %v6396_v8  ;;  %4008 = vmatprep.subr.mxu1 %v6399_v4 }
 0xd82   :  { %3938 = vmatpush1.msra.mxu0 %v6402_v7  ;;  %4009 = vmatpush1.msra.mxu1 %v6405_v62  ;;  %v7332_v7 = vld [vmem:[#allocation42_spill] sm:$0xff] }
 0xd83   :  { %3939 = vmatprep.subr.mxu0 %v6408_v35  ;;  %4010 = vmatprep.subr.mxu1 %v6411_v19  ;;  %v2635_v62 = vadd.f32 %v7332_v7, %v6056_v22 }
 0xd84   :  { %3940 = vmatpush1.msra.mxu0 %v6414_v12  ;;  %4011 = vmatpush1.msra.mxu1 %v6417_v18 }
 0xd85   :  { %3941 = vmatprep.subr.mxu0 %v6420_v39  ;;  %4012 = vmatprep.subr.mxu1 %v6423_v20  ;;  %v7333_v20 = vld [vmem:[#allocation65_spill] sm:$0xff] }
 0xd86   :  { %3942 = vmatpush1.msra.mxu0 %v6426_v27  ;;  %4013 = vmatpush1.msra.mxu1 %v7306_v41  ;;  %v2637_v27 = vadd.f32 %v7333_v20, %v6062_v43  ;;  %v4096_v41 = vld [vmem:[#allocation12 + $0x58] sm:$0xff] }
 0xd87   :  { %3943 = vmatprep.subr.mxu0 %v7307_v63  ;;  %4014 = vmatprep.subr.mxu1 %v7308_v30  ;;  %v4095_v63 = vld [vmem:[#allocation12 + $0x50] sm:$0xff]  ;;  %v4094_v30 = vld [vmem:[#allocation12 + $0x48] sm:$0xff] }
 0xd88   :  { %3944 = vmatpush1.msra.mxu0 %v7309_v46  ;;  %4015 = vmatpush1.msra.mxu1 %v7310_v36  ;;  %v4093_v46 = vld [vmem:[#allocation12 + $0x40] sm:$0xff]  ;;  %v4092_v36 = vld [vmem:[#allocation12 + $0x38] sm:$0xff] }
 0xd89   :  { %3945 = vmatprep.subr.mxu0 %v7311_v47  ;;  %4016 = vmatprep.subr.mxu1 %v7312_v48  ;;  %v4091_v47 = vld [vmem:[#allocation12 + $0x30] sm:$0xff]  ;;  %v4090_v48 = vld [vmem:[#allocation12 + $0x28] sm:$0xff] }
 0xd8a   :  { %3946 = vmatpush1.msra.mxu0 %v7313_v49  ;;  %4017 = vmatpush1.msra.mxu1 %v7314_v50  ;;  %v4089_v49 = vld [vmem:[#allocation12 + $0x20] sm:$0xff]  ;;  %v4088_v50 = vld [vmem:[#allocation12 + $0x18] sm:$0xff] }
 0xd8b   :  { %3947 = vmatprep.subr.mxu0 %v7315_v51  ;;  %4018 = vmatprep.subr.mxu1 %v7316_v52  ;;  %v4087_v51 = vld [vmem:[#allocation12 + $0x10] sm:$0xff]  ;;  %v4086_v52 = vld [vmem:[#allocation12 + $0x8] sm:$0xff] }
 0xd8c   :  { %3948 = vmatpush1.msra.mxu0 %v7317_v54  ;;  %4019 = vmatpush1.msra.mxu1 %v7318_v55  ;;  %v4085_v54 = vld [vmem:[#allocation12] sm:$0xff]  ;;  %v7334_v55 = vld [vmem:[#allocation66_spill] sm:$0xff] }
 0xd8d   :  { %3949 = vmatprep.subr.mxu0 %v7319_v56  ;;  %4020 = vmatprep.subr.mxu1 %v7320_v57  ;;  %v2528_v56 = vadd.f32 %v7334_v55, %v7328_v42  ;;  %v7337_v42 = vld [vmem:[#allocation70_spill] sm:$0xff] }
 0xd8e   :  { %3950 = vmatpush1.msra.mxu0 %v7321_v58  ;;  %4021 = vmatpush1.msra.mxu1 %v7322_v6  ;;  %v7335_v58 = vld [vmem:[#allocation69_spill] sm:$0xff] }
 0xd8f   :  { %3951 = vmatprep.subr.mxu0 %v7323_v15  ;;  %4022 = vmatprep.subr.mxu1 %v7324_v0  ;;  %v2530_v6 = vadd.f32 %v7335_v58, %v7330_v53 }
 0xd90   :  { %3952 = vmatpush1.msra.mxu0 %v7325_v3  ;;  %3985 = vmatprep.mubr.f32.mxu0 %v7326_v61 }
 0xd91   :  { %4023 = vmatpush1.msra.mxu1 %v7327_v11  ;;  %4056 = vmatprep.mubr.f32.mxu1 %v7326_v61  ;;  %v7336_v11 = vld [vmem:[#allocation39_spill] sm:$0xff] }
 0xd92   :  { %4237 = vmatprep.subr.mxu0 %v7326_v61  ;;  %v2641_v44 = vadd.f32 %v7336_v11, %v6056_v22 }
 0xe31   :  { %v3819_v10 = vpop.f32.mrf.mxu0  ;;  %v3890_v8 = vpop.f32.mrf.mxu1 }
 0xe32   :  { %v3895_v9 = vadd.f32 %v3819_v10, %v2522_v14  ;;  %v3897_v12 = vadd.f32 %v3890_v8, %v2635_v62 }
 0xe33   :  { %v3821_v4 = vpop.f32.mrf.mxu0  ;;  %v3892_v39 = vpop.f32.mrf.mxu1 }
 0xe34   :  { %v3899_v35 = vmul.f32 0.5, %v3895_v9  ;;  %v3896_v19 = vadd.f32 %v3821_v4, %v2524_v60  ;;  %v3898_v31 = vadd.f32 %v3892_v39, %v2637_v27  ;;  %v2643_v9 = vadd.f32 %v7337_v42, %v6062_v43 }
 0xe36   :  { %4424 = vtanh.f32 %v3899_v35  ;;  %v3903_v18 = vmul.f32 0.5, %v3896_v19  ;;  %v3908_v17 = vmul.f32 0.5, %v3898_v31 }
 0xe38   :  { %4426 = vtanh.f32 %v3903_v18 }
 0xe39   :  { %4428 = vtanh.f32 %v3897_v12 }
 0xe3a   :  { %4430 = vtanh.f32 %v3908_v17 }
 0xe43   :  { %v4425_v59 = vpop.eup %4424 }
 0xe44   :  { %v3901_v45 = vmul.f32 0.5, %v4425_v59 }
 0xe45   :  { %v4427_v16 = vpop.eup %4426 }
 0xe46   :  { %v3902_v25 = vadd.f32 0.5, %v3901_v45  ;;  %v3905_v40 = vmul.f32 0.5, %v4427_v16  ;;  %v4429_v1 = vpop.eup %4428  ;;  %v4219_v45 = vld [vmem:[%s6702_s8] ss:$0 sm:$0xff] }
 0xe47   :  { %v4431_v26 = vpop.eup %4430 }
 0xe48   :  { %v3906_v21 = vadd.f32 0.5, %v3905_v40  ;;  %v3913_v34 = vmul.f32 %v4429_v1, %v3902_v25  ;;  %v3910_v29 = vmul.f32 0.5, %v4431_v26 }
 0xe4a   :  { %v3912_v13 = vmul.f32 %v3906_v21, %v6583_v37  ;;  %v3911_v23 = vadd.f32 0.5, %v3910_v29  ;;  %v4098_v37 = vld [vmem:[#allocation12 + $0x68] sm:$0xff] }
 0xe4c   :  { %v6660_v38 = vadd.f32 %v3913_v34, %v3912_v13 }
 0xe4e   :  { %4432 = vtanh.f32 %v6660_v38 }
 0xe5b   :  { %v4433_v28 = vpop.eup %4432 }
 0xe5c   :  { %v3916_v5 = vmul.f32 %v4433_v28, %v3911_v23 }
 0xe5e   :  { %3986 = vmatmul.mubr.f32.vlgmr.msra.gmra.mxu0 %v3916_v5  ;;  %4057 = vmatmul.mubr.f32.vlgmr.msra.gmra.mxu1 %v3916_v5 }
 0xe5f   :  { %4238 = vmatpush3.msra.mxu0 %v4100_v32  ;;  %4269 = vmatprep.mubr.msk.f32.mxu0 %vm4646_vm1, %v7326_v61 }
 0xe60   :  { %4239 = vmatprep.subr.mxu0 %v7326_v61 }
 0xe61   :  { %4240 = vmatpush3.msra.mxu0 %v4099_v24 }
 0xe62   :  { %4241 = vmatprep.subr.mxu0 %v7326_v61 }
 0xe63   :  { %4242 = vmatpush3.msra.mxu0 %v4098_v37 }
 0xe64   :  { %4243 = vmatprep.subr.mxu0 %v7326_v61 }
 0xe65   :  { %4244 = vmatpush3.msra.mxu0 %v4097_v33 }
 0xe66   :  { %4245 = vmatprep.subr.mxu0 %v7326_v61 }
 0xe67   :  { %4246 = vmatpush3.msra.mxu0 %v4096_v41 }
 0xe68   :  { %4247 = vmatprep.subr.mxu0 %v7326_v61 }
 0xe69   :  { %4248 = vmatpush3.msra.mxu0 %v4095_v63 }
 0xe6a   :  { %4249 = vmatprep.subr.mxu0 %v7326_v61 }
 0xe6b   :  { %4250 = vmatpush3.msra.mxu0 %v4094_v30 }
 0xe6c   :  { %4251 = vmatprep.subr.mxu0 %v7326_v61 }
 0xe6d   :  { %4252 = vmatpush3.msra.mxu0 %v4093_v46 }
 0xe6e   :  { %4253 = vmatprep.subr.mxu0 %v7326_v61 }
 0xe6f   :  { %4254 = vmatpush3.msra.mxu0 %v4092_v36 }
 0xe70   :  { %4255 = vmatprep.subr.mxu0 %v7326_v61 }
 0xe71   :  { %4256 = vmatpush3.msra.mxu0 %v4091_v47 }
 0xe72   :  { %4257 = vmatprep.subr.mxu0 %v7326_v61 }
 0xe73   :  { %4258 = vmatpush3.msra.mxu0 %v4090_v48 }
 0xe74   :  { %4259 = vmatprep.subr.mxu0 %v7326_v61 }
 0xe75   :  { %4260 = vmatpush3.msra.mxu0 %v4089_v49 }
 0xe76   :  { %4261 = vmatprep.subr.mxu0 %v7326_v61 }
 0xe77   :  { %4262 = vmatpush3.msra.mxu0 %v4088_v50 }
 0xe78   :  { %4263 = vmatprep.subr.mxu0 %v7326_v61 }
 0xe79   :  { %4264 = vmatpush3.msra.mxu0 %v4087_v51 }
 0xe7a   :  { %4265 = vmatprep.subr.mxu0 %v7326_v61 }
 0xe7b   :  { %4266 = vmatpush3.msra.mxu0 %v4086_v52 }
 0xe7c   :  { %4267 = vmatprep.subr.mxu0 %v7326_v61 }
 0xe7d   :  { %4268 = vmatpush3.msra.mxu0 %v4085_v54 }
 0xf1e   :  { %v3987_v57 = vpop.f32.mrf.mxu0  ;;  %v4058_v0 = vpop.f32.mrf.mxu1 }
 0xf1f   :  { %v4063_v15 = vadd.f32 %v3987_v57, %v2528_v56  ;;  %v4065_v2 = vadd.f32 %v4058_v0, %v2641_v44 }
 0xf20   :  { %v3989_v3 = vpop.f32.mrf.mxu0  ;;  %v4060_v61 = vpop.f32.mrf.mxu1 }
 0xf21   :  { %v4067_v14 = vmul.f32 0.5, %v4063_v15  ;;  %v4064_v10 = vadd.f32 %v3989_v3, %v2530_v6  ;;  %v4066_v8 = vadd.f32 %v4060_v61, %v2643_v9 }
 0xf23   :  { %4434 = vtanh.f32 %v4067_v14  ;;  %v4071_v60 = vmul.f32 0.5, %v4064_v10  ;;  %v4076_v4 = vmul.f32 0.5, %v4066_v8 }
 0xf25   :  { %4436 = vtanh.f32 %v4071_v60 }
 0xf26   :  { %4438 = vtanh.f32 %v4065_v2 }
 0xf27   :  { %4440 = vtanh.f32 %v4076_v4 }
 0xf30   :  { %v4435_v53 = vpop.eup %4434 }
 0xf31   :  { %v4069_v7 = vmul.f32 0.5, %v4435_v53 }
 0xf32   :  { %v4437_v62 = vpop.eup %4436 }
 0xf33   :  { %v4070_v35 = vadd.f32 0.5, %v4069_v7  ;;  %v4073_v19 = vmul.f32 0.5, %v4437_v62  ;;  %v4439_v22 = vpop.eup %4438 }
 0xf34   :  { %v4441_v27 = vpop.eup %4440 }
 0xf35   :  { %v4074_v12 = vadd.f32 0.5, %v4073_v19  ;;  %v4081_v18 = vmul.f32 %v4439_v22, %v4070_v35  ;;  %v4078_v31 = vmul.f32 0.5, %v4441_v27 }
 0xf37   :  { %v4080_v39 = vmul.f32 %v4074_v12, %v6660_v38  ;;  %v4079_v17 = vadd.f32 0.5, %v4078_v31 }
 0xf39   :  { %v4082_v20 = vadd.f32 %v4081_v18, %v4080_v39 }
 0xf3b   :  { %4442 = vtanh.f32 %v4082_v20 }
 0xf48   :  { %v4443_v59 = vpop.eup %4442 }
 0xf49   :  { %v4084_v43 = vmul.f32 %v4443_v59, %v4079_v17 }
 0xf4b   :  { %4270 = vmatmul.mubr.f32.vlgmr.msra.gmra.mxu0 %v4084_v43 }
0x100b   :  { %v4174_v16 = vpop.f32.mrf.mxu0 }
0x100c   :  { %v4175_v25 = vadd.f32 %v4219_v45, %v4174_v16 }
0x100d   :  { %v4271_v40 = vpop.f32.mrf.mxu0 }
0x100e   :  { %4178 = vst [vmem:[#allocation13] sm:$0xff] %v4175_v25 }
0x100f   :  { %4619 = shalt.err (!%p4616_p1)
}
0x1010   :  { %4188 = dma.vmem_to_hbm [thread:$0]  %s4186_s30, 128, %s6703_s9, [#allocation6]  }
0x1011   :  { %4634 = dma.done.wait [#allocation6], 128  }
0x1012   :  { %4635 = vsyncadd [#allocation6], 4294967168 }
0x1013   :  { %4192 = vsyncpa [#allocation5], 1 }
0x1014   :  { %4193 = vsyncpa [#allocation8], 1 }
0x1015   :  { %4194 = vsyncpa [#allocation11], 1 }
0x1016   :  { %4195 = vsyncpa [#allocation6], 1 }

</bundles_post_ra>
